<compile_context>
chip_gen: v7x
topology: tpu7x:2x2x1
jax: 0.10.0
libtpu: 0.0.40
codegen_flags: <defaults>
</compile_context>

<pallas_src>
import functools

import jax
import jax.numpy as jnp
from jax.experimental import pallas as pl
from jax.experimental.pallas import tpu as pltpu


# --------------------------------------------------------------------------
# Fused Pallas kernel
# --------------------------------------------------------------------------

def _fused_forward_kernel(patches_ref, convw_ref, pool_ref, whead_ref, bhead_ref,
                          w1_ref, w2_ref, w3_ref, g1_ref, b1_ref, g2_ref, b2_ref,
                          loc_ref, scale_ref, losses_ref,
                          *, n_view, rep_dim, lambda_bt, lambda_reg, lambda_unc):
    """Whole BarlowTwins forward for both views (concatenated along batch).

    patches: (2B*HW, Cin*9)   im2col patches of both views
    convw:   (Cin*9, D)       conv weight as matmul
    pool:    (2B, 2B*HW)      block-diagonal 1/HW mean-pool matrix (MXU pool)
    whead:   (D, D+1)         fused [loc | scale] head
    bhead:   (1, D+1)         fused head bias (zeros for loc, b_scale for scale)
    w1/w2/w3, g1/b1/g2/b2:    projector MLP weights + BN affine params

    outputs:
    loc:    (2B, D)  unit-norm powerspherical loc
    scale:  (2B, 1)  concentration (softplus + 1)
    losses: (3,)     [ssl, regularizer, uncertainty] scalars in SMEM
    """
    f32 = jnp.float32

    # ---- Backbone: conv-as-matmul + ReLU + mean-pool (all on the MXU) -------
    y = jnp.dot(patches_ref[...], convw_ref[...], preferred_element_type=f32)
    y = jnp.maximum(y, 0.0)                                          # (2B*HW, D)
    feats = jnp.dot(pool_ref[...], y, preferred_element_type=f32)    # (2B, D)

    # ---- Probabilistic_Layer('powerspherical'): fused loc|scale head --------
    hs = jnp.dot(feats, whead_ref[...], preferred_element_type=f32) + bhead_ref[...]
    loc_raw = hs[:, :rep_dim]                                        # (2B, D)
    scale_raw = hs[:, rep_dim:]                                      # (2B, 1)
    inv_norm = jax.lax.rsqrt(
        jnp.sum(loc_raw * loc_raw, axis=-1, keepdims=True) + 1e-12)
    loc = loc_raw * inv_norm
    kappa = jax.nn.softplus(scale_raw) + 1.0
    loc_ref[...] = loc
    scale_ref[...] = kappa

    # ---- Projector MLP (Linear->BN->ReLU x2 -> Linear), BN stats PER VIEW ---
    def _standardize(v):
        mu = jnp.mean(v, axis=0, keepdims=True)
        var = jnp.mean((v - mu) ** 2, axis=0, keepdims=True)
        return (v - mu) * jax.lax.rsqrt(var + 1e-5)

    def bn_per_view(x, g, b):
        xa = _standardize(x[:n_view])          # view 1 rows
        xb = _standardize(x[n_view:])          # view 2 rows
        return jnp.concatenate([xa, xb], axis=0) * g + b

    # loc-warmup path: z = dist.loc
    h = jnp.dot(loc, w1_ref[...], preferred_element_type=f32)
    h = jnp.maximum(bn_per_view(h, g1_ref[...], b1_ref[...]), 0.0)
    h = jnp.dot(h, w2_ref[...], preferred_element_type=f32)
    h = jnp.maximum(bn_per_view(h, g2_ref[...], b2_ref[...]), 0.0)
    p = jnp.dot(h, w3_ref[...], preferred_element_type=f32)          # (2B, Dp)

    # ---- BT loss: c = BN(p1).T @ BN(p2) / N ----------------------------------
    z1 = _standardize(p[:n_view])
    z2 = _standardize(p[n_view:])
    inv_n = 1.0 / float(n_view)
    # contraction over batch axis (dim 0 of both) -> no explicit XLU transpose
    c = jax.lax.dot_general(z1, z2, (((0,), (0,)), ((), ())),
                            preferred_element_type=f32) * inv_n      # (Dp, Dp)
    diag = jnp.sum(z1 * z2, axis=0, keepdims=True) * inv_n           # (1, Dp)
    on_diag = jnp.sum((diag - 1.0) ** 2, keepdims=True)              # (1, 1)
    off_diag = (jnp.sum(c * c, keepdims=True)
                - jnp.sum(diag * diag, keepdims=True))               # (1, 1)
    ssl = on_diag + lambda_bt * off_diag
    losses_ref[0] = ssl[0, 0]

    # ---- Probabilistic_Regularizer (lambda_reg defaults to 0) ---------------
    # TODO(synk): exact Probabilistic_Regularizer definition not provided
    # upstream; with the module default lambda_reg=0 this term is exactly zero.
    k1 = kappa[:n_view]
    k2 = kappa[n_view:]
    reg = lambda_reg * (jnp.mean(k1, keepdims=True) + jnp.mean(k2, keepdims=True))
    losses_ref[1] = reg[0, 0]

    # ---- UncertaintyLoss -----------------------------------------------------
    # TODO(synk): exact UncertaintyLoss definition not provided upstream; using
    # Pearson correlation between summed concentration and view cosine-sim.
    loc1 = loc[:n_view]
    loc2 = loc[n_view:]
    sim = jnp.sum(loc1 * loc2, axis=-1, keepdims=True)               # (B, 1)
    kap = k1 + k2                                                    # (B, 1)
    sim_c = sim - jnp.mean(sim, keepdims=True)
    kap_c = kap - jnp.mean(kap, keepdims=True)
    cov = jnp.mean(sim_c * kap_c, keepdims=True)
    denom = jnp.sqrt(jnp.mean(sim_c ** 2, keepdims=True)
                     * jnp.mean(kap_c ** 2, keepdims=True) + 1e-12)
    unc = lambda_unc * cov / denom
    losses_ref[2] = unc[0, 0]


# --------------------------------------------------------------------------
# pallas_call wrapper (whole arrays resident in VMEM -- working set ~5 MiB)
# --------------------------------------------------------------------------

def _vmem_spec():
    return pl.BlockSpec(memory_space=pltpu.MemorySpace.VMEM)


def _smem_spec():
    return pl.BlockSpec(memory_space=pltpu.MemorySpace.SMEM)


def barlow_twins_fused(params, patches_both, pool_mat, n_view,
                       *, lambda_bt, lambda_reg, lambda_unc):
    two_b = 2 * n_view
    rep_dim = params["w_head"].shape[0]
    kernel = functools.partial(
        _fused_forward_kernel,
        n_view=n_view, rep_dim=rep_dim,
        lambda_bt=lambda_bt, lambda_reg=lambda_reg, lambda_unc=lambda_unc)
    out_shapes = (
        jax.ShapeDtypeStruct((two_b, rep_dim), jnp.float32),   # loc
        jax.ShapeDtypeStruct((two_b, 1), jnp.float32),         # scale (kappa)
        jax.ShapeDtypeStruct((3,), jnp.float32),               # [ssl, reg, unc]
    )
    return pl.pallas_call(
        kernel,
        out_shape=out_shapes,
        in_specs=[_vmem_spec()] * 12,
        out_specs=(_vmem_spec(), _vmem_spec(), _smem_spec()),
        compiler_params=pltpu.CompilerParams(vmem_limit_bytes=32 * 1024 * 1024),
    )(patches_both,
      params["conv_w_mat"], pool_mat,
      params["w_head"], params["b_head"],
      params["proj_w1"], params["proj_w2"], params["proj_w3"],
      params["proj_g1"], params["proj_b1"], params["proj_g2"], params["proj_b2"])


# --------------------------------------------------------------------------
# Host-side glue: im2col, pooling matrix, parameter setup, forward
# --------------------------------------------------------------------------

def im2col_3x3(x_nchw):
    """x: (N, C, H, W) NCHW -> patches (N*H*W, C*9); padding=1, stride=1."""
    N, C, H, W = x_nchw.shape
    xp = jnp.pad(x_nchw, ((0, 0), (0, 0), (1, 1), (1, 1)))
    cols = []
    for di in range(3):
        for dj in range(3):
            cols.append(xp[:, :, di:di + H, dj:dj + W])
    patches = jnp.stack(cols, axis=2)               # (N, C, 9, H, W)
    patches = patches.transpose(0, 3, 4, 1, 2)      # (N, H, W, C, 9)
    return patches.reshape(N * H * W, C * 9).astype(jnp.float32)


def mean_pool_matrix(n_rows, p):
    """Block-diagonal (n_rows, n_rows*p) matrix of 1/p -> exact mean over p."""
    row = jnp.arange(n_rows, dtype=jnp.int32)[:, None]
    col = jnp.arange(n_rows * p, dtype=jnp.int32)[None, :] // p
    return (row == col).astype(jnp.float32) / float(p)


def init_params(key, in_ch=4, rep_dim=32, hidden=(32, 32, 32)):
    ks = jax.random.split(key, 8)
    conv_w = jax.random.normal(ks[0], (rep_dim, in_ch, 3, 3), jnp.float32) * 0.1
    w_loc = jax.random.normal(ks[1], (rep_dim, rep_dim), jnp.float32) * 0.1
    w_scale = jax.random.normal(ks[2], (rep_dim, 1), jnp.float32) * 0.1
    b_head = jnp.concatenate([jnp.zeros((1, rep_dim), jnp.float32),
                              jnp.ones((1, 1), jnp.float32)], axis=1)
    return {
        # conv weight flattened to matmul form: (Cin*9, Cout)
        "conv_w_mat": conv_w.reshape(rep_dim, in_ch * 9).T,
        # fused probabilistic head: [w_loc | w_scale] and its bias row
        "w_head": jnp.concatenate([w_loc, w_scale], axis=1),     # (D, D+1)
        "b_head": b_head,                                        # (1, D+1)
        # Projector MLP (bias=False) + BN affine params
        "proj_w1": jax.random.normal(ks[3], (rep_dim, hidden[0]), jnp.float32) * 0.1,
        "proj_w2": jax.random.normal(ks[4], (hidden[0], hidden[1]), jnp.float32) * 0.1,
        "proj_w3": jax.random.normal(ks[5], (hidden[1], hidden[2]), jnp.float32) * 0.1,
        "proj_g1": jnp.ones((1, hidden[0]), jnp.float32),
        "proj_b1": jnp.zeros((1, hidden[0]), jnp.float32),
        "proj_g2": jnp.ones((1, hidden[1]), jnp.float32),
        "proj_b2": jnp.zeros((1, hidden[1]), jnp.float32),
    }


def barlow_twins_forward(params, x1, x2, epoch, *,
                         lambda_bt=0.0051, lambda_reg=0.0,
                         lambda_unc=0.001, loc_warmup=1):
    # BT_Loss path. epoch < loc_warmup -> distributions' loc used directly.
    # TODO(synk): power-spherical rsample (reparameterized Beta + Householder
    # sampling) has no clean Pallas equivalent here; only the loc-warmup path.
    if epoch >= loc_warmup:
        raise NotImplementedError("rsample path not implemented")

    B = x1.shape[0]
    H, W = x1.shape[2], x1.shape[3]

    x_both = jnp.concatenate([x1, x2], axis=0)          # (2B, C, H, W)
    patches = im2col_3x3(x_both)                        # (2B*HW, C*9)
    pool_mat = mean_pool_matrix(2 * B, H * W)           # (2B, 2B*HW)

    loc, kappa, losses = barlow_twins_fused(
        params, patches, pool_mat, B,
        lambda_bt=lambda_bt, lambda_reg=lambda_reg, lambda_unc=lambda_unc)

    loc1, loc2 = loc[:B], loc[B:]
    s1, s2 = kappa[:B], kappa[B:]
    ssl_loss, var_reg = losses[0], losses[1]
    unc_loss = losses[2] if lambda_unc != 0.0 else jnp.float32(0.0)
    return ssl_loss, var_reg, unc_loss, ((loc1, s1), (loc2, s2))


# --------------------------------------------------------------------------
# Main
# --------------------------------------------------------------------------

if __name__ == "__main__":
    key = jax.random.PRNGKey(0)
    kp, k1, k2 = jax.random.split(key, 3)

    B, C, H, W = 8, 4, 16, 16          # two augmented views, NCHW
    x1 = jax.random.normal(k1, (B, C, H, W), jnp.float32)
    x2 = jax.random.normal(k2, (B, C, H, W), jnp.float32)

    params = init_params(kp, in_ch=C, rep_dim=32, hidden=(32, 32, 32))

    ssl_loss, var_reg, unc_loss, (d1, d2) = barlow_twins_forward(
        params, x1, x2, epoch=0)

    jax.block_until_ready((ssl_loss, var_reg, unc_loss, d1, d2))
    print("KERNEL_OK")
</pallas_src>

<mosaic_0001>
module attributes {stable_mosaic.version = 11 : i64} {
  func.func @_fused_forward_kernel(%arg0: memref<4096x36xf32, #tpu.memory_space<vmem>>, %arg1: memref<36x32xf32, #tpu.memory_space<vmem>>, %arg2: memref<16x4096xf32, #tpu.memory_space<vmem>>, %arg3: memref<32x33xf32, #tpu.memory_space<vmem>>, %arg4: memref<1x33xf32, #tpu.memory_space<vmem>>, %arg5: memref<32x32xf32, #tpu.memory_space<vmem>>, %arg6: memref<32x32xf32, #tpu.memory_space<vmem>>, %arg7: memref<32x32xf32, #tpu.memory_space<vmem>>, %arg8: memref<1x32xf32, #tpu.memory_space<vmem>>, %arg9: memref<1x32xf32, #tpu.memory_space<vmem>>, %arg10: memref<1x32xf32, #tpu.memory_space<vmem>>, %arg11: memref<1x32xf32, #tpu.memory_space<vmem>>, %arg12: memref<16x32xf32, #tpu.memory_space<vmem>>, %arg13: memref<16x1xf32, #tpu.memory_space<vmem>>, %arg14: memref<3xf32, #tpu.memory_space<smem>>) attributes {dimension_semantics = [], scalar_prefetch = 0 : i64, scratch_operands = 0 : i64, tpu.core_type = #tpu.core_type<tc>} {
    %c0 = arith.constant 0 : index
    %c0_0 = arith.constant 0 : index
    %0 = vector.load %arg0[%c0, %c0_0] : memref<4096x36xf32, #tpu.memory_space<vmem>>, vector<4096x36xf32>
    %c0_1 = arith.constant 0 : index
    %c0_2 = arith.constant 0 : index
    %1 = vector.load %arg1[%c0_1, %c0_2] : memref<36x32xf32, #tpu.memory_space<vmem>>, vector<36x32xf32>
    %cst = arith.constant dense<0.000000e+00> : vector<4096x32xf32>
    %2 = tpu.matmul %0, %1, %cst {dimension_numbers = #tpu.dot_dimension_numbers<[1], [0], [0], [1], [0, 0, 1, 1], [], []>} : vector<4096x36xf32>, vector<36x32xf32>, vector<4096x32xf32> -> vector<4096x32xf32>
    %cst_3 = arith.constant 0.000000e+00 : f32
    %3 = vector.broadcast %cst_3 : f32 to vector<4096x32xf32>
    %4 = arith.maximumf %2, %3 : vector<4096x32xf32>
    %c0_4 = arith.constant 0 : index
    %c0_5 = arith.constant 0 : index
    %5 = vector.load %arg2[%c0_4, %c0_5] : memref<16x4096xf32, #tpu.memory_space<vmem>>, vector<16x4096xf32>
    %cst_6 = arith.constant dense<0.000000e+00> : vector<16x32xf32>
    %6 = tpu.matmul %5, %4, %cst_6 {dimension_numbers = #tpu.dot_dimension_numbers<[1], [0], [0], [1], [0, 0, 1, 1], [], []>} : vector<16x4096xf32>, vector<4096x32xf32>, vector<16x32xf32> -> vector<16x32xf32>
    %c0_7 = arith.constant 0 : index
    %c0_8 = arith.constant 0 : index
    %7 = vector.load %arg3[%c0_7, %c0_8] : memref<32x33xf32, #tpu.memory_space<vmem>>, vector<32x33xf32>
    %cst_9 = arith.constant dense<0.000000e+00> : vector<16x33xf32>
    %8 = tpu.matmul %6, %7, %cst_9 {dimension_numbers = #tpu.dot_dimension_numbers<[1], [0], [0], [1], [0, 0, 1, 1], [], []>} : vector<16x32xf32>, vector<32x33xf32>, vector<16x33xf32> -> vector<16x33xf32>
    %c0_10 = arith.constant 0 : index
    %c0_11 = arith.constant 0 : index
    %9 = vector.load %arg4[%c0_10, %c0_11] : memref<1x33xf32, #tpu.memory_space<vmem>>, vector<1x33xf32>
    %10 = vector.broadcast %9 : vector<1x33xf32> to vector<16x33xf32>
    %11 = arith.addf %8, %10 : vector<16x33xf32>
    %12 = vector.extract_strided_slice %11 {offsets = [0, 0], sizes = [16, 32], strides = [1, 1]} : vector<16x33xf32> to vector<16x32xf32>
    %13 = vector.extract_strided_slice %11 {offsets = [0, 32], sizes = [16, 1], strides = [1, 1]} : vector<16x33xf32> to vector<16x1xf32>
    %14 = arith.mulf %12, %12 : vector<16x32xf32>
    %cst_12 = arith.constant dense<0.000000e+00> : vector<16xf32>
    %15 = vector.multi_reduction <add>, %14, %cst_12 [1] : vector<16x32xf32> to vector<16xf32>
    %16 = vector.shape_cast %15 : vector<16xf32> to vector<16x1xf32>
    %cst_13 = arith.constant 9.99999996E-13 : f32
    %17 = vector.broadcast %cst_13 : f32 to vector<16x1xf32>
    %18 = arith.addf %16, %17 : vector<16x1xf32>
    %19 = math.rsqrt %18 : vector<16x1xf32>
    %20 = vector.broadcast %19 : vector<16x1xf32> to vector<16x32xf32>
    %21 = arith.mulf %12, %20 : vector<16x32xf32>
    %cst_14 = arith.constant 0.000000e+00 : f32
    %22 = vector.broadcast %cst_14 : f32 to vector<16x1xf32>
    %23 = arith.maximumf %13, %22 : vector<16x1xf32>
    %24 = vector.broadcast %cst_14 : f32 to vector<16x1xf32>
    %25 = arith.subf %13, %24 : vector<16x1xf32>
    %26 = arith.cmpf one, %25, %25 : vector<16x1xf32>
    %27 = vector.broadcast %cst_14 : f32 to vector<16x1xf32>
    %28 = arith.addf %13, %27 : vector<16x1xf32>
    %29 = math.absf %25 : vector<16x1xf32>
    %cst_15 = arith.constant 0.000000e+00 : f32
    %30 = vector.broadcast %cst_15 : f32 to vector<16x1xf32>
    %31 = arith.subf %30, %29 : vector<16x1xf32>
    %32 = math.exp %31 : vector<16x1xf32>
    %33 = math.log1p %32 : vector<16x1xf32>
    %34 = arith.addf %23, %33 : vector<16x1xf32>
    %35 = arith.select %26, %28, %34 : vector<16x1xi1>, vector<16x1xf32>
    %cst_16 = arith.constant 1.000000e+00 : f32
    %36 = vector.broadcast %cst_16 : f32 to vector<16x1xf32>
    %37 = arith.addf %35, %36 : vector<16x1xf32>
    %c0_17 = arith.constant 0 : index
    %c0_18 = arith.constant 0 : index
    %38 = vector.load %arg12[%c0_17, %c0_18] : memref<16x32xf32, #tpu.memory_space<vmem>>, vector<16x32xf32>
    tpu.vector_store %arg12[%c0_17, %c0_18], %21 {strides = array<i32>} : memref<16x32xf32, #tpu.memory_space<vmem>>, vector<16x32xf32>,
    %c0_19 = arith.constant 0 : index
    %c0_20 = arith.constant 0 : index
    %39 = vector.load %arg13[%c0_19, %c0_20] : memref<16x1xf32, #tpu.memory_space<vmem>>, vector<16x1xf32>
    tpu.vector_store %arg13[%c0_19, %c0_20], %37 {strides = array<i32>} : memref<16x1xf32, #tpu.memory_space<vmem>>, vector<16x1xf32>,
    %c0_21 = arith.constant 0 : index
    %c0_22 = arith.constant 0 : index
    %40 = vector.load %arg5[%c0_21, %c0_22] : memref<32x32xf32, #tpu.memory_space<vmem>>, vector<32x32xf32>
    %cst_23 = arith.constant dense<0.000000e+00> : vector<16x32xf32>
    %41 = tpu.matmul %21, %40, %cst_23 {dimension_numbers = #tpu.dot_dimension_numbers<[1], [0], [0], [1], [0, 0, 1, 1], [], []>} : vector<16x32xf32>, vector<32x32xf32>, vector<16x32xf32> -> vector<16x32xf32>
    %c0_24 = arith.constant 0 : index
    %c0_25 = arith.constant 0 : index
    %42 = vector.load %arg8[%c0_24, %c0_25] : memref<1x32xf32, #tpu.memory_space<vmem>>, vector<1x32xf32>
    %c0_26 = arith.constant 0 : index
    %c0_27 = arith.constant 0 : index
    %43 = vector.load %arg9[%c0_26, %c0_27] : memref<1x32xf32, #tpu.memory_space<vmem>>, vector<1x32xf32>
    %44 = vector.extract_strided_slice %41 {offsets = [0, 0], sizes = [8, 32], strides = [1, 1]} : vector<16x32xf32> to vector<8x32xf32>
    %cst_28 = arith.constant dense<0.000000e+00> : vector<32xf32>
    %45 = vector.multi_reduction <add>, %44, %cst_28 [0] : vector<8x32xf32> to vector<32xf32>
    %46 = vector.shape_cast %45 : vector<32xf32> to vector<1x32xf32>
    %cst_29 = arith.constant 8.000000e+00 : f32
    %47 = vector.broadcast %cst_29 : f32 to vector<1x32xf32>
    %48 = arith.divf %46, %47 : vector<1x32xf32>
    %49 = vector.broadcast %48 : vector<1x32xf32> to vector<8x32xf32>
    %50 = arith.subf %44, %49 : vector<8x32xf32>
    %51 = arith.mulf %50, %50 : vector<8x32xf32>
    %cst_30 = arith.constant dense<0.000000e+00> : vector<32xf32>
    %52 = vector.multi_reduction <add>, %51, %cst_30 [0] : vector<8x32xf32> to vector<32xf32>
    %53 = vector.shape_cast %52 : vector<32xf32> to vector<1x32xf32>
    %cst_31 = arith.constant 8.000000e+00 : f32
    %54 = vector.broadcast %cst_31 : f32 to vector<1x32xf32>
    %55 = arith.divf %53, %54 : vector<1x32xf32>
    %56 = vector.broadcast %48 : vector<1x32xf32> to vector<8x32xf32>
    %57 = arith.subf %44, %56 : vector<8x32xf32>
    %cst_32 = arith.constant 9.99999974E-6 : f32
    %58 = vector.broadcast %cst_32 : f32 to vector<1x32xf32>
    %59 = arith.addf %55, %58 : vector<1x32xf32>
    %60 = math.rsqrt %59 : vector<1x32xf32>
    %61 = vector.broadcast %60 : vector<1x32xf32> to vector<8x32xf32>
    %62 = arith.mulf %57, %61 : vector<8x32xf32>
    %63 = vector.extract_strided_slice %41 {offsets = [8, 0], sizes = [8, 32], strides = [1, 1]} : vector<16x32xf32> to vector<8x32xf32>
    %cst_33 = arith.constant dense<0.000000e+00> : vector<32xf32>
    %64 = vector.multi_reduction <add>, %63, %cst_33 [0] : vector<8x32xf32> to vector<32xf32>
    %65 = vector.shape_cast %64 : vector<32xf32> to vector<1x32xf32>
    %cst_34 = arith.constant 8.000000e+00 : f32
    %66 = vector.broadcast %cst_34 : f32 to vector<1x32xf32>
    %67 = arith.divf %65, %66 : vector<1x32xf32>
    %68 = vector.broadcast %67 : vector<1x32xf32> to vector<8x32xf32>
    %69 = arith.subf %63, %68 : vector<8x32xf32>
    %70 = arith.mulf %69, %69 : vector<8x32xf32>
    %cst_35 = arith.constant dense<0.000000e+00> : vector<32xf32>
    %71 = vector.multi_reduction <add>, %70, %cst_35 [0] : vector<8x32xf32> to vector<32xf32>
    %72 = vector.shape_cast %71 : vector<32xf32> to vector<1x32xf32>
    %cst_36 = arith.constant 8.000000e+00 : f32
    %73 = vector.broadcast %cst_36 : f32 to vector<1x32xf32>
    %74 = arith.divf %72, %73 : vector<1x32xf32>
    %75 = vector.broadcast %67 : vector<1x32xf32> to vector<8x32xf32>
    %76 = arith.subf %63, %75 : vector<8x32xf32>
    %cst_37 = arith.constant 9.99999974E-6 : f32
    %77 = vector.broadcast %cst_37 : f32 to vector<1x32xf32>
    %78 = arith.addf %74, %77 : vector<1x32xf32>
    %79 = math.rsqrt %78 : vector<1x32xf32>
    %80 = vector.broadcast %79 : vector<1x32xf32> to vector<8x32xf32>
    %81 = arith.mulf %76, %80 : vector<8x32xf32>
    %82 = tpu.concatenate %62, %81 in 0 : vector<8x32xf32>, vector<8x32xf32> -> vector<16x32xf32>
    %83 = vector.broadcast %42 : vector<1x32xf32> to vector<16x32xf32>
    %84 = arith.mulf %82, %83 : vector<16x32xf32>
    %85 = vector.broadcast %43 : vector<1x32xf32> to vector<16x32xf32>
    %86 = arith.addf %84, %85 : vector<16x32xf32>
    %cst_38 = arith.constant 0.000000e+00 : f32
    %87 = vector.broadcast %cst_38 : f32 to vector<16x32xf32>
    %88 = arith.maximumf %86, %87 : vector<16x32xf32>
    %c0_39 = arith.constant 0 : index
    %c0_40 = arith.constant 0 : index
    %89 = vector.load %arg6[%c0_39, %c0_40] : memref<32x32xf32, #tpu.memory_space<vmem>>, vector<32x32xf32>
    %cst_41 = arith.constant dense<0.000000e+00> : vector<16x32xf32>
    %90 = tpu.matmul %88, %89, %cst_41 {dimension_numbers = #tpu.dot_dimension_numbers<[1], [0], [0], [1], [0, 0, 1, 1], [], []>} : vector<16x32xf32>, vector<32x32xf32>, vector<16x32xf32> -> vector<16x32xf32>
    %c0_42 = arith.constant 0 : index
    %c0_43 = arith.constant 0 : index
    %91 = vector.load %arg10[%c0_42, %c0_43] : memref<1x32xf32, #tpu.memory_space<vmem>>, vector<1x32xf32>
    %c0_44 = arith.constant 0 : index
    %c0_45 = arith.constant 0 : index
    %92 = vector.load %arg11[%c0_44, %c0_45] : memref<1x32xf32, #tpu.memory_space<vmem>>, vector<1x32xf32>
    %93 = vector.extract_strided_slice %90 {offsets = [0, 0], sizes = [8, 32], strides = [1, 1]} : vector<16x32xf32> to vector<8x32xf32>
    %cst_46 = arith.constant dense<0.000000e+00> : vector<32xf32>
    %94 = vector.multi_reduction <add>, %93, %cst_46 [0] : vector<8x32xf32> to vector<32xf32>
    %95 = vector.shape_cast %94 : vector<32xf32> to vector<1x32xf32>
    %cst_47 = arith.constant 8.000000e+00 : f32
    %96 = vector.broadcast %cst_47 : f32 to vector<1x32xf32>
    %97 = arith.divf %95, %96 : vector<1x32xf32>
    %98 = vector.broadcast %97 : vector<1x32xf32> to vector<8x32xf32>
    %99 = arith.subf %93, %98 : vector<8x32xf32>
    %100 = arith.mulf %99, %99 : vector<8x32xf32>
    %cst_48 = arith.constant dense<0.000000e+00> : vector<32xf32>
    %101 = vector.multi_reduction <add>, %100, %cst_48 [0] : vector<8x32xf32> to vector<32xf32>
    %102 = vector.shape_cast %101 : vector<32xf32> to vector<1x32xf32>
    %cst_49 = arith.constant 8.000000e+00 : f32
    %103 = vector.broadcast %cst_49 : f32 to vector<1x32xf32>
    %104 = arith.divf %102, %103 : vector<1x32xf32>
    %105 = vector.broadcast %97 : vector<1x32xf32> to vector<8x32xf32>
    %106 = arith.subf %93, %105 : vector<8x32xf32>
    %cst_50 = arith.constant 9.99999974E-6 : f32
    %107 = vector.broadcast %cst_50 : f32 to vector<1x32xf32>
    %108 = arith.addf %104, %107 : vector<1x32xf32>
    %109 = math.rsqrt %108 : vector<1x32xf32>
    %110 = vector.broadcast %109 : vector<1x32xf32> to vector<8x32xf32>
    %111 = arith.mulf %106, %110 : vector<8x32xf32>
    %112 = vector.extract_strided_slice %90 {offsets = [8, 0], sizes = [8, 32], strides = [1, 1]} : vector<16x32xf32> to vector<8x32xf32>
    %cst_51 = arith.constant dense<0.000000e+00> : vector<32xf32>
    %113 = vector.multi_reduction <add>, %112, %cst_51 [0] : vector<8x32xf32> to vector<32xf32>
    %114 = vector.shape_cast %113 : vector<32xf32> to vector<1x32xf32>
    %cst_52 = arith.constant 8.000000e+00 : f32
    %115 = vector.broadcast %cst_52 : f32 to vector<1x32xf32>
    %116 = arith.divf %114, %115 : vector<1x32xf32>
    %117 = vector.broadcast %116 : vector<1x32xf32> to vector<8x32xf32>
    %118 = arith.subf %112, %117 : vector<8x32xf32>
    %119 = arith.mulf %118, %118 : vector<8x32xf32>
    %cst_53 = arith.constant dense<0.000000e+00> : vector<32xf32>
    %120 = vector.multi_reduction <add>, %119, %cst_53 [0] : vector<8x32xf32> to vector<32xf32>
    %121 = vector.shape_cast %120 : vector<32xf32> to vector<1x32xf32>
    %cst_54 = arith.constant 8.000000e+00 : f32
    %122 = vector.broadcast %cst_54 : f32 to vector<1x32xf32>
    %123 = arith.divf %121, %122 : vector<1x32xf32>
    %124 = vector.broadcast %116 : vector<1x32xf32> to vector<8x32xf32>
    %125 = arith.subf %112, %124 : vector<8x32xf32>
    %cst_55 = arith.constant 9.99999974E-6 : f32
    %126 = vector.broadcast %cst_55 : f32 to vector<1x32xf32>
    %127 = arith.addf %123, %126 : vector<1x32xf32>
    %128 = math.rsqrt %127 : vector<1x32xf32>
    %129 = vector.broadcast %128 : vector<1x32xf32> to vector<8x32xf32>
    %130 = arith.mulf %125, %129 : vector<8x32xf32>
    %131 = tpu.concatenate %111, %130 in 0 : vector<8x32xf32>, vector<8x32xf32> -> vector<16x32xf32>
    %132 = vector.broadcast %91 : vector<1x32xf32> to vector<16x32xf32>
    %133 = arith.mulf %131, %132 : vector<16x32xf32>
    %134 = vector.broadcast %92 : vector<1x32xf32> to vector<16x32xf32>
    %135 = arith.addf %133, %134 : vector<16x32xf32>
    %cst_56 = arith.constant 0.000000e+00 : f32
    %136 = vector.broadcast %cst_56 : f32 to vector<16x32xf32>
    %137 = arith.maximumf %135, %136 : vector<16x32xf32>
    %c0_57 = arith.constant 0 : index
    %c0_58 = arith.constant 0 : index
    %138 = vector.load %arg7[%c0_57, %c0_58] : memref<32x32xf32, #tpu.memory_space<vmem>>, vector<32x32xf32>
    %cst_59 = arith.constant dense<0.000000e+00> : vector<16x32xf32>
    %139 = tpu.matmul %137, %138, %cst_59 {dimension_numbers = #tpu.dot_dimension_numbers<[1], [0], [0], [1], [0, 0, 1, 1], [], []>} : vector<16x32xf32>, vector<32x32xf32>, vector<16x32xf32> -> vector<16x32xf32>
    %140 = vector.extract_strided_slice %139 {offsets = [0, 0], sizes = [8, 32], strides = [1, 1]} : vector<16x32xf32> to vector<8x32xf32>
    %cst_60 = arith.constant dense<0.000000e+00> : vector<32xf32>
    %141 = vector.multi_reduction <add>, %140, %cst_60 [0] : vector<8x32xf32> to vector<32xf32>
    %142 = vector.shape_cast %141 : vector<32xf32> to vector<1x32xf32>
    %cst_61 = arith.constant 8.000000e+00 : f32
    %143 = vector.broadcast %cst_61 : f32 to vector<1x32xf32>
    %144 = arith.divf %142, %143 : vector<1x32xf32>
    %145 = vector.broadcast %144 : vector<1x32xf32> to vector<8x32xf32>
    %146 = arith.subf %140, %145 : vector<8x32xf32>
    %147 = arith.mulf %146, %146 : vector<8x32xf32>
    %cst_62 = arith.constant dense<0.000000e+00> : vector<32xf32>
    %148 = vector.multi_reduction <add>, %147, %cst_62 [0] : vector<8x32xf32> to vector<32xf32>
    %149 = vector.shape_cast %148 : vector<32xf32> to vector<1x32xf32>
    %cst_63 = arith.constant 8.000000e+00 : f32
    %150 = vector.broadcast %cst_63 : f32 to vector<1x32xf32>
    %151 = arith.divf %149, %150 : vector<1x32xf32>
    %152 = vector.broadcast %144 : vector<1x32xf32> to vector<8x32xf32>
    %153 = arith.subf %140, %152 : vector<8x32xf32>
    %cst_64 = arith.constant 9.99999974E-6 : f32
    %154 = vector.broadcast %cst_64 : f32 to vector<1x32xf32>
    %155 = arith.addf %151, %154 : vector<1x32xf32>
    %156 = math.rsqrt %155 : vector<1x32xf32>
    %157 = vector.broadcast %156 : vector<1x32xf32> to vector<8x32xf32>
    %158 = arith.mulf %153, %157 : vector<8x32xf32>
    %159 = vector.extract_strided_slice %139 {offsets = [8, 0], sizes = [8, 32], strides = [1, 1]} : vector<16x32xf32> to vector<8x32xf32>
    %cst_65 = arith.constant dense<0.000000e+00> : vector<32xf32>
    %160 = vector.multi_reduction <add>, %159, %cst_65 [0] : vector<8x32xf32> to vector<32xf32>
    %161 = vector.shape_cast %160 : vector<32xf32> to vector<1x32xf32>
    %cst_66 = arith.constant 8.000000e+00 : f32
    %162 = vector.broadcast %cst_66 : f32 to vector<1x32xf32>
    %163 = arith.divf %161, %162 : vector<1x32xf32>
    %164 = vector.broadcast %163 : vector<1x32xf32> to vector<8x32xf32>
    %165 = arith.subf %159, %164 : vector<8x32xf32>
    %166 = arith.mulf %165, %165 : vector<8x32xf32>
    %cst_67 = arith.constant dense<0.000000e+00> : vector<32xf32>
    %167 = vector.multi_reduction <add>, %166, %cst_67 [0] : vector<8x32xf32> to vector<32xf32>
    %168 = vector.shape_cast %167 : vector<32xf32> to vector<1x32xf32>
    %cst_68 = arith.constant 8.000000e+00 : f32
    %169 = vector.broadcast %cst_68 : f32 to vector<1x32xf32>
    %170 = arith.divf %168, %169 : vector<1x32xf32>
    %171 = vector.broadcast %163 : vector<1x32xf32> to vector<8x32xf32>
    %172 = arith.subf %159, %171 : vector<8x32xf32>
    %cst_69 = arith.constant 9.99999974E-6 : f32
    %173 = vector.broadcast %cst_69 : f32 to vector<1x32xf32>
    %174 = arith.addf %170, %173 : vector<1x32xf32>
    %175 = math.rsqrt %174 : vector<1x32xf32>
    %176 = vector.broadcast %175 : vector<1x32xf32> to vector<8x32xf32>
    %177 = arith.mulf %172, %176 : vector<8x32xf32>
    %cst_70 = arith.constant dense<0.000000e+00> : vector<32x32xf32>
    %178 = tpu.matmul %158, %177, %cst_70 {dimension_numbers = #tpu.dot_dimension_numbers<[0], [0], [1], [1], [0, 1, 1, 1], [], []>} : vector<8x32xf32>, vector<8x32xf32>, vector<32x32xf32> -> vector<32x32xf32>
    %cst_71 = arith.constant 1.250000e-01 : f32
    %179 = vector.broadcast %cst_71 : f32 to vector<32x32xf32>
    %180 = arith.mulf %178, %179 : vector<32x32xf32>
    %181 = arith.mulf %158, %177 : vector<8x32xf32>
    %cst_72 = arith.constant dense<0.000000e+00> : vector<32xf32>
    %182 = vector.multi_reduction <add>, %181, %cst_72 [0] : vector<8x32xf32> to vector<32xf32>
    %183 = vector.shape_cast %182 : vector<32xf32> to vector<1x32xf32>
    %cst_73 = arith.constant 1.250000e-01 : f32
    %184 = vector.broadcast %cst_73 : f32 to vector<1x32xf32>
    %185 = arith.mulf %183, %184 : vector<1x32xf32>
    %cst_74 = arith.constant 1.000000e+00 : f32
    %186 = vector.broadcast %cst_74 : f32 to vector<1x32xf32>
    %187 = arith.subf %185, %186 : vector<1x32xf32>
    %188 = arith.mulf %187, %187 : vector<1x32xf32>
    %189 = vector.shape_cast %188 : vector<1x32xf32> to vector<1x1x32xf32>
    %cst_75 = arith.constant dense<0.000000e+00> : vector<1xf32>
    %190 = vector.multi_reduction <add>, %189, %cst_75 [1, 2] : vector<1x1x32xf32> to vector<1xf32>
    %191 = vector.shape_cast %190 : vector<1xf32> to vector<1x1x1xf32>
    %192 = vector.extract %191[0, 0, 0] : f32 from vector<1x1x1xf32>
    %193 = vector.broadcast %192 : f32 to vector<1x1xf32>
    %194 = arith.mulf %180, %180 : vector<32x32xf32>
    %195 = vector.shape_cast %194 : vector<32x32xf32> to vector<1x32x32xf32>
    %cst_76 = arith.constant dense<0.000000e+00> : vector<1xf32>
    %196 = vector.multi_reduction <add>, %195, %cst_76 [1, 2] : vector<1x32x32xf32> to vector<1xf32>
    %197 = vector.shape_cast %196 : vector<1xf32> to vector<1x1x1xf32>
    %198 = vector.extract %197[0, 0, 0] : f32 from vector<1x1x1xf32>
    %199 = vector.broadcast %198 : f32 to vector<1x1xf32>
    %200 = arith.mulf %185, %185 : vector<1x32xf32>
    %201 = vector.shape_cast %200 : vector<1x32xf32> to vector<1x1x32xf32>
    %cst_77 = arith.constant dense<0.000000e+00> : vector<1xf32>
    %202 = vector.multi_reduction <add>, %201, %cst_77 [1, 2] : vector<1x1x32xf32> to vector<1xf32>
    %203 = vector.shape_cast %202 : vector<1xf32> to vector<1x1x1xf32>
    %204 = vector.extract %203[0, 0, 0] : f32 from vector<1x1x1xf32>
    %205 = vector.broadcast %204 : f32 to vector<1x1xf32>
    %206 = arith.subf %199, %205 : vector<1x1xf32>
    %cst_78 = arith.constant 5.100000e-03 : f32
    %207 = vector.broadcast %cst_78 : f32 to vector<1x1xf32>
    %208 = arith.mulf %207, %206 : vector<1x1xf32>
    %209 = arith.addf %193, %208 : vector<1x1xf32>
    %210 = vector.extract %209[0, 0] : f32 from vector<1x1xf32>
    %c0_79 = arith.constant 0 : index
    %211 = memref.load %arg14[%c0_79] : memref<3xf32, #tpu.memory_space<smem>>
    memref.store %210, %arg14[%c0_79] : memref<3xf32, #tpu.memory_space<smem>>
    %212 = vector.extract_strided_slice %37 {offsets = [0, 0], sizes = [8, 1], strides = [1, 1]} : vector<16x1xf32> to vector<8x1xf32>
    %213 = vector.extract_strided_slice %37 {offsets = [8, 0], sizes = [8, 1], strides = [1, 1]} : vector<16x1xf32> to vector<8x1xf32>
    %214 = vector.shape_cast %212 : vector<8x1xf32> to vector<1x8x1xf32>
    %cst_80 = arith.constant dense<0.000000e+00> : vector<1xf32>
    %215 = vector.multi_reduction <add>, %214, %cst_80 [1, 2] : vector<1x8x1xf32> to vector<1xf32>
    %216 = vector.shape_cast %215 : vector<1xf32> to vector<1x1x1xf32>
    %217 = vector.extract %216[0, 0, 0] : f32 from vector<1x1x1xf32>
    %218 = vector.broadcast %217 : f32 to vector<1x1xf32>
    %cst_81 = arith.constant 8.000000e+00 : f32
    %219 = vector.broadcast %cst_81 : f32 to vector<1x1xf32>
    %220 = arith.divf %218, %219 : vector<1x1xf32>
    %221 = vector.shape_cast %213 : vector<8x1xf32> to vector<1x8x1xf32>
    %cst_82 = arith.constant dense<0.000000e+00> : vector<1xf32>
    %222 = vector.multi_reduction <add>, %221, %cst_82 [1, 2] : vector<1x8x1xf32> to vector<1xf32>
    %223 = vector.shape_cast %222 : vector<1xf32> to vector<1x1x1xf32>
    %224 = vector.extract %223[0, 0, 0] : f32 from vector<1x1x1xf32>
    %225 = vector.broadcast %224 : f32 to vector<1x1xf32>
    %cst_83 = arith.constant 8.000000e+00 : f32
    %226 = vector.broadcast %cst_83 : f32 to vector<1x1xf32>
    %227 = arith.divf %225, %226 : vector<1x1xf32>
    %228 = arith.addf %220, %227 : vector<1x1xf32>
    %cst_84 = arith.constant 0.000000e+00 : f32
    %229 = vector.broadcast %cst_84 : f32 to vector<1x1xf32>
    %230 = arith.mulf %229, %228 : vector<1x1xf32>
    %231 = vector.extract %230[0, 0] : f32 from vector<1x1xf32>
    %c1 = arith.constant 1 : index
    %232 = memref.load %arg14[%c1] : memref<3xf32, #tpu.memory_space<smem>>
    memref.store %231, %arg14[%c1] : memref<3xf32, #tpu.memory_space<smem>>
    %233 = vector.extract_strided_slice %21 {offsets = [0, 0], sizes = [8, 32], strides = [1, 1]} : vector<16x32xf32> to vector<8x32xf32>
    %234 = vector.extract_strided_slice %21 {offsets = [8, 0], sizes = [8, 32], strides = [1, 1]} : vector<16x32xf32> to vector<8x32xf32>
    %235 = arith.mulf %233, %234 : vector<8x32xf32>
    %cst_85 = arith.constant dense<0.000000e+00> : vector<8xf32>
    %236 = vector.multi_reduction <add>, %235, %cst_85 [1] : vector<8x32xf32> to vector<8xf32>
    %237 = vector.shape_cast %236 : vector<8xf32> to vector<8x1xf32>
    %238 = arith.addf %212, %213 : vector<8x1xf32>
    %239 = vector.shape_cast %237 : vector<8x1xf32> to vector<1x8x1xf32>
    %cst_86 = arith.constant dense<0.000000e+00> : vector<1xf32>
    %240 = vector.multi_reduction <add>, %239, %cst_86 [1, 2] : vector<1x8x1xf32> to vector<1xf32>
    %241 = vector.shape_cast %240 : vector<1xf32> to vector<1x1x1xf32>
    %242 = vector.extract %241[0, 0, 0] : f32 from vector<1x1x1xf32>
    %243 = vector.broadcast %242 : f32 to vector<1x1xf32>
    %cst_87 = arith.constant 8.000000e+00 : f32
    %244 = vector.broadcast %cst_87 : f32 to vector<1x1xf32>
    %245 = arith.divf %243, %244 : vector<1x1xf32>
    %246 = vector.broadcast %245 : vector<1x1xf32> to vector<8x1xf32>
    %247 = arith.subf %237, %246 : vector<8x1xf32>
    %248 = vector.shape_cast %238 : vector<8x1xf32> to vector<1x8x1xf32>
    %cst_88 = arith.constant dense<0.000000e+00> : vector<1xf32>
    %249 = vector.multi_reduction <add>, %248, %cst_88 [1, 2] : vector<1x8x1xf32> to vector<1xf32>
    %250 = vector.shape_cast %249 : vector<1xf32> to vector<1x1x1xf32>
    %251 = vector.extract %250[0, 0, 0] : f32 from vector<1x1x1xf32>
    %252 = vector.broadcast %251 : f32 to vector<1x1xf32>
    %cst_89 = arith.constant 8.000000e+00 : f32
    %253 = vector.broadcast %cst_89 : f32 to vector<1x1xf32>
    %254 = arith.divf %252, %253 : vector<1x1xf32>
    %255 = vector.broadcast %254 : vector<1x1xf32> to vector<8x1xf32>
    %256 = arith.subf %238, %255 : vector<8x1xf32>
    %257 = arith.mulf %247, %256 : vector<8x1xf32>
    %258 = vector.shape_cast %257 : vector<8x1xf32> to vector<1x8x1xf32>
    %cst_90 = arith.constant dense<0.000000e+00> : vector<1xf32>
    %259 = vector.multi_reduction <add>, %258, %cst_90 [1, 2] : vector<1x8x1xf32> to vector<1xf32>
    %260 = vector.shape_cast %259 : vector<1xf32> to vector<1x1x1xf32>
    %261 = vector.extract %260[0, 0, 0] : f32 from vector<1x1x1xf32>
    %262 = vector.broadcast %261 : f32 to vector<1x1xf32>
    %cst_91 = arith.constant 8.000000e+00 : f32
    %263 = vector.broadcast %cst_91 : f32 to vector<1x1xf32>
    %264 = arith.divf %262, %263 : vector<1x1xf32>
    %265 = arith.mulf %247, %247 : vector<8x1xf32>
    %266 = vector.shape_cast %265 : vector<8x1xf32> to vector<1x8x1xf32>
    %cst_92 = arith.constant dense<0.000000e+00> : vector<1xf32>
    %267 = vector.multi_reduction <add>, %266, %cst_92 [1, 2] : vector<1x8x1xf32> to vector<1xf32>
    %268 = vector.shape_cast %267 : vector<1xf32> to vector<1x1x1xf32>
    %269 = vector.extract %268[0, 0, 0] : f32 from vector<1x1x1xf32>
    %270 = vector.broadcast %269 : f32 to vector<1x1xf32>
    %cst_93 = arith.constant 8.000000e+00 : f32
    %271 = vector.broadcast %cst_93 : f32 to vector<1x1xf32>
    %272 = arith.divf %270, %271 : vector<1x1xf32>
    %273 = arith.mulf %256, %256 : vector<8x1xf32>
    %274 = vector.shape_cast %273 : vector<8x1xf32> to vector<1x8x1xf32>
    %cst_94 = arith.constant dense<0.000000e+00> : vector<1xf32>
    %275 = vector.multi_reduction <add>, %274, %cst_94 [1, 2] : vector<1x8x1xf32> to vector<1xf32>
    %276 = vector.shape_cast %275 : vector<1xf32> to vector<1x1x1xf32>
    %277 = vector.extract %276[0, 0, 0] : f32 from vector<1x1x1xf32>
    %278 = vector.broadcast %277 : f32 to vector<1x1xf32>
    %cst_95 = arith.constant 8.000000e+00 : f32
    %279 = vector.broadcast %cst_95 : f32 to vector<1x1xf32>
    %280 = arith.divf %278, %279 : vector<1x1xf32>
    %281 = arith.mulf %272, %280 : vector<1x1xf32>
    %cst_96 = arith.constant 9.99999996E-13 : f32
    %282 = vector.broadcast %cst_96 : f32 to vector<1x1xf32>
    %283 = arith.addf %281, %282 : vector<1x1xf32>
    %284 = math.sqrt %283 : vector<1x1xf32>
    %cst_97 = arith.constant 1.000000e-03 : f32
    %285 = vector.broadcast %cst_97 : f32 to vector<1x1xf32>
    %286 = arith.mulf %285, %264 : vector<1x1xf32>
    %287 = arith.divf %286, %284 : vector<1x1xf32>
    %288 = vector.extract %287[0, 0] : f32 from vector<1x1xf32>
    %c2 = arith.constant 2 : index
    %289 = memref.load %arg14[%c2] : memref<3xf32, #tpu.memory_space<smem>>
    memref.store %288, %arg14[%c2] : memref<3xf32, #tpu.memory_space<smem>>
    return
  }
}

</mosaic_0001>

<bundles_post_ra>
// kernel: tpu_custom_call.1
= control target key start
LH: loop header
LB: loop body
LE: loop exit
PB: predicated region body
PF: predicated region fallthrough
CT: control target
= control target key end

     0   :  { %20 = vsyncpa [#allocation3], 0  ;;  %vm563_vm0 = vcmask 293888   ;;  %vm2100_vm1 = vcmask 1043456   ;;  %s13551_s0 = inlined_call_operand.vmem [shape: f32[4096,36], index: 0, kind: input, shape index: {}]   ;;  %s13552_s1 = inlined_call_operand.vmem [shape: f32[36,32], index: 1, kind: input, shape index: {}]   ;;  %s13553_s2 = inlined_call_operand.vmem [shape: f32[16,4096], index: 2, kind: input, shape index: {}]   ;;  %s13554_s3 = inlined_call_operand.vmem [shape: f32[32,33], index: 3, kind: input, shape index: {}]   ;;  %s13555_s4 = inlined_call_operand.vmem [shape: f32[1,33], index: 4, kind: input, shape index: {}]   ;;  %s13556_s5 = inlined_call_operand.vmem [shape: f32[32,32], index: 5, kind: input, shape index: {}]   ;;  %s13557_s6 = inlined_call_operand.vmem [shape: f32[32,32], index: 6, kind: input, shape index: {}]   ;;  %s13558_s7 = inlined_call_operand.vmem [shape: f32[32,32], index: 7, kind: input, shape index: {}]   ;;  %s13559_s8 = inlined_call_operand.vmem [shape: f32[1,32], index: 8, kind: input, shape index: {}]   ;;  %s13560_s9 = inlined_call_operand.vmem [shape: f32[1,32], index: 9, kind: input, shape index: {}]   ;;  %s13561_s10 = inlined_call_operand.vmem [shape: f32[1,32], index: 10, kind: input, shape index: {}]   ;;  %s13562_s11 = inlined_call_operand.vmem [shape: f32[1,32], index: 11, kind: input, shape index: {}]   ;;  %s13563_s12 = inlined_call_operand.hbm [shape: f32[16,32], index: 12, kind: output, shape index: {0}]   ;;  %s13564_s13 = inlined_call_operand.vmem [shape: f32[16,1], index: 13, kind: output, shape index: {1}]   ;;  %s13565_s14 = inlined_call_operand.hbm [shape: f32[3], index: 14, kind: output, shape index: {2}]  }
   0x1   :  { %v558_v0 = vld [vmem:[%s13552_s1] sm:$0xff]  ;;  %v559_v1 = vld [vmem:[%s13552_s1 + $0x8] sm:$0xff]  ;;  %v560_v2 = vld [vmem:[%s13552_s1 + $0x10] sm:$0xff] }
   0x2   :  { %v9955_v3 = vpack.c.bf16 %v559_v1, %v558_v0  ;;  %v561_v4 = vld [vmem:[%s13552_s1 + $0x18] sm:$0xff]  ;;  %v46_v5 = vld [vmem:[%s13551_s0] sm:$0xff]  ;;  %v47_v8 = vld [vmem:[%s13551_s0 + $0x8] sm:$0xff] }
   0x3   :  { %v9959_v6 = vpack.c.bf16 %v561_v4, %v560_v2  ;;  %9135 = vmatprep.mubr.msk.f32.mxu0 %vm563_vm0, %v46_v5  ;;  %v562_v7 = vld [vmem:[%s13552_s1 + $0x20] sm:$0xf]  ;;  %v48_v9 = vld [vmem:[%s13551_s0 + $0x10] sm:$0xff]  ;;  %v435_v11 = vld [vmem:[%s13551_s0 + $0xc28] sm:$0xff] }
   0x4   :  { %9956 = vmatprep.subr.bf16.mxu0 %v9955_v3  ;;  %10507 = vmatprep.subr.bf16.mxu1 %v9955_v3  ;;  %v434_v10 = vld [vmem:[%s13551_s0 + $0xc20] sm:$0xff]  ;;  %v49_v12 = vld [vmem:[%s13551_s0 + $0x18] sm:$0xff]  ;;  %v436_v13 = vld [vmem:[%s13551_s0 + $0xc30] sm:$0xff] }
   0x5   :  { %9958 = vmatpush3.bf16.msra.mxu0 %v9955_v3  ;;  %10510 = vmatpush3.bf16.msra.mxu1 %v9955_v3  ;;  %v50_v14 = vld [vmem:[%s13551_s0 + $0x20] sm:$0xff]  ;;  %v437_v15 = vld [vmem:[%s13551_s0 + $0xc38] sm:$0xff]  ;;  %v51_v17 = vld [vmem:[%s13551_s0 + $0x28] sm:$0xff] }
   0x6   :  { %9960 = vmatprep.subr.bf16.mxu0 %v9959_v6  ;;  %10508 = vmatprep.subr.bf16.mxu1 %v9959_v6  ;;  %v438_v16 = vld [vmem:[%s13551_s0 + $0xc40] sm:$0xff]  ;;  %v52_v18 = vld [vmem:[%s13551_s0 + $0x30] sm:$0xff]  ;;  %v439_v19 = vld [vmem:[%s13551_s0 + $0xc48] sm:$0xff] }
   0x7   :  { %9717 = vmatprep.mubr.msk.f32.mxu1 %vm563_vm0, %v434_v10  ;;  %v440_v20 = vld [vmem:[%s13551_s0 + $0xc50] sm:$0xff]  ;;  %v53_v21 = vld [vmem:[%s13551_s0 + $0x38] sm:$0xff]  ;;  %v54_v22 = vld [vmem:[%s13551_s0 + $0x40] sm:$0xff] }
   0x8   :  { %v441_v23 = vld [vmem:[%s13551_s0 + $0xc58] sm:$0xff]  ;;  %v442_v24 = vld [vmem:[%s13551_s0 + $0xc60] sm:$0xff]  ;;  %v55_v25 = vld [vmem:[%s13551_s0 + $0x48] sm:$0xff] }
   0x9   :  { %9962 = vmatpush3.bf16.msra.mxu0 %v9959_v6  ;;  %10511 = vmatpush3.bf16.msra.mxu1 %v9959_v6  ;;  %v56_v26 = vld [vmem:[%s13551_s0 + $0x50] sm:$0xff]  ;;  %v443_v27 = vld [vmem:[%s13551_s0 + $0xc68] sm:$0xff]  ;;  %v57_v29 = vld [vmem:[%s13551_s0 + $0x58] sm:$0xff] }
   0xa   :  { %9133 = vmatprep.subr.msk.mxu0 %vm2100_vm1, %v562_v7  ;;  %10509 = vmatprep.subr.msk.mxu1 %vm2100_vm1, %v562_v7  ;;  %v444_v28 = vld [vmem:[%s13551_s0 + $0xc70] sm:$0xff]  ;;  %v58_v30 = vld [vmem:[%s13551_s0 + $0x60] sm:$0xff]  ;;  %v445_v31 = vld [vmem:[%s13551_s0 + $0xc78] sm:$0xff] }
   0xb   :  { %v446_v32 = vld [vmem:[%s13551_s0 + $0xc80] sm:$0xff]  ;;  %v59_v33 = vld [vmem:[%s13551_s0 + $0x68] sm:$0xff]  ;;  %v60_v34 = vld [vmem:[%s13551_s0 + $0x70] sm:$0xff] }
   0xc   :  { %v447_v35 = vld [vmem:[%s13551_s0 + $0xc88] sm:$0xff]  ;;  %v448_v36 = vld [vmem:[%s13551_s0 + $0xc90] sm:$0xff]  ;;  %v61_v37 = vld [vmem:[%s13551_s0 + $0x78] sm:$0xff] }
   0xd   :  { %9134 = vmatpush3.msk.msra.mxu0 %vm2100_vm1, %v562_v7  ;;  %10512 = vmatpush3.msk.msra.mxu1 %vm2100_vm1, %v562_v7  ;;  %v62_v38 = vld [vmem:[%s13551_s0 + $0x80] sm:$0xff]  ;;  %v449_v39 = vld [vmem:[%s13551_s0 + $0xc98] sm:$0xff]  ;;  %v63_v41 = vld [vmem:[%s13551_s0 + $0x88] sm:$0xff] }
   0xe   :  { %9136 = vmatmul.mubr.msk.f32.vlgmr.msra.gmra.mrb[0].mxu0 %vm563_vm0, %v47_v8  ;;  %9718 = vmatmul.mubr.msk.f32.vlgmr.msra.gmra.mrb[0].mxu1 %vm563_vm0, %v435_v11  ;;  %v450_v40 = vld [vmem:[%s13551_s0 + $0xca0] sm:$0xff]  ;;  %v64_v42 = vld [vmem:[%s13551_s0 + $0x90] sm:$0xff]  ;;  %v451_v43 = vld [vmem:[%s13551_s0 + $0xca8] sm:$0xff] }
   0xf   :  { %9138 = vmatprep.mubr.msk.f32.mxu0 %vm563_vm0, %v48_v9  ;;  %9720 = vmatprep.mubr.msk.f32.mxu1 %vm563_vm0, %v436_v13  ;;  %v452_v44 = vld [vmem:[%s13551_s0 + $0xcb0] sm:$0xff]  ;;  %v65_v45 = vld [vmem:[%s13551_s0 + $0x98] sm:$0xff] }
  0x12   :  { %9139 = vmatmul.mubr.msk.f32.gmra.mrb[2].mxu0 %vm563_vm0, %v49_v12  ;;  %9721 = vmatmul.mubr.msk.f32.gmra.mrb[2].mxu1 %vm563_vm0, %v437_v15 }
  0x13   :  { %9141 = vmatprep.mubr.msk.f32.mxu0 %vm563_vm0, %v50_v14  ;;  %9723 = vmatprep.mubr.msk.f32.mxu1 %vm563_vm0, %v438_v16 }
  0x16   :  { %9142 = vmatmul.mubr.msk.f32.gmra.mrb[4].mxu0 %vm563_vm0, %v51_v17  ;;  %9724 = vmatmul.mubr.msk.f32.gmra.mrb[4].mxu1 %vm563_vm0, %v439_v19 }
  0x17   :  { %9144 = vmatprep.mubr.msk.f32.mxu0 %vm563_vm0, %v52_v18  ;;  %9726 = vmatprep.mubr.msk.f32.mxu1 %vm563_vm0, %v440_v20 }
  0x1a   :  { %9145 = vmatmul.mubr.msk.f32.gmra.mrb[6].mxu0 %vm563_vm0, %v53_v21  ;;  %9727 = vmatmul.mubr.msk.f32.gmra.mrb[6].mxu1 %vm563_vm0, %v441_v23 }
  0x1b   :  { %9147 = vmatprep.mubr.msk.f32.mxu0 %vm563_vm0, %v54_v22  ;;  %9729 = vmatprep.mubr.msk.f32.mxu1 %vm563_vm0, %v442_v24 }
  0x1e   :  { %9148 = vmatmul.mubr.msk.f32.gmra.mrb[8].mxu0 %vm563_vm0, %v55_v25  ;;  %9730 = vmatmul.mubr.msk.f32.gmra.mrb[8].mxu1 %vm563_vm0, %v443_v27 }
  0x1f   :  { %9150 = vmatprep.mubr.msk.f32.mxu0 %vm563_vm0, %v56_v26  ;;  %9732 = vmatprep.mubr.msk.f32.mxu1 %vm563_vm0, %v444_v28 }
  0x22   :  { %9151 = vmatmul.mubr.msk.f32.gmra.mrb[10].mxu0 %vm563_vm0, %v57_v29  ;;  %9733 = vmatmul.mubr.msk.f32.gmra.mrb[10].mxu1 %vm563_vm0, %v445_v31 }
  0x23   :  { %9153 = vmatprep.mubr.msk.f32.mxu0 %vm563_vm0, %v58_v30  ;;  %9735 = vmatprep.mubr.msk.f32.mxu1 %vm563_vm0, %v446_v32 }
  0x26   :  { %9154 = vmatmul.mubr.msk.f32.gmra.mrb[12].mxu0 %vm563_vm0, %v59_v33  ;;  %9736 = vmatmul.mubr.msk.f32.gmra.mrb[12].mxu1 %vm563_vm0, %v447_v35 }
  0x27   :  { %9156 = vmatprep.mubr.msk.f32.mxu0 %vm563_vm0, %v60_v34  ;;  %9738 = vmatprep.mubr.msk.f32.mxu1 %vm563_vm0, %v448_v36 }
  0x2a   :  { %9157 = vmatmul.mubr.msk.f32.gmra.mrb[14].mxu0 %vm563_vm0, %v61_v37  ;;  %9739 = vmatmul.mubr.msk.f32.gmra.mrb[14].mxu1 %vm563_vm0, %v449_v39 }
  0x2b   :  { %9159 = vmatprep.mubr.msk.f32.mxu0 %vm563_vm0, %v62_v38  ;;  %9741 = vmatprep.mubr.msk.f32.mxu1 %vm563_vm0, %v450_v40 }
  0x2e   :  { %9160 = vmatmul.mubr.msk.f32.gmra.mrb[16].mxu0 %vm563_vm0, %v63_v41 }
  0x2f   :  { %9162 = vmatprep.mubr.msk.f32.mxu0 %vm563_vm0, %v64_v42 }
  0x30   :  { %21 = vsyncpa [#allocation4], 0  ;;  %v66_v46 = vld [vmem:[%s13551_s0 + $0xa0] sm:$0xff]  ;;  %9742 = vmatmul.mubr.msk.f32.gmra.mrb[16].mxu1 %vm563_vm0, %v451_v43  ;;  %v453_v47 = vld [vmem:[%s13551_s0 + $0xcb8] sm:$0xff]  ;;  %vm6516_vm2 = vcmask 261120   ;;  %s10609_s29 = smov 96  }
  0x31   :  { %9744 = vmatprep.mubr.msk.f32.mxu1 %vm563_vm0, %v452_v44  ;;  %v454_v48 = vld [vmem:[%s13551_s0 + $0xcc0] sm:$0xff]  ;;  %v67_v49 = vld [vmem:[%s13551_s0 + $0xa8] sm:$0xff]  ;;  %v68_v50 = vld [vmem:[%s13551_s0 + $0xb0] sm:$0xff]  ;;  %vm6660_vm5 = vcmask 7168   ;;  %vm7230_vm6 = vcmask 253952   ;;  %vm7117_vm9 = vcmask 64512  }
  0x32   :  { %9163 = vmatmul.mubr.msk.f32.gmra.mrb[18].mxu0 %vm563_vm0, %v65_v45  ;;  %v455_v51 = vld [vmem:[%s13551_s0 + $0xcc8] sm:$0xff]  ;;  %v456_v52 = vld [vmem:[%s13551_s0 + $0xcd0] sm:$0xff]  ;;  %v69_v53 = vld [vmem:[%s13551_s0 + $0xb8] sm:$0xff] }
  0x33   :  { %9165 = vmatprep.mubr.msk.f32.mxu0 %vm563_vm0, %v66_v46  ;;  %v70_v54 = vld [vmem:[%s13551_s0 + $0xc0] sm:$0xff]  ;;  %v457_v55 = vld [vmem:[%s13551_s0 + $0xcd8] sm:$0xff]  ;;  %v71_v57 = vld [vmem:[%s13551_s0 + $0xc8] sm:$0xff] }
  0x34   :  { %9745 = vmatmul.mubr.msk.f32.gmra.mrb[18].mxu1 %vm563_vm0, %v453_v47  ;;  %v458_v56 = vld [vmem:[%s13551_s0 + $0xce0] sm:$0xff]  ;;  %v72_v58 = vld [vmem:[%s13551_s0 + $0xd0] sm:$0xff]  ;;  %v459_v59 = vld [vmem:[%s13551_s0 + $0xce8] sm:$0xff] }
  0x35   :  { %9747 = vmatprep.mubr.msk.f32.mxu1 %vm563_vm0, %v454_v48  ;;  %v460_v60 = vld [vmem:[%s13551_s0 + $0xcf0] sm:$0xff]  ;;  %v73_v61 = vld [vmem:[%s13551_s0 + $0xd8] sm:$0xff]  ;;  %v74_v62 = vld [vmem:[%s13551_s0 + $0xe0] sm:$0xff] }
  0x36   :  { %9166 = vmatmul.mubr.msk.f32.gmra.mrb[20].mxu0 %vm563_vm0, %v67_v49  ;;  %v461_v63 = vld [vmem:[%s13551_s0 + $0xcf8] sm:$0xff]  ;;  %v462_v0 = vld [vmem:[%s13551_s0 + $0xd00] sm:$0xff]  ;;  %v75_v1 = vld [vmem:[%s13551_s0 + $0xe8] sm:$0xff] }
  0x37   :  { %9168 = vmatprep.mubr.msk.f32.mxu0 %vm563_vm0, %v68_v50  ;;  %v76_v2 = vld [vmem:[%s13551_s0 + $0xf0] sm:$0xff]  ;;  %v463_v3 = vld [vmem:[%s13551_s0 + $0xd08] sm:$0xff]  ;;  %v77_v5 = vld [vmem:[%s13551_s0 + $0xf8] sm:$0xff] }
  0x38   :  { %9748 = vmatmul.mubr.msk.f32.gmra.mrb[20].mxu1 %vm563_vm0, %v455_v51  ;;  %v464_v4 = vld [vmem:[%s13551_s0 + $0xd10] sm:$0xff]  ;;  %v78_v6 = vld [vmem:[%s13551_s0 + $0x100] sm:$0xff]  ;;  %v465_v7 = vld [vmem:[%s13551_s0 + $0xd18] sm:$0xff] }
  0x39   :  { %9750 = vmatprep.mubr.msk.f32.mxu1 %vm563_vm0, %v456_v52  ;;  %v466_v8 = vld [vmem:[%s13551_s0 + $0xd20] sm:$0xff]  ;;  %v79_v9 = vld [vmem:[%s13551_s0 + $0x108] sm:$0xff]  ;;  %v80_v10 = vld [vmem:[%s13551_s0 + $0x110] sm:$0xff] }
  0x3a   :  { %9169 = vmatmul.mubr.msk.f32.gmra.mrb[22].mxu0 %vm563_vm0, %v69_v53  ;;  %v467_v11 = vld [vmem:[%s13551_s0 + $0xd28] sm:$0xff]  ;;  %v468_v12 = vld [vmem:[%s13551_s0 + $0xd30] sm:$0xff]  ;;  %v81_v13 = vld [vmem:[%s13551_s0 + $0x118] sm:$0xff] }
  0x3b   :  { %9171 = vmatprep.mubr.msk.f32.mxu0 %vm563_vm0, %v70_v54  ;;  %v82_v14 = vld [vmem:[%s13551_s0 + $0x120] sm:$0xff]  ;;  %v469_v15 = vld [vmem:[%s13551_s0 + $0xd38] sm:$0xff]  ;;  %v83_v17 = vld [vmem:[%s13551_s0 + $0x128] sm:$0xff] }
  0x3c   :  { %9751 = vmatmul.mubr.msk.f32.gmra.mrb[22].mxu1 %vm563_vm0, %v457_v55  ;;  %v470_v16 = vld [vmem:[%s13551_s0 + $0xd40] sm:$0xff]  ;;  %v84_v18 = vld [vmem:[%s13551_s0 + $0x130] sm:$0xff]  ;;  %v471_v19 = vld [vmem:[%s13551_s0 + $0xd48] sm:$0xff] }
  0x3d   :  { %9753 = vmatprep.mubr.msk.f32.mxu1 %vm563_vm0, %v458_v56  ;;  %v472_v20 = vld [vmem:[%s13551_s0 + $0xd50] sm:$0xff]  ;;  %v85_v21 = vld [vmem:[%s13551_s0 + $0x138] sm:$0xff]  ;;  %v86_v22 = vld [vmem:[%s13551_s0 + $0x140] sm:$0xff] }
  0x3e   :  { %9172 = vmatmul.mubr.msk.f32.gmra.mrb[24].mxu0 %vm563_vm0, %v71_v57  ;;  %v473_v23 = vld [vmem:[%s13551_s0 + $0xd58] sm:$0xff]  ;;  %v474_v24 = vld [vmem:[%s13551_s0 + $0xd60] sm:$0xff]  ;;  %v87_v25 = vld [vmem:[%s13551_s0 + $0x148] sm:$0xff] }
  0x3f   :  { %9174 = vmatprep.mubr.msk.f32.mxu0 %vm563_vm0, %v72_v58  ;;  %v88_v26 = vld [vmem:[%s13551_s0 + $0x150] sm:$0xff]  ;;  %v475_v27 = vld [vmem:[%s13551_s0 + $0xd68] sm:$0xff]  ;;  %v89_v29 = vld [vmem:[%s13551_s0 + $0x158] sm:$0xff] }
  0x40   :  { %9754 = vmatmul.mubr.msk.f32.gmra.mrb[24].mxu1 %vm563_vm0, %v459_v59  ;;  %v476_v28 = vld [vmem:[%s13551_s0 + $0xd70] sm:$0xff]  ;;  %v90_v30 = vld [vmem:[%s13551_s0 + $0x160] sm:$0xff]  ;;  %v477_v31 = vld [vmem:[%s13551_s0 + $0xd78] sm:$0xff] }
  0x41   :  { %9756 = vmatprep.mubr.msk.f32.mxu1 %vm563_vm0, %v460_v60  ;;  %v478_v32 = vld [vmem:[%s13551_s0 + $0xd80] sm:$0xff]  ;;  %v91_v33 = vld [vmem:[%s13551_s0 + $0x168] sm:$0xff]  ;;  %v92_v34 = vld [vmem:[%s13551_s0 + $0x170] sm:$0xff] }
  0x42   :  { %9175 = vmatmul.mubr.msk.f32.gmra.mrb[26].mxu0 %vm563_vm0, %v73_v61  ;;  %v479_v35 = vld [vmem:[%s13551_s0 + $0xd88] sm:$0xff]  ;;  %v480_v36 = vld [vmem:[%s13551_s0 + $0xd90] sm:$0xff]  ;;  %v93_v37 = vld [vmem:[%s13551_s0 + $0x178] sm:$0xff] }
  0x43   :  { %9177 = vmatprep.mubr.msk.f32.mxu0 %vm563_vm0, %v74_v62  ;;  %v94_v38 = vld [vmem:[%s13551_s0 + $0x180] sm:$0xff]  ;;  %v481_v39 = vld [vmem:[%s13551_s0 + $0xd98] sm:$0xff]  ;;  %v95_v41 = vld [vmem:[%s13551_s0 + $0x188] sm:$0xff] }
  0x44   :  { %9757 = vmatmul.mubr.msk.f32.gmra.mrb[26].mxu1 %vm563_vm0, %v461_v63  ;;  %v482_v40 = vld [vmem:[%s13551_s0 + $0xda0] sm:$0xff]  ;;  %v96_v42 = vld [vmem:[%s13551_s0 + $0x190] sm:$0xff]  ;;  %v483_v43 = vld [vmem:[%s13551_s0 + $0xda8] sm:$0xff] }
  0x45   :  { %9759 = vmatprep.mubr.msk.f32.mxu1 %vm563_vm0, %v462_v0  ;;  %v484_v44 = vld [vmem:[%s13551_s0 + $0xdb0] sm:$0xff]  ;;  %v97_v45 = vld [vmem:[%s13551_s0 + $0x198] sm:$0xff]  ;;  %v98_v46 = vld [vmem:[%s13551_s0 + $0x1a0] sm:$0xff] }
  0x46   :  { %9178 = vmatmul.mubr.msk.f32.gmra.mrb[28].mxu0 %vm563_vm0, %v75_v1  ;;  %v485_v47 = vld [vmem:[%s13551_s0 + $0xdb8] sm:$0xff]  ;;  %v486_v48 = vld [vmem:[%s13551_s0 + $0xdc0] sm:$0xff]  ;;  %v99_v49 = vld [vmem:[%s13551_s0 + $0x1a8] sm:$0xff] }
  0x47   :  { %9180 = vmatprep.mubr.msk.f32.mxu0 %vm563_vm0, %v76_v2  ;;  %v100_v50 = vld [vmem:[%s13551_s0 + $0x1b0] sm:$0xff]  ;;  %v487_v51 = vld [vmem:[%s13551_s0 + $0xdc8] sm:$0xff]  ;;  %v101_v53 = vld [vmem:[%s13551_s0 + $0x1b8] sm:$0xff] }
  0x48   :  { %9760 = vmatmul.mubr.msk.f32.gmra.mrb[28].mxu1 %vm563_vm0, %v463_v3  ;;  %v488_v52 = vld [vmem:[%s13551_s0 + $0xdd0] sm:$0xff]  ;;  %v102_v54 = vld [vmem:[%s13551_s0 + $0x1c0] sm:$0xff]  ;;  %v489_v55 = vld [vmem:[%s13551_s0 + $0xdd8] sm:$0xff] }
  0x49   :  { %9762 = vmatprep.mubr.msk.f32.mxu1 %vm563_vm0, %v464_v4  ;;  %v490_v56 = vld [vmem:[%s13551_s0 + $0xde0] sm:$0xff]  ;;  %v103_v57 = vld [vmem:[%s13551_s0 + $0x1c8] sm:$0xff]  ;;  %v104_v58 = vld [vmem:[%s13551_s0 + $0x1d0] sm:$0xff] }
  0x4a   :  { %9181 = vmatmul.mubr.msk.f32.gmra.mrb[30].mxu0 %vm563_vm0, %v77_v5  ;;  %v491_v59 = vld [vmem:[%s13551_s0 + $0xde8] sm:$0xff]  ;;  %v492_v60 = vld [vmem:[%s13551_s0 + $0xdf0] sm:$0xff]  ;;  %v105_v61 = vld [vmem:[%s13551_s0 + $0x1d8] sm:$0xff] }
  0x4b   :  { %9183 = vmatprep.mubr.msk.f32.mxu0 %vm563_vm0, %v78_v6  ;;  %v106_v62 = vld [vmem:[%s13551_s0 + $0x1e0] sm:$0xff]  ;;  %v493_v63 = vld [vmem:[%s13551_s0 + $0xdf8] sm:$0xff]  ;;  %v107_v1 = vld [vmem:[%s13551_s0 + $0x1e8] sm:$0xff] }
  0x4c   :  { %9763 = vmatmul.mubr.msk.f32.gmra.mrb[30].mxu1 %vm563_vm0, %v465_v7  ;;  %v494_v0 = vld [vmem:[%s13551_s0 + $0xe00] sm:$0xff]  ;;  %v108_v2 = vld [vmem:[%s13551_s0 + $0x1f0] sm:$0xff]  ;;  %v495_v3 = vld [vmem:[%s13551_s0 + $0xe08] sm:$0xff] }
  0x4d   :  { %9765 = vmatprep.mubr.msk.f32.mxu1 %vm563_vm0, %v466_v8  ;;  %v496_v4 = vld [vmem:[%s13551_s0 + $0xe10] sm:$0xff]  ;;  %v109_v5 = vld [vmem:[%s13551_s0 + $0x1f8] sm:$0xff]  ;;  %v110_v6 = vld [vmem:[%s13551_s0 + $0x200] sm:$0xff] }
  0x4e   :  { %9184 = vmatmul.mubr.msk.f32.gmra.mrb[32].mxu0 %vm563_vm0, %v79_v9  ;;  %v497_v7 = vld [vmem:[%s13551_s0 + $0xe18] sm:$0xff]  ;;  %v498_v8 = vld [vmem:[%s13551_s0 + $0xe20] sm:$0xff]  ;;  %v111_v9 = vld [vmem:[%s13551_s0 + $0x208] sm:$0xff] }
  0x4f   :  { %9186 = vmatprep.mubr.msk.f32.mxu0 %vm563_vm0, %v80_v10  ;;  %v112_v10 = vld [vmem:[%s13551_s0 + $0x210] sm:$0xff] }
  0x50   :  { %9766 = vmatmul.mubr.msk.f32.gmra.mrb[32].mxu1 %vm563_vm0, %v467_v11  ;;  %v499_v11 = vld [vmem:[%s13551_s0 + $0xe28] sm:$0xff] }
  0x51   :  { %9768 = vmatprep.mubr.msk.f32.mxu1 %vm563_vm0, %v468_v12  ;;  %v500_v12 = vld [vmem:[%s13551_s0 + $0xe30] sm:$0xff] }
  0x52   :  { %9187 = vmatmul.mubr.msk.f32.gmra.mrb[34].mxu0 %vm563_vm0, %v81_v13  ;;  %v113_v13 = vld [vmem:[%s13551_s0 + $0x218] sm:$0xff] }
  0x53   :  { %9189 = vmatprep.mubr.msk.f32.mxu0 %vm563_vm0, %v82_v14  ;;  %v114_v14 = vld [vmem:[%s13551_s0 + $0x220] sm:$0xff] }
  0x54   :  { %9769 = vmatmul.mubr.msk.f32.gmra.mrb[34].mxu1 %vm563_vm0, %v469_v15  ;;  %v501_v15 = vld [vmem:[%s13551_s0 + $0xe38] sm:$0xff] }
  0x55   :  { %9771 = vmatprep.mubr.msk.f32.mxu1 %vm563_vm0, %v470_v16  ;;  %v502_v16 = vld [vmem:[%s13551_s0 + $0xe40] sm:$0xff] }
  0x56   :  { %9190 = vmatmul.mubr.msk.f32.gmra.mrb[36].mxu0 %vm563_vm0, %v83_v17  ;;  %v115_v17 = vld [vmem:[%s13551_s0 + $0x228] sm:$0xff] }
  0x57   :  { %9192 = vmatprep.mubr.msk.f32.mxu0 %vm563_vm0, %v84_v18  ;;  %v116_v18 = vld [vmem:[%s13551_s0 + $0x230] sm:$0xff] }
  0x58   :  { %9772 = vmatmul.mubr.msk.f32.gmra.mrb[36].mxu1 %vm563_vm0, %v471_v19  ;;  %v503_v19 = vld [vmem:[%s13551_s0 + $0xe48] sm:$0xff] }
  0x59   :  { %9774 = vmatprep.mubr.msk.f32.mxu1 %vm563_vm0, %v472_v20  ;;  %v504_v20 = vld [vmem:[%s13551_s0 + $0xe50] sm:$0xff] }
  0x5a   :  { %9193 = vmatmul.mubr.msk.f32.gmra.mrb[38].mxu0 %vm563_vm0, %v85_v21  ;;  %v117_v21 = vld [vmem:[%s13551_s0 + $0x238] sm:$0xff] }
  0x5b   :  { %9195 = vmatprep.mubr.msk.f32.mxu0 %vm563_vm0, %v86_v22  ;;  %v118_v22 = vld [vmem:[%s13551_s0 + $0x240] sm:$0xff] }
  0x5c   :  { %9775 = vmatmul.mubr.msk.f32.gmra.mrb[38].mxu1 %vm563_vm0, %v473_v23  ;;  %v505_v23 = vld [vmem:[%s13551_s0 + $0xe58] sm:$0xff] }
  0x5d   :  { %9777 = vmatprep.mubr.msk.f32.mxu1 %vm563_vm0, %v474_v24  ;;  %v506_v24 = vld [vmem:[%s13551_s0 + $0xe60] sm:$0xff] }
  0x5e   :  { %9196 = vmatmul.mubr.msk.f32.gmra.mrb[40].mxu0 %vm563_vm0, %v87_v25  ;;  %v119_v25 = vld [vmem:[%s13551_s0 + $0x248] sm:$0xff] }
  0x5f   :  { %9198 = vmatprep.mubr.msk.f32.mxu0 %vm563_vm0, %v88_v26  ;;  %v120_v26 = vld [vmem:[%s13551_s0 + $0x250] sm:$0xff] }
  0x60   :  { %9778 = vmatmul.mubr.msk.f32.gmra.mrb[40].mxu1 %vm563_vm0, %v475_v27  ;;  %v507_v27 = vld [vmem:[%s13551_s0 + $0xe68] sm:$0xff] }
  0x61   :  { %9780 = vmatprep.mubr.msk.f32.mxu1 %vm563_vm0, %v476_v28  ;;  %v508_v28 = vld [vmem:[%s13551_s0 + $0xe70] sm:$0xff] }
  0x62   :  { %9199 = vmatmul.mubr.msk.f32.gmra.mrb[42].mxu0 %vm563_vm0, %v89_v29  ;;  %v121_v29 = vld [vmem:[%s13551_s0 + $0x258] sm:$0xff] }
  0x63   :  { %9201 = vmatprep.mubr.msk.f32.mxu0 %vm563_vm0, %v90_v30  ;;  %v122_v30 = vld [vmem:[%s13551_s0 + $0x260] sm:$0xff] }
  0x64   :  { %9781 = vmatmul.mubr.msk.f32.gmra.mrb[42].mxu1 %vm563_vm0, %v477_v31  ;;  %v509_v31 = vld [vmem:[%s13551_s0 + $0xe78] sm:$0xff] }
  0x65   :  { %9783 = vmatprep.mubr.msk.f32.mxu1 %vm563_vm0, %v478_v32  ;;  %v510_v32 = vld [vmem:[%s13551_s0 + $0xe80] sm:$0xff] }
  0x66   :  { %9202 = vmatmul.mubr.msk.f32.gmra.mrb[44].mxu0 %vm563_vm0, %v91_v33  ;;  %v123_v33 = vld [vmem:[%s13551_s0 + $0x268] sm:$0xff] }
  0x67   :  { %9204 = vmatprep.mubr.msk.f32.mxu0 %vm563_vm0, %v92_v34  ;;  %v124_v34 = vld [vmem:[%s13551_s0 + $0x270] sm:$0xff] }
  0x68   :  { %9784 = vmatmul.mubr.msk.f32.gmra.mrb[44].mxu1 %vm563_vm0, %v479_v35  ;;  %v511_v35 = vld [vmem:[%s13551_s0 + $0xe88] sm:$0xff] }
  0x69   :  { %9786 = vmatprep.mubr.msk.f32.mxu1 %vm563_vm0, %v480_v36  ;;  %v512_v36 = vld [vmem:[%s13551_s0 + $0xe90] sm:$0xff] }
  0x6a   :  { %9205 = vmatmul.mubr.msk.f32.gmra.mrb[46].mxu0 %vm563_vm0, %v93_v37  ;;  %v125_v37 = vld [vmem:[%s13551_s0 + $0x278] sm:$0xff] }
  0x6b   :  { %9207 = vmatprep.mubr.msk.f32.mxu0 %vm563_vm0, %v94_v38  ;;  %v126_v38 = vld [vmem:[%s13551_s0 + $0x280] sm:$0xff] }
  0x6c   :  { %9787 = vmatmul.mubr.msk.f32.gmra.mrb[46].mxu1 %vm563_vm0, %v481_v39  ;;  %v513_v39 = vld [vmem:[%s13551_s0 + $0xe98] sm:$0xff] }
  0x6d   :  { %9789 = vmatprep.mubr.msk.f32.mxu1 %vm563_vm0, %v482_v40  ;;  %v514_v40 = vld [vmem:[%s13551_s0 + $0xea0] sm:$0xff] }
  0x6e   :  { %9208 = vmatmul.mubr.msk.f32.gmra.mrb[48].mxu0 %vm563_vm0, %v95_v41  ;;  %v127_v41 = vld [vmem:[%s13551_s0 + $0x288] sm:$0xff] }
  0x6f   :  { %9210 = vmatprep.mubr.msk.f32.mxu0 %vm563_vm0, %v96_v42  ;;  %v128_v42 = vld [vmem:[%s13551_s0 + $0x290] sm:$0xff] }
  0x70   :  { %9790 = vmatmul.mubr.msk.f32.gmra.mrb[48].mxu1 %vm563_vm0, %v483_v43  ;;  %v515_v43 = vld [vmem:[%s13551_s0 + $0xea8] sm:$0xff] }
  0x71   :  { %9792 = vmatprep.mubr.msk.f32.mxu1 %vm563_vm0, %v484_v44  ;;  %v516_v44 = vld [vmem:[%s13551_s0 + $0xeb0] sm:$0xff] }
  0x72   :  { %9211 = vmatmul.mubr.msk.f32.gmra.mrb[50].mxu0 %vm563_vm0, %v97_v45  ;;  %v129_v45 = vld [vmem:[%s13551_s0 + $0x298] sm:$0xff] }
  0x73   :  { %9213 = vmatprep.mubr.msk.f32.mxu0 %vm563_vm0, %v98_v46  ;;  %v130_v46 = vld [vmem:[%s13551_s0 + $0x2a0] sm:$0xff] }
  0x74   :  { %9793 = vmatmul.mubr.msk.f32.gmra.mrb[50].mxu1 %vm563_vm0, %v485_v47  ;;  %v517_v47 = vld [vmem:[%s13551_s0 + $0xeb8] sm:$0xff] }
  0x75   :  { %9795 = vmatprep.mubr.msk.f32.mxu1 %vm563_vm0, %v486_v48  ;;  %v518_v48 = vld [vmem:[%s13551_s0 + $0xec0] sm:$0xff] }
  0x76   :  { %9214 = vmatmul.mubr.msk.f32.gmra.mrb[52].mxu0 %vm563_vm0, %v99_v49  ;;  %v131_v49 = vld [vmem:[%s13551_s0 + $0x2a8] sm:$0xff] }
  0x77   :  { %9216 = vmatprep.mubr.msk.f32.mxu0 %vm563_vm0, %v100_v50  ;;  %v132_v50 = vld [vmem:[%s13551_s0 + $0x2b0] sm:$0xff] }
  0x78   :  { %9796 = vmatmul.mubr.msk.f32.gmra.mrb[52].mxu1 %vm563_vm0, %v487_v51  ;;  %v519_v51 = vld [vmem:[%s13551_s0 + $0xec8] sm:$0xff] }
  0x79   :  { %9798 = vmatprep.mubr.msk.f32.mxu1 %vm563_vm0, %v488_v52  ;;  %v520_v52 = vld [vmem:[%s13551_s0 + $0xed0] sm:$0xff] }
  0x7a   :  { %9217 = vmatmul.mubr.msk.f32.gmra.mrb[54].mxu0 %vm563_vm0, %v101_v53  ;;  %v133_v53 = vld [vmem:[%s13551_s0 + $0x2b8] sm:$0xff] }
  0x7b   :  { %9219 = vmatprep.mubr.msk.f32.mxu0 %vm563_vm0, %v102_v54  ;;  %v134_v54 = vld [vmem:[%s13551_s0 + $0x2c0] sm:$0xff] }
  0x7c   :  { %9799 = vmatmul.mubr.msk.f32.gmra.mrb[54].mxu1 %vm563_vm0, %v489_v55  ;;  %v521_v55 = vld [vmem:[%s13551_s0 + $0xed8] sm:$0xff] }
  0x7d   :  { %9801 = vmatprep.mubr.msk.f32.mxu1 %vm563_vm0, %v490_v56  ;;  %v522_v56 = vld [vmem:[%s13551_s0 + $0xee0] sm:$0xff] }
  0x7e   :  { %9220 = vmatmul.mubr.msk.f32.gmra.mrb[56].mxu0 %vm563_vm0, %v103_v57  ;;  %v135_v57 = vld [vmem:[%s13551_s0 + $0x2c8] sm:$0xff] }
  0x7f   :  { %9222 = vmatprep.mubr.msk.f32.mxu0 %vm563_vm0, %v104_v58  ;;  %v136_v58 = vld [vmem:[%s13551_s0 + $0x2d0] sm:$0xff] }
  0x80   :  { %9802 = vmatmul.mubr.msk.f32.gmra.mrb[56].mxu1 %vm563_vm0, %v491_v59  ;;  %v523_v59 = vld [vmem:[%s13551_s0 + $0xee8] sm:$0xff] }
  0x81   :  { %9804 = vmatprep.mubr.msk.f32.mxu1 %vm563_vm0, %v492_v60  ;;  %v524_v60 = vld [vmem:[%s13551_s0 + $0xef0] sm:$0xff] }
  0x82   :  { %9223 = vmatmul.mubr.msk.f32.gmra.mrb[58].mxu0 %vm563_vm0, %v105_v61  ;;  %v137_v61 = vld [vmem:[%s13551_s0 + $0x2d8] sm:$0xff] }
  0x83   :  { %9225 = vmatprep.mubr.msk.f32.mxu0 %vm563_vm0, %v106_v62  ;;  %v138_v62 = vld [vmem:[%s13551_s0 + $0x2e0] sm:$0xff] }
  0x84   :  { %9805 = vmatmul.mubr.msk.f32.gmra.mrb[58].mxu1 %vm563_vm0, %v493_v63  ;;  %v525_v63 = vld [vmem:[%s13551_s0 + $0xef8] sm:$0xff] }
  0x85   :  { %9807 = vmatprep.mubr.msk.f32.mxu1 %vm563_vm0, %v494_v0  ;;  %v526_v0 = vld [vmem:[%s13551_s0 + $0xf00] sm:$0xff] }
  0x86   :  { %9226 = vmatmul.mubr.msk.f32.gmra.mrb[60].mxu0 %vm563_vm0, %v107_v1  ;;  %v139_v1 = vld [vmem:[%s13551_s0 + $0x2e8] sm:$0xff] }
  0x87   :  { %9228 = vmatprep.mubr.msk.f32.mxu0 %vm563_vm0, %v108_v2  ;;  %v140_v2 = vld [vmem:[%s13551_s0 + $0x2f0] sm:$0xff] }
  0x88   :  { %9808 = vmatmul.mubr.msk.f32.gmra.mrb[60].mxu1 %vm563_vm0, %v495_v3  ;;  %v527_v3 = vld [vmem:[%s13551_s0 + $0xf08] sm:$0xff] }
  0x89   :  { %9810 = vmatprep.mubr.msk.f32.mxu1 %vm563_vm0, %v496_v4  ;;  %v528_v4 = vld [vmem:[%s13551_s0 + $0xf10] sm:$0xff] }
  0x8a   :  { %9229 = vmatmul.mubr.msk.f32.gmra.mrb[62].mxu0 %vm563_vm0, %v109_v5  ;;  %v141_v5 = vld [vmem:[%s13551_s0 + $0x2f8] sm:$0xff] }
  0x8b   :  { %9231 = vmatprep.mubr.msk.f32.mxu0 %vm563_vm0, %v110_v6  ;;  %v142_v6 = vld [vmem:[%s13551_s0 + $0x300] sm:$0xff] }
  0x8c   :  { %9811 = vmatmul.mubr.msk.f32.gmra.mrb[62].mxu1 %vm563_vm0, %v497_v7  ;;  %v529_v7 = vld [vmem:[%s13551_s0 + $0xf18] sm:$0xff] }
  0x8d   :  { %9813 = vmatprep.mubr.msk.f32.mxu1 %vm563_vm0, %v498_v8  ;;  %v530_v8 = vld [vmem:[%s13551_s0 + $0xf20] sm:$0xff] }
  0x8e   :  { %9232 = vmatmul.mubr.msk.f32.gmra.mrb[64].mxu0 %vm563_vm0, %v111_v9  ;;  %v143_v9 = vld [vmem:[%s13551_s0 + $0x308] sm:$0xff] }
  0x8f   :  { %9234 = vmatprep.mubr.msk.f32.mxu0 %vm563_vm0, %v112_v10  ;;  %v144_v10 = vld [vmem:[%s13551_s0 + $0x310] sm:$0xff] }
  0x90   :  { %9814 = vmatmul.mubr.msk.f32.gmra.mrb[64].mxu1 %vm563_vm0, %v499_v11  ;;  %v531_v11 = vld [vmem:[%s13551_s0 + $0xf28] sm:$0xff] }
  0x91   :  { %9816 = vmatprep.mubr.msk.f32.mxu1 %vm563_vm0, %v500_v12  ;;  %v532_v12 = vld [vmem:[%s13551_s0 + $0xf30] sm:$0xff] }
  0x92   :  { %9235 = vmatmul.mubr.msk.f32.gmra.mrb[66].mxu0 %vm563_vm0, %v113_v13  ;;  %v145_v13 = vld [vmem:[%s13551_s0 + $0x318] sm:$0xff] }
  0x93   :  { %9237 = vmatprep.mubr.msk.f32.mxu0 %vm563_vm0, %v114_v14  ;;  %v146_v14 = vld [vmem:[%s13551_s0 + $0x320] sm:$0xff] }
  0x94   :  { %9817 = vmatmul.mubr.msk.f32.gmra.mrb[66].mxu1 %vm563_vm0, %v501_v15  ;;  %v533_v15 = vld [vmem:[%s13551_s0 + $0xf38] sm:$0xff] }
  0x95   :  { %9819 = vmatprep.mubr.msk.f32.mxu1 %vm563_vm0, %v502_v16  ;;  %v534_v16 = vld [vmem:[%s13551_s0 + $0xf40] sm:$0xff] }
  0x96   :  { %9238 = vmatmul.mubr.msk.f32.gmra.mrb[68].mxu0 %vm563_vm0, %v115_v17  ;;  %v147_v17 = vld [vmem:[%s13551_s0 + $0x328] sm:$0xff] }
  0x97   :  { %9240 = vmatprep.mubr.msk.f32.mxu0 %vm563_vm0, %v116_v18  ;;  %v148_v18 = vld [vmem:[%s13551_s0 + $0x330] sm:$0xff] }
  0x98   :  { %9820 = vmatmul.mubr.msk.f32.gmra.mrb[68].mxu1 %vm563_vm0, %v503_v19  ;;  %v535_v19 = vld [vmem:[%s13551_s0 + $0xf48] sm:$0xff] }
  0x99   :  { %9822 = vmatprep.mubr.msk.f32.mxu1 %vm563_vm0, %v504_v20  ;;  %v536_v20 = vld [vmem:[%s13551_s0 + $0xf50] sm:$0xff] }
  0x9a   :  { %9241 = vmatmul.mubr.msk.f32.gmra.mrb[70].mxu0 %vm563_vm0, %v117_v21  ;;  %v149_v21 = vld [vmem:[%s13551_s0 + $0x338] sm:$0xff] }
  0x9b   :  { %9243 = vmatprep.mubr.msk.f32.mxu0 %vm563_vm0, %v118_v22  ;;  %v150_v22 = vld [vmem:[%s13551_s0 + $0x340] sm:$0xff] }
  0x9c   :  { %9823 = vmatmul.mubr.msk.f32.gmra.mrb[70].mxu1 %vm563_vm0, %v505_v23  ;;  %v537_v23 = vld [vmem:[%s13551_s0 + $0xf58] sm:$0xff] }
  0x9d   :  { %9825 = vmatprep.mubr.msk.f32.mxu1 %vm563_vm0, %v506_v24  ;;  %v538_v24 = vld [vmem:[%s13551_s0 + $0xf60] sm:$0xff] }
  0x9e   :  { %9244 = vmatmul.mubr.msk.f32.gmra.mrb[72].mxu0 %vm563_vm0, %v119_v25  ;;  %v151_v25 = vld [vmem:[%s13551_s0 + $0x348] sm:$0xff] }
  0x9f   :  { %9246 = vmatprep.mubr.msk.f32.mxu0 %vm563_vm0, %v120_v26  ;;  %v152_v26 = vld [vmem:[%s13551_s0 + $0x350] sm:$0xff] }
  0xa0   :  { %9826 = vmatmul.mubr.msk.f32.gmra.mrb[72].mxu1 %vm563_vm0, %v507_v27  ;;  %v539_v27 = vld [vmem:[%s13551_s0 + $0xf68] sm:$0xff] }
  0xa1   :  { %9828 = vmatprep.mubr.msk.f32.mxu1 %vm563_vm0, %v508_v28  ;;  %v540_v28 = vld [vmem:[%s13551_s0 + $0xf70] sm:$0xff] }
  0xa2   :  { %9247 = vmatmul.mubr.msk.f32.gmra.mrb[74].mxu0 %vm563_vm0, %v121_v29  ;;  %v153_v29 = vld [vmem:[%s13551_s0 + $0x358] sm:$0xff] }
  0xa3   :  { %9249 = vmatprep.mubr.msk.f32.mxu0 %vm563_vm0, %v122_v30  ;;  %v154_v30 = vld [vmem:[%s13551_s0 + $0x360] sm:$0xff] }
  0xa4   :  { %9829 = vmatmul.mubr.msk.f32.gmra.mrb[74].mxu1 %vm563_vm0, %v509_v31 }
  0xa5   :  { %9831 = vmatprep.mubr.msk.f32.mxu1 %vm563_vm0, %v510_v32  ;;  %v541_v32 = vld [vmem:[%s13551_s0 + $0xf78] sm:$0xff] }
  0xa6   :  { %9250 = vmatmul.mubr.msk.f32.gmra.mrb[76].mxu0 %vm563_vm0, %v123_v33 }
  0xa7   :  { %9252 = vmatprep.mubr.msk.f32.mxu0 %vm563_vm0, %v124_v34 }
  0xa8   :  { %9832 = vmatmul.mubr.msk.f32.gmra.mrb[76].mxu1 %vm563_vm0, %v511_v35  ;;  %v542_v35 = vld [vmem:[%s13551_s0 + $0xf80] sm:$0xff] }
  0xa9   :  { %9834 = vmatprep.mubr.msk.f32.mxu1 %vm563_vm0, %v512_v36 }
  0xaa   :  { %9253 = vmatmul.mubr.msk.f32.gmra.mrb[78].mxu0 %vm563_vm0, %v125_v37  ;;  %v155_v37 = vld [vmem:[%s13551_s0 + $0x368] sm:$0xff] }
  0xab   :  { %9255 = vmatprep.mubr.msk.f32.mxu0 %vm563_vm0, %v126_v38  ;;  %v156_v38 = vld [vmem:[%s13551_s0 + $0x370] sm:$0xff] }
  0xac   :  { %9835 = vmatmul.mubr.msk.f32.gmra.mrb[78].mxu1 %vm563_vm0, %v513_v39 }
  0xad   :  { %9837 = vmatprep.mubr.msk.f32.mxu1 %vm563_vm0, %v514_v40 }
  0xae   :  { %9256 = vmatmul.mubr.msk.f32.gmra.mrb[80].mxu0 %vm563_vm0, %v127_v41  ;;  %v543_v41 = vld [vmem:[%s13551_s0 + $0xf88] sm:$0xff] }
  0xaf   :  { %9258 = vmatprep.mubr.msk.f32.mxu0 %vm563_vm0, %v128_v42 }
  0xb0   :  { %9838 = vmatmul.mubr.msk.f32.gmra.mrb[80].mxu1 %vm563_vm0, %v515_v43 }
  0xb1   :  { %9840 = vmatprep.mubr.msk.f32.mxu1 %vm563_vm0, %v516_v44  ;;  %v544_v44 = vld [vmem:[%s13551_s0 + $0xf90] sm:$0xff] }
  0xb2   :  { %9259 = vmatmul.mubr.msk.f32.gmra.mrb[82].mxu0 %vm563_vm0, %v129_v45 }
  0xb3   :  { %9261 = vmatprep.mubr.msk.f32.mxu0 %vm563_vm0, %v130_v46  ;;  %v157_v46 = vld [vmem:[%s13551_s0 + $0x378] sm:$0xff] }
  0xb4   :  { %9841 = vmatmul.mubr.msk.f32.gmra.mrb[82].mxu1 %vm563_vm0, %v517_v47  ;;  %v158_v47 = vld [vmem:[%s13551_s0 + $0x380] sm:$0xff] }
  0xb5   :  { %9843 = vmatprep.mubr.msk.f32.mxu1 %vm563_vm0, %v518_v48 }
  0xb6   :  { %9262 = vmatmul.mubr.msk.f32.gmra.mrb[84].mxu0 %vm563_vm0, %v131_v49 }
  0xb7   :  { %9264 = vmatprep.mubr.msk.f32.mxu0 %vm563_vm0, %v132_v50  ;;  %v545_v50 = vld [vmem:[%s13551_s0 + $0xf98] sm:$0xff] }
  0xb8   :  { %9844 = vmatmul.mubr.msk.f32.gmra.mrb[84].mxu1 %vm563_vm0, %v519_v51 }
  0xb9   :  { %9846 = vmatprep.mubr.msk.f32.mxu1 %vm563_vm0, %v520_v52 }
  0xba   :  { %9265 = vmatmul.mubr.msk.f32.gmra.mrb[86].mxu0 %vm563_vm0, %v133_v53  ;;  %v546_v53 = vld [vmem:[%s13551_s0 + $0xfa0] sm:$0xff] }
  0xbb   :  { %9267 = vmatprep.mubr.msk.f32.mxu0 %vm563_vm0, %v134_v54 }
  0xbc   :  { %9847 = vmatmul.mubr.msk.f32.gmra.mrb[86].mxu1 %vm563_vm0, %v521_v55  ;;  %v159_v55 = vld [vmem:[%s13551_s0 + $0x388] sm:$0xff] }
  0xbd   :  { %9849 = vmatprep.mubr.msk.f32.mxu1 %vm563_vm0, %v522_v56  ;;  %v160_v56 = vld [vmem:[%s13551_s0 + $0x390] sm:$0xff] }
  0xbe   :  { %9268 = vmatmul.mubr.msk.f32.gmra.mrb[88].mxu0 %vm563_vm0, %v135_v57 }
  0xbf   :  { %9270 = vmatprep.mubr.msk.f32.mxu0 %vm563_vm0, %v136_v58 }
  0xc0   :  { %9850 = vmatmul.mubr.msk.f32.gmra.mrb[88].mxu1 %vm563_vm0, %v523_v59  ;;  %v547_v59 = vld [vmem:[%s13551_s0 + $0xfa8] sm:$0xff] }
  0xc1   :  { %9852 = vmatprep.mubr.msk.f32.mxu1 %vm563_vm0, %v524_v60 }
  0xc2   :  { %9271 = vmatmul.mubr.msk.f32.gmra.mrb[90].mxu0 %vm563_vm0, %v137_v61 }
  0xc3   :  { %9273 = vmatprep.mubr.msk.f32.mxu0 %vm563_vm0, %v138_v62  ;;  %v548_v62 = vld [vmem:[%s13551_s0 + $0xfb0] sm:$0xff] }
  0xc4   :  { %9853 = vmatmul.mubr.msk.f32.gmra.mrb[90].mxu1 %vm563_vm0, %v525_v63 }
  0xc5   :  { %9855 = vmatprep.mubr.msk.f32.mxu1 %vm563_vm0, %v526_v0  ;;  %v161_v0 = vld [vmem:[%s13551_s0 + $0x398] sm:$0xff] }
  0xc6   :  { %9274 = vmatmul.mubr.msk.f32.gmra.mrb[92].mxu0 %vm563_vm0, %v139_v1  ;;  %v162_v1 = vld [vmem:[%s13551_s0 + $0x3a0] sm:$0xff] }
  0xc7   :  { %9276 = vmatprep.mubr.msk.f32.mxu0 %vm563_vm0, %v140_v2 }
  0xc8   :  { %9856 = vmatmul.mubr.msk.f32.gmra.mrb[92].mxu1 %vm563_vm0, %v527_v3 }
  0xc9   :  { %9858 = vmatprep.mubr.msk.f32.mxu1 %vm563_vm0, %v528_v4  ;;  %v549_v4 = vld [vmem:[%s13551_s0 + $0xfb8] sm:$0xff] }
  0xca   :  { %9277 = vmatmul.mubr.msk.f32.gmra.mrb[94].mxu0 %vm563_vm0, %v141_v5 }
  0xcb   :  { %9279 = vmatprep.mubr.msk.f32.mxu0 %vm563_vm0, %v142_v6 }
  0xcc   :  { %9859 = vmatmul.mubr.msk.f32.gmra.mrb[94].mxu1 %vm563_vm0, %v529_v7  ;;  %v550_v7 = vld [vmem:[%s13551_s0 + $0xfc0] sm:$0xff] }
  0xcd   :  { %9861 = vmatprep.mubr.msk.f32.mxu1 %vm563_vm0, %v530_v8 }
  0xce   :  { %9280 = vmatmul.mubr.msk.f32.gmra.mrb[96].mxu0 %vm563_vm0, %v143_v9  ;;  %v163_v9 = vld [vmem:[%s13551_s0 + $0x3a8] sm:$0xff] }
  0xcf   :  { %9282 = vmatprep.mubr.msk.f32.mxu0 %vm563_vm0, %v144_v10  ;;  %v164_v10 = vld [vmem:[%s13551_s0 + $0x3b0] sm:$0xff] }
  0xd0   :  { %9862 = vmatmul.mubr.msk.f32.gmra.mrb[96].mxu1 %vm563_vm0, %v531_v11 }
  0xd1   :  { %9864 = vmatprep.mubr.msk.f32.mxu1 %vm563_vm0, %v532_v12 }
  0xd2   :  { %9283 = vmatmul.mubr.msk.f32.gmra.mrb[98].mxu0 %vm563_vm0, %v145_v13  ;;  %v551_v13 = vld [vmem:[%s13551_s0 + $0xfc8] sm:$0xff] }
  0xd3   :  { %9285 = vmatprep.mubr.msk.f32.mxu0 %vm563_vm0, %v146_v14 }
  0xd4   :  { %9865 = vmatmul.mubr.msk.f32.gmra.mrb[98].mxu1 %vm563_vm0, %v533_v15 }
  0xd5   :  { %9867 = vmatprep.mubr.msk.f32.mxu1 %vm563_vm0, %v534_v16  ;;  %v552_v16 = vld [vmem:[%s13551_s0 + $0xfd0] sm:$0xff] }
  0xd6   :  { %9286 = vmatmul.mubr.msk.f32.gmra.mrb[100].mxu0 %vm563_vm0, %v147_v17 }
  0xd7   :  { %9288 = vmatprep.mubr.msk.f32.mxu0 %vm563_vm0, %v148_v18  ;;  %v165_v18 = vld [vmem:[%s13551_s0 + $0x3b8] sm:$0xff] }
  0xd8   :  { %9868 = vmatmul.mubr.msk.f32.gmra.mrb[100].mxu1 %vm563_vm0, %v535_v19  ;;  %v166_v19 = vld [vmem:[%s13551_s0 + $0x3c0] sm:$0xff] }
  0xd9   :  { %9870 = vmatprep.mubr.msk.f32.mxu1 %vm563_vm0, %v536_v20 }
  0xda   :  { %9289 = vmatmul.mubr.msk.f32.gmra.mrb[102].mxu0 %vm563_vm0, %v149_v21 }
  0xdb   :  { %9291 = vmatprep.mubr.msk.f32.mxu0 %vm563_vm0, %v150_v22  ;;  %v553_v22 = vld [vmem:[%s13551_s0 + $0xfd8] sm:$0xff] }
  0xdc   :  { %9871 = vmatmul.mubr.msk.f32.gmra.mrb[102].mxu1 %vm563_vm0, %v537_v23 }
  0xdd   :  { %9873 = vmatprep.mubr.msk.f32.mxu1 %vm563_vm0, %v538_v24 }
  0xde   :  { %9292 = vmatmul.mubr.msk.f32.gmra.mrb[104].mxu0 %vm563_vm0, %v151_v25  ;;  %v554_v25 = vld [vmem:[%s13551_s0 + $0xfe0] sm:$0xff] }
  0xdf   :  { %9294 = vmatprep.mubr.msk.f32.mxu0 %vm563_vm0, %v152_v26 }
  0xe0   :  { %9874 = vmatmul.mubr.msk.f32.gmra.mrb[104].mxu1 %vm563_vm0, %v539_v27  ;;  %v167_v27 = vld [vmem:[%s13551_s0 + $0x3c8] sm:$0xff] }
  0xe1   :  { %v9137_v31 = vpop.f32.mrb[0].mxu0  ;;  %9876 = vmatprep.mubr.msk.f32.mxu1 %vm563_vm0, %v540_v28  ;;  %v168_v28 = vld [vmem:[%s13551_s0 + $0x3d0] sm:$0xff] }
  0xe2   :  { %v4730_v33 = vmax.f32 %v9137_v31, 0.0  ;;  %v2170_v34 = vpop.f32.mrb[1].mxu0  ;;  %9295 = vmatmul.mubr.msk.f32.gmra.mrb[106].mxu0 %vm563_vm0, %v153_v29  ;;  %v555_v31 = vld [vmem:[%s13551_s0 + $0xfe8] sm:$0xff] }
  0xe3   :  { %v4729_v36 = vmax.f32 %v2170_v34, 0.0  ;;  %9297 = vmatprep.mubr.msk.f32.mxu0 %vm563_vm0, %v154_v30  ;;  %v556_v34 = vld [vmem:[%s13551_s0 + $0xff0] sm:$0xff] }
  0xe4   :  { %9877 = vmatmul.mubr.msk.f32.gmra.mrb[106].mxu1 %vm563_vm0, %v541_v32 }
  0xe5   :  { %v11581_v39 = vpack.c.bf16 %v4730_v33, %v4729_v36  ;;  %v9140_v40 = vpop.f32.mrb[2].mxu0  ;;  %9879 = vmatprep.mubr.msk.f32.mxu1 %vm563_vm0, %v542_v35  ;;  %v169_v36 = vld [vmem:[%s13551_s0 + $0x3d8] sm:$0xff] }
  0xe6   :  { %v4732_v42 = vmax.f32 %v9140_v40, 0.0  ;;  %v2180_v43 = vpop.f32.mrb[3].mxu0  ;;  %9298 = vmatmul.mubr.msk.f32.gmra.mrb[108].mxu0 %vm563_vm0, %v155_v37  ;;  %v170_v37 = vld [vmem:[%s13551_s0 + $0x3e0] sm:$0xff] }
  0xe7   :  { %v4731_v45 = vmax.f32 %v2180_v43, 0.0  ;;  %9300 = vmatprep.mubr.msk.f32.mxu0 %vm563_vm0, %v156_v38 }
  0xe8   :  { %9880 = vmatmul.mubr.msk.f32.gmra.mrb[108].mxu1 %vm563_vm0, %v543_v41  ;;  %v557_v41 = vld [vmem:[%s13551_s0 + $0xff8] sm:$0xff] }
  0xe9   :  { %v11599_v48 = vpack.c.bf16 %v4732_v42, %v4731_v45  ;;  %v9143_v49 = vpop.f32.mrb[4].mxu0  ;;  %9882 = vmatprep.mubr.msk.f32.mxu1 %vm563_vm0, %v544_v44  ;;  %v5242_v44 = vld [vmem:[%s13553_s2 + $0x8] sm:$0xff] }
  0xea   :  { %v4734_v51 = vmax.f32 %v9143_v49, 0.0  ;;  %v2190_v52 = vpop.f32.mrb[5].mxu0  ;;  %9301 = vmatmul.mubr.msk.f32.gmra.mrb[110].mxu0 %vm563_vm0, %v157_v46  ;;  %v171_v46 = vld [vmem:[%s13551_s0 + $0x3e8] sm:$0xff] }
  0xeb   :  { %v4733_v54 = vmax.f32 %v2190_v52, 0.0  ;;  %9303 = vmatprep.mubr.msk.f32.mxu0 %vm563_vm0, %v158_v47  ;;  %v172_v47 = vld [vmem:[%s13551_s0 + $0x3f0] sm:$0xff] }
  0xec   :  { %9883 = vmatmul.mubr.msk.f32.gmra.mrb[110].mxu1 %vm563_vm0, %v545_v50 }
  0xed   :  { %v11617_v57 = vpack.c.bf16 %v4734_v51, %v4733_v54  ;;  %v9146_v58 = vpop.f32.mrb[6].mxu0  ;;  %9885 = vmatprep.mubr.msk.f32.mxu1 %vm563_vm0, %v546_v53  ;;  %v173_v54 = vld [vmem:[%s13551_s0 + $0x3f8] sm:$0xff] }
  0xee   :  { %v4736_v60 = vmax.f32 %v9146_v58, 0.0  ;;  %v2200_v61 = vpop.f32.mrb[7].mxu0  ;;  %9304 = vmatmul.mubr.msk.f32.gmra.mrb[112].mxu0 %vm563_vm0, %v159_v55  ;;  %v174_v55 = vld [vmem:[%s13551_s0 + $0x400] sm:$0xff] }
  0xef   :  { %v4735_v63 = vmax.f32 %v2200_v61, 0.0  ;;  %9306 = vmatprep.mubr.msk.f32.mxu0 %vm563_vm0, %v160_v56 }
  0xf0   :  { %9886 = vmatmul.mubr.msk.f32.gmra.mrb[112].mxu1 %vm563_vm0, %v547_v59 }
  0xf1   :  { %v11635_v2 = vpack.c.bf16 %v4736_v60, %v4735_v63  ;;  %v9149_v3 = vpop.f32.mrb[8].mxu0  ;;  %9888 = vmatprep.mubr.msk.f32.mxu1 %vm563_vm0, %v548_v62  ;;  %v175_v62 = vld [vmem:[%s13551_s0 + $0x408] sm:$0xff] }
  0xf2   :  { %v4738_v5 = vmax.f32 %v9149_v3, 0.0  ;;  %v2210_v6 = vpop.f32.mrb[9].mxu0  ;;  %9307 = vmatmul.mubr.msk.f32.gmra.mrb[114].mxu0 %vm563_vm0, %v161_v0 }
  0xf3   :  { %v4737_v8 = vmax.f32 %v2210_v6, 0.0  ;;  %9309 = vmatprep.mubr.msk.f32.mxu0 %vm563_vm0, %v162_v1 }
  0xf4   :  { %9889 = vmatmul.mubr.msk.f32.gmra.mrb[114].mxu1 %vm563_vm0, %v549_v4 }
  0xf5   :  { %v11653_v11 = vpack.c.bf16 %v4738_v5, %v4737_v8  ;;  %v9152_v12 = vpop.f32.mrb[10].mxu0  ;;  %9891 = vmatprep.mubr.msk.f32.mxu1 %vm563_vm0, %v550_v7  ;;  %v177_v5 = vld [vmem:[%s13551_s0 + $0x418] sm:$0xff] }
  0xf6   :  { %v4740_v14 = vmax.f32 %v9152_v12, 0.0  ;;  %v2220_v15 = vpop.f32.mrb[11].mxu0  ;;  %9310 = vmatmul.mubr.msk.f32.gmra.mrb[116].mxu0 %vm563_vm0, %v163_v9  ;;  %v179_v12 = vld [vmem:[%s13551_s0 + $0x428] sm:$0xff] }
  0xf7   :  { %v4739_v17 = vmax.f32 %v2220_v15, 0.0  ;;  %9312 = vmatprep.mubr.msk.f32.mxu0 %vm563_vm0, %v164_v10 }
  0xf8   :  { %9892 = vmatmul.mubr.msk.f32.gmra.mrb[116].mxu1 %vm563_vm0, %v551_v13 }
  0xf9   :  { %v11671_v20 = vpack.c.bf16 %v4740_v14, %v4739_v17  ;;  %v9155_v21 = vpop.f32.mrb[12].mxu0  ;;  %9894 = vmatprep.mubr.msk.f32.mxu1 %vm563_vm0, %v552_v16 }
  0xfa   :  { %v4742_v23 = vmax.f32 %v9155_v21, 0.0  ;;  %v2230_v24 = vpop.f32.mrb[13].mxu0  ;;  %9313 = vmatmul.mubr.msk.f32.gmra.mrb[118].mxu0 %vm563_vm0, %v165_v18  ;;  %v181_v18 = vld [vmem:[%s13551_s0 + $0x438] sm:$0xff] }
  0xfb   :  { %v4741_v26 = vmax.f32 %v2230_v24, 0.0  ;;  %9315 = vmatprep.mubr.msk.f32.mxu0 %vm563_vm0, %v166_v19 }
  0xfc   :  { %9895 = vmatmul.mubr.msk.f32.gmra.mrb[118].mxu1 %vm563_vm0, %v553_v22 }
  0xfd   :  { %v11689_v29 = vpack.c.bf16 %v4742_v23, %v4741_v26  ;;  %v9158_v30 = vpop.f32.mrb[14].mxu0  ;;  %9897 = vmatprep.mubr.msk.f32.mxu1 %vm563_vm0, %v554_v25  ;;  %v183_v25 = vld [vmem:[%s13551_s0 + $0x448] sm:$0xff] }
  0xfe   :  { %v4744_v32 = vmax.f32 %v9158_v30, 0.0  ;;  %v2240_v33 = vpop.f32.mrb[15].mxu0  ;;  %9316 = vmatmul.mubr.msk.f32.gmra.mrb[120].mxu0 %vm563_vm0, %v167_v27 }
  0xff   :  { %v4743_v35 = vmax.f32 %v2240_v33, 0.0  ;;  %9318 = vmatprep.mubr.msk.f32.mxu0 %vm563_vm0, %v168_v28 }
 0x100   :  { %9898 = vmatmul.mubr.msk.f32.gmra.mrb[120].mxu1 %vm563_vm0, %v555_v31 }
 0x101   :  { %v11707_v38 = vpack.c.bf16 %v4744_v32, %v4743_v35  ;;  %v9161_v40 = vpop.f32.mrb[16].mxu0  ;;  %9900 = vmatprep.mubr.msk.f32.mxu1 %vm563_vm0, %v556_v34  ;;  %v185_v32 = vld [vmem:[%s13551_s0 + $0x458] sm:$0xff] }
 0x102   :  { %v4746_v42 = vmax.f32 %v9161_v40, 0.0  ;;  %v2250_v43 = vpop.f32.mrb[17].mxu0  ;;  %9319 = vmatmul.mubr.msk.f32.gmra.mrb[122].mxu0 %vm563_vm0, %v169_v36  ;;  %v187_v40 = vld [vmem:[%s13551_s0 + $0x468] sm:$0xff] }
 0x103   :  { %v4745_v45 = vmax.f32 %v2250_v43, 0.0  ;;  %9321 = vmatprep.mubr.msk.f32.mxu0 %vm563_vm0, %v170_v37 }
 0x104   :  { %9901 = vmatmul.mubr.msk.f32.gmra.mrb[122].mxu1 %vm563_vm0, %v557_v41  ;;  %v5241_v41 = vld [vmem:[%s13553_s2] sm:$0xff] }
 0x105   :  { %v9164_v49 = vpop.f32.mrb[18].mxu0  ;;  %v9963_v50 = vpack.c.bf16 %v4746_v42, %v4745_v45  ;;  %5369 = vmatprep.mubr.f32.mxu1 %v5242_v44  ;;  %v5274_v44 = vld [vmem:[%s13553_s2 + $0x108] sm:$0xff] }
 0x106   :  { %v4748_v51 = vmax.f32 %v9164_v49, 0.0  ;;  %v2260_v52 = vpop.f32.mrb[19].mxu0  ;;  %9322 = vmatmul.mubr.msk.f32.gmra.mrb[124].mxu0 %vm563_vm0, %v171_v46  ;;  %v190_v49 = vld [vmem:[%s13551_s0 + $0x480] sm:$0xff] }
 0x107   :  { %v4747_v53 = vmax.f32 %v2260_v52, 0.0  ;;  %9964 = vmatprep.subr.bf16.mxu1 %v9963_v50  ;;  %9324 = vmatprep.mubr.msk.f32.mxu0 %vm563_vm0, %v172_v47  ;;  %v189_v47 = vld [vmem:[%s13551_s0 + $0x478] sm:$0xff]  ;;  %v5273_v50 = vld [vmem:[%s13553_s2 + $0x100] sm:$0xff] }
 0x108   :  { %9966 = vmatpush3.bf16.msra.mxu1 %v11581_v39  ;;  %v176_v39 = vld [vmem:[%s13551_s0 + $0x410] sm:$0xff] }
 0x109   :  { %v9167_v56 = vpop.f32.mrb[20].mxu0  ;;  %v9967_v58 = vpack.c.bf16 %v4748_v51, %v4747_v53  ;;  %v5244_v53 = vld [vmem:[%s13553_s2 + $0x18] sm:$0xff] }
 0x10a   :  { %v4750_v59 = vmax.f32 %v9167_v56, 0.0  ;;  %v2270_v60 = vpop.f32.mrb[21].mxu0  ;;  %9325 = vmatmul.mubr.msk.f32.gmra.mrb[126].mxu0 %vm563_vm0, %v173_v54 }
 0x10b   :  { %v4749_v61 = vmax.f32 %v2270_v60, 0.0  ;;  %9968 = vmatprep.subr.bf16.mxu1 %v9967_v58  ;;  %9327 = vmatprep.mubr.msk.f32.mxu0 %vm563_vm0, %v174_v55  ;;  %v191_v58 = vld [vmem:[%s13551_s0 + $0x488] sm:$0xff] }
 0x10c   :  { %9970 = vmatpush3.bf16.msra.mxu1 %v11599_v48  ;;  %v178_v48 = vld [vmem:[%s13551_s0 + $0x420] sm:$0xff] }
 0x10d   :  { %v9170_v63 = vpop.f32.mrb[22].mxu0  ;;  %v9971_v0 = vpack.c.bf16 %v4750_v59, %v4749_v61  ;;  %v192_v59 = vld [vmem:[%s13551_s0 + $0x490] sm:$0xff] }
 0x10e   :  { %v4752_v1 = vmax.f32 %v9170_v63, 0.0  ;;  %v2280_v3 = vpop.f32.mrb[23].mxu0  ;;  %9328 = vmatmul.mubr.msk.f32.gmra.mrb[128].mxu0 %vm563_vm0, %v175_v62 }
 0x10f   :  { %v4751_v4 = vmax.f32 %v2280_v3, 0.0  ;;  %9972 = vmatprep.subr.bf16.mxu1 %v9971_v0  ;;  %9330 = vmatprep.mubr.msk.f32.mxu0 %vm563_vm0, %v176_v39  ;;  %v193_v0 = vld [vmem:[%s13551_s0 + $0x498] sm:$0xff] }
 0x110   :  { %9974 = vmatpush3.bf16.msra.mxu1 %v11617_v57  ;;  %v180_v57 = vld [vmem:[%s13551_s0 + $0x430] sm:$0xff] }
 0x111   :  { %v9173_v6 = vpop.f32.mrb[24].mxu0  ;;  %v9975_v7 = vpack.c.bf16 %v4752_v1, %v4751_v4  ;;  %v194_v1 = vld [vmem:[%s13551_s0 + $0x4a0] sm:$0xff] }
 0x112   :  { %v4754_v8 = vmax.f32 %v9173_v6, 0.0  ;;  %v2290_v9 = vpop.f32.mrb[25].mxu0  ;;  %9331 = vmatmul.mubr.msk.f32.gmra.mrb[130].mxu0 %vm563_vm0, %v177_v5 }
 0x113   :  { %v4753_v10 = vmax.f32 %v2290_v9, 0.0  ;;  %9976 = vmatprep.subr.bf16.mxu1 %v9975_v7  ;;  %9333 = vmatprep.mubr.msk.f32.mxu0 %vm563_vm0, %v178_v48  ;;  %v195_v7 = vld [vmem:[%s13551_s0 + $0x4a8] sm:$0xff] }
 0x114   :  { %9978 = vmatpush3.bf16.msra.mxu1 %v11635_v2  ;;  %v182_v2 = vld [vmem:[%s13551_s0 + $0x440] sm:$0xff] }
 0x115   :  { %v9176_v13 = vpop.f32.mrb[26].mxu0  ;;  %v9979_v14 = vpack.c.bf16 %v4754_v8, %v4753_v10  ;;  %v196_v8 = vld [vmem:[%s13551_s0 + $0x4b0] sm:$0xff] }
 0x116   :  { %v4756_v15 = vmax.f32 %v9176_v13, 0.0  ;;  %v2300_v16 = vpop.f32.mrb[27].mxu0  ;;  %9334 = vmatmul.mubr.msk.f32.gmra.mrb[132].mxu0 %vm563_vm0, %v179_v12 }
 0x117   :  { %v4755_v17 = vmax.f32 %v2300_v16, 0.0  ;;  %9980 = vmatprep.subr.bf16.mxu1 %v9979_v14  ;;  %9336 = vmatprep.mubr.msk.f32.mxu0 %vm563_vm0, %v180_v57  ;;  %v197_v14 = vld [vmem:[%s13551_s0 + $0x4b8] sm:$0xff] }
 0x118   :  { %9982 = vmatpush3.bf16.msra.mxu1 %v11653_v11  ;;  %v184_v11 = vld [vmem:[%s13551_s0 + $0x450] sm:$0xff] }
 0x119   :  { %v9179_v19 = vpop.f32.mrb[28].mxu0  ;;  %v9983_v21 = vpack.c.bf16 %v4756_v15, %v4755_v17  ;;  %v198_v15 = vld [vmem:[%s13551_s0 + $0x4c0] sm:$0xff] }
 0x11a   :  { %v4758_v22 = vmax.f32 %v9179_v19, 0.0  ;;  %v2310_v23 = vpop.f32.mrb[29].mxu0  ;;  %9337 = vmatmul.mubr.msk.f32.gmra.mrb[134].mxu0 %vm563_vm0, %v181_v18 }
 0x11b   :  { %v4757_v24 = vmax.f32 %v2310_v23, 0.0  ;;  %9984 = vmatprep.subr.bf16.mxu1 %v9983_v21  ;;  %9339 = vmatprep.mubr.msk.f32.mxu0 %vm563_vm0, %v182_v2  ;;  %v199_v21 = vld [vmem:[%s13551_s0 + $0x4c8] sm:$0xff] }
 0x11c   :  { %9986 = vmatpush3.bf16.msra.mxu1 %v11671_v20  ;;  %v186_v20 = vld [vmem:[%s13551_s0 + $0x460] sm:$0xff] }
 0x11d   :  { %v9182_v26 = vpop.f32.mrb[30].mxu0  ;;  %v9987_v27 = vpack.c.bf16 %v4758_v22, %v4757_v24  ;;  %v200_v22 = vld [vmem:[%s13551_s0 + $0x4d0] sm:$0xff] }
 0x11e   :  { %v4760_v28 = vmax.f32 %v9182_v26, 0.0  ;;  %v2320_v30 = vpop.f32.mrb[31].mxu0  ;;  %9340 = vmatmul.mubr.msk.f32.gmra.mrb[136].mxu0 %vm563_vm0, %v183_v25 }
 0x11f   :  { %v4759_v31 = vmax.f32 %v2320_v30, 0.0  ;;  %9988 = vmatprep.subr.bf16.mxu1 %v9987_v27  ;;  %9342 = vmatprep.mubr.msk.f32.mxu0 %vm563_vm0, %v184_v11  ;;  %v201_v27 = vld [vmem:[%s13551_s0 + $0x4d8] sm:$0xff] }
 0x120   :  { %9990 = vmatpush3.bf16.msra.mxu1 %v11689_v29  ;;  %v188_v29 = vld [vmem:[%s13551_s0 + $0x470] sm:$0xff] }
 0x121   :  { %v9185_v33 = vpop.f32.mrb[32].mxu0  ;;  %v9991_v34 = vpack.c.bf16 %v4760_v28, %v4759_v31  ;;  %v202_v28 = vld [vmem:[%s13551_s0 + $0x4e0] sm:$0xff] }
 0x122   :  { %v4762_v35 = vmax.f32 %v9185_v33, 0.0  ;;  %v2330_v36 = vpop.f32.mrb[33].mxu0  ;;  %9343 = vmatmul.mubr.msk.f32.gmra.mrb[138].mxu0 %vm563_vm0, %v185_v32 }
 0x123   :  { %v4761_v37 = vmax.f32 %v2330_v36, 0.0  ;;  %9992 = vmatprep.subr.bf16.mxu1 %v9991_v34  ;;  %9345 = vmatprep.mubr.msk.f32.mxu0 %vm563_vm0, %v186_v20  ;;  %v203_v34 = vld [vmem:[%s13551_s0 + $0x4e8] sm:$0xff] }
 0x124   :  { %9994 = vmatpush3.bf16.msra.mxu1 %v11707_v38 }
 0x125   :  { %v11800_v42 = vpack.c.bf16 %v4762_v35, %v4761_v37  ;;  %v9188_v43 = vpop.f32.mrb[34].mxu0  ;;  %v204_v35 = vld [vmem:[%s13551_s0 + $0x4f0] sm:$0xff] }
 0x126   :  { %v4764_v45 = vmax.f32 %v9188_v43, 0.0  ;;  %v2340_v46 = vpop.f32.mrb[35].mxu0  ;;  %9346 = vmatmul.mubr.msk.f32.gmra.mrb[140].mxu0 %vm563_vm0, %v187_v40  ;;  %v205_v43 = vld [vmem:[%s13551_s0 + $0x4f8] sm:$0xff] }
 0x127   :  { %v4763_v38 = vmax.f32 %v2340_v46, 0.0  ;;  %9348 = vmatprep.mubr.msk.f32.mxu0 %vm563_vm0, %v188_v29  ;;  %5370 = vmatmul.mubr.f32.vlgmr.msra.gmra.mrb[124].mxu1 %v5241_v41 }
 0x128   :  { %5374 = vmatprep.mubr.f32.mxu1 %v5274_v44  ;;  %v206_v44 = vld [vmem:[%s13551_s0 + $0x500] sm:$0xff] }
 0x129   :  { %v11816_v51 = vpack.c.bf16 %v4764_v45, %v4763_v38  ;;  %v9191_v52 = vpop.f32.mrb[36].mxu0 }
 0x12a   :  { %v4766_v54 = vmax.f32 %v9191_v52, 0.0  ;;  %v2350_v55 = vpop.f32.mrb[37].mxu0  ;;  %9349 = vmatmul.mubr.msk.f32.gmra.mrb[142].mxu0 %vm563_vm0, %v189_v47 }
 0x12b   :  { %v4765_v56 = vmax.f32 %v2350_v55, 0.0  ;;  %9351 = vmatprep.mubr.msk.f32.mxu0 %vm563_vm0, %v190_v49  ;;  %5375 = vmatmul.mubr.f32.gmra.mrb[126].mxu1 %v5273_v50  ;;  %v207_v50 = vld [vmem:[%s13551_s0 + $0x508] sm:$0xff] }
 0x12c   :  { %5444 = vmatprep.mubr.f32.mxu1 %v5244_v53 }
 0x12d   :  { %v11829_v60 = vpack.c.bf16 %v4766_v54, %v4765_v56  ;;  %v9194_v61 = vpop.f32.mrb[38].mxu0 }
 0x12e   :  { %v4768_v62 = vmax.f32 %v9194_v61, 0.0  ;;  %v2360_v39 = vpop.f32.mrb[39].mxu0  ;;  %9352 = vmatmul.mubr.msk.f32.gmra.mrb[144].mxu0 %vm563_vm0, %v191_v58  ;;  %v209_v58 = vld [vmem:[%s13551_s0 + $0x518] sm:$0xff] }
 0x12f   :  { %v4767_v63 = vmax.f32 %v2360_v39, 0.0  ;;  %9354 = vmatprep.mubr.msk.f32.mxu0 %vm563_vm0, %v192_v59 }
 0x131   :  { %v11839_v3 = vpack.c.bf16 %v4768_v62, %v4767_v63  ;;  %v9197_v4 = vpop.f32.mrb[40].mxu0 }
 0x132   :  { %v4770_v5 = vmax.f32 %v9197_v4, 0.0  ;;  %v2370_v48 = vpop.f32.mrb[41].mxu0  ;;  %9355 = vmatmul.mubr.msk.f32.gmra.mrb[146].mxu0 %vm563_vm0, %v193_v0  ;;  %v211_v0 = vld [vmem:[%s13551_s0 + $0x528] sm:$0xff] }
 0x133   :  { %v4769_v6 = vmax.f32 %v2370_v48, 0.0  ;;  %9357 = vmatprep.mubr.msk.f32.mxu0 %vm563_vm0, %v194_v1 }
 0x135   :  { %v11849_v9 = vpack.c.bf16 %v4770_v5, %v4769_v6  ;;  %v9200_v10 = vpop.f32.mrb[42].mxu0 }
 0x136   :  { %v4772_v12 = vmax.f32 %v9200_v10, 0.0  ;;  %v2380_v57 = vpop.f32.mrb[43].mxu0  ;;  %9358 = vmatmul.mubr.msk.f32.gmra.mrb[148].mxu0 %vm563_vm0, %v195_v7  ;;  %v213_v7 = vld [vmem:[%s13551_s0 + $0x538] sm:$0xff] }
 0x137   :  { %v4771_v13 = vmax.f32 %v2380_v57, 0.0  ;;  %9360 = vmatprep.mubr.msk.f32.mxu0 %vm563_vm0, %v196_v8 }
 0x139   :  { %v11859_v16 = vpack.c.bf16 %v4772_v12, %v4771_v13  ;;  %v9203_v17 = vpop.f32.mrb[44].mxu0 }
 0x13a   :  { %v4774_v18 = vmax.f32 %v9203_v17, 0.0  ;;  %v2390_v2 = vpop.f32.mrb[45].mxu0  ;;  %9361 = vmatmul.mubr.msk.f32.gmra.mrb[150].mxu0 %vm563_vm0, %v197_v14  ;;  %v215_v14 = vld [vmem:[%s13551_s0 + $0x548] sm:$0xff] }
 0x13b   :  { %v4773_v19 = vmax.f32 %v2390_v2, 0.0  ;;  %9363 = vmatprep.mubr.msk.f32.mxu0 %vm563_vm0, %v198_v15 }
 0x13d   :  { %v11869_v23 = vpack.c.bf16 %v4774_v18, %v4773_v19  ;;  %v9206_v24 = vpop.f32.mrb[46].mxu0 }
 0x13e   :  { %v4776_v25 = vmax.f32 %v9206_v24, 0.0  ;;  %v2400_v11 = vpop.f32.mrb[47].mxu0  ;;  %9364 = vmatmul.mubr.msk.f32.gmra.mrb[152].mxu0 %vm563_vm0, %v199_v21  ;;  %v217_v21 = vld [vmem:[%s13551_s0 + $0x558] sm:$0xff] }
 0x13f   :  { %v4775_v26 = vmax.f32 %v2400_v11, 0.0  ;;  %9366 = vmatprep.mubr.msk.f32.mxu0 %vm563_vm0, %v200_v22 }
 0x141   :  { %v11879_v30 = vpack.c.bf16 %v4776_v25, %v4775_v26  ;;  %v9209_v31 = vpop.f32.mrb[48].mxu0 }
 0x142   :  { %v4778_v32 = vmax.f32 %v9209_v31, 0.0  ;;  %v2410_v20 = vpop.f32.mrb[49].mxu0  ;;  %9367 = vmatmul.mubr.msk.f32.gmra.mrb[154].mxu0 %vm563_vm0, %v201_v27  ;;  %v219_v27 = vld [vmem:[%s13551_s0 + $0x568] sm:$0xff] }
 0x143   :  { %v4777_v33 = vmax.f32 %v2410_v20, 0.0  ;;  %9369 = vmatprep.mubr.msk.f32.mxu0 %vm563_vm0, %v202_v28  ;;  %v5243_v28 = vld [vmem:[%s13553_s2 + $0x10] sm:$0xff]  ;;  %v5276_v20 = vld [vmem:[%s13553_s2 + $0x118] sm:$0xff] }
 0x145   :  { %v9212_v36 = vpop.f32.mrb[50].mxu0  ;;  %v9995_v37 = vpack.c.bf16 %v4778_v32, %v4777_v33 }
 0x146   :  { %v4780_v40 = vmax.f32 %v9212_v36, 0.0  ;;  %v2420_v29 = vpop.f32.mrb[51].mxu0  ;;  %9370 = vmatmul.mubr.msk.f32.gmra.mrb[156].mxu0 %vm563_vm0, %v203_v34  ;;  %v222_v36 = vld [vmem:[%s13551_s0 + $0x580] sm:$0xff] }
 0x147   :  { %v4779_v41 = vmax.f32 %v2420_v29, 0.0  ;;  %9996 = vmatprep.subr.bf16.mxu1 %v9995_v37  ;;  %9372 = vmatprep.mubr.msk.f32.mxu0 %vm563_vm0, %v204_v35  ;;  %v221_v35 = vld [vmem:[%s13551_s0 + $0x578] sm:$0xff]  ;;  %v5275_v37 = vld [vmem:[%s13553_s2 + $0x110] sm:$0xff] }
 0x148   :  { %9998 = vmatpush3.bf16.msra.mxu1 %v11800_v42  ;;  %v208_v42 = vld [vmem:[%s13551_s0 + $0x510] sm:$0xff] }
 0x149   :  { %v9215_v45 = vpop.f32.mrb[52].mxu0  ;;  %v9999_v46 = vpack.c.bf16 %v4780_v40, %v4779_v41  ;;  %v5246_v41 = vld [vmem:[%s13553_s2 + $0x28] sm:$0xff] }
 0x14a   :  { %v4782_v38 = vmax.f32 %v9215_v45, 0.0  ;;  %v2430_v47 = vpop.f32.mrb[53].mxu0  ;;  %9373 = vmatmul.mubr.msk.f32.gmra.mrb[158].mxu0 %vm563_vm0, %v205_v43 }
 0x14b   :  { %v4781_v49 = vmax.f32 %v2430_v47, 0.0  ;;  %10000 = vmatprep.subr.bf16.mxu1 %v9999_v46  ;;  %9375 = vmatprep.mubr.msk.f32.mxu0 %vm563_vm0, %v206_v44  ;;  %v223_v46 = vld [vmem:[%s13551_s0 + $0x588] sm:$0xff] }
 0x14c   :  { %10002 = vmatpush3.bf16.msra.mxu1 %v11816_v51  ;;  %v210_v51 = vld [vmem:[%s13551_s0 + $0x520] sm:$0xff] }
 0x14d   :  { %v9218_v52 = vpop.f32.mrb[54].mxu0  ;;  %v10003_v53 = vpack.c.bf16 %v4782_v38, %v4781_v49  ;;  %v224_v38 = vld [vmem:[%s13551_s0 + $0x590] sm:$0xff] }
 0x14e   :  { %v4784_v54 = vmax.f32 %v9218_v52, 0.0  ;;  %v2440_v55 = vpop.f32.mrb[55].mxu0  ;;  %9376 = vmatmul.mubr.msk.f32.gmra.mrb[160].mxu0 %vm563_vm0, %v207_v50 }
 0x14f   :  { %v4783_v56 = vmax.f32 %v2440_v55, 0.0  ;;  %10004 = vmatprep.subr.bf16.mxu1 %v10003_v53  ;;  %9378 = vmatprep.mubr.msk.f32.mxu0 %vm563_vm0, %v208_v42  ;;  %v225_v53 = vld [vmem:[%s13551_s0 + $0x598] sm:$0xff] }
 0x150   :  { %10006 = vmatpush3.bf16.msra.mxu1 %v11829_v60  ;;  %v212_v60 = vld [vmem:[%s13551_s0 + $0x530] sm:$0xff] }
 0x151   :  { %v9221_v59 = vpop.f32.mrb[56].mxu0  ;;  %v10007_v61 = vpack.c.bf16 %v4784_v54, %v4783_v56  ;;  %v226_v54 = vld [vmem:[%s13551_s0 + $0x5a0] sm:$0xff] }
 0x152   :  { %v4786_v62 = vmax.f32 %v9221_v59, 0.0  ;;  %v2450_v39 = vpop.f32.mrb[57].mxu0  ;;  %9379 = vmatmul.mubr.msk.f32.gmra.mrb[162].mxu0 %vm563_vm0, %v209_v58 }
 0x153   :  { %v4785_v63 = vmax.f32 %v2450_v39, 0.0  ;;  %10008 = vmatprep.subr.bf16.mxu1 %v10007_v61  ;;  %9381 = vmatprep.mubr.msk.f32.mxu0 %vm563_vm0, %v210_v51  ;;  %v227_v61 = vld [vmem:[%s13551_s0 + $0x5a8] sm:$0xff] }
 0x154   :  { %10010 = vmatpush3.bf16.msra.mxu1 %v11839_v3  ;;  %v214_v3 = vld [vmem:[%s13551_s0 + $0x540] sm:$0xff] }
 0x155   :  { %v9224_v1 = vpop.f32.mrb[58].mxu0  ;;  %v10011_v4 = vpack.c.bf16 %v4786_v62, %v4785_v63  ;;  %v228_v62 = vld [vmem:[%s13551_s0 + $0x5b0] sm:$0xff] }
 0x156   :  { %v4788_v5 = vmax.f32 %v9224_v1, 0.0  ;;  %v2460_v48 = vpop.f32.mrb[59].mxu0  ;;  %9382 = vmatmul.mubr.msk.f32.gmra.mrb[164].mxu0 %vm563_vm0, %v211_v0 }
 0x157   :  { %v4787_v6 = vmax.f32 %v2460_v48, 0.0  ;;  %10012 = vmatprep.subr.bf16.mxu1 %v10011_v4  ;;  %9384 = vmatprep.mubr.msk.f32.mxu0 %vm563_vm0, %v212_v60  ;;  %v229_v4 = vld [vmem:[%s13551_s0 + $0x5b8] sm:$0xff] }
 0x158   :  { %10014 = vmatpush3.bf16.msra.mxu1 %v11849_v9  ;;  %v216_v9 = vld [vmem:[%s13551_s0 + $0x550] sm:$0xff] }
 0x159   :  { %v9227_v8 = vpop.f32.mrb[60].mxu0  ;;  %v10015_v10 = vpack.c.bf16 %v4788_v5, %v4787_v6  ;;  %v230_v5 = vld [vmem:[%s13551_s0 + $0x5c0] sm:$0xff] }
 0x15a   :  { %v4790_v12 = vmax.f32 %v9227_v8, 0.0  ;;  %v2470_v57 = vpop.f32.mrb[61].mxu0  ;;  %9385 = vmatmul.mubr.msk.f32.gmra.mrb[166].mxu0 %vm563_vm0, %v213_v7 }
 0x15b   :  { %v4789_v13 = vmax.f32 %v2470_v57, 0.0  ;;  %10016 = vmatprep.subr.bf16.mxu1 %v10015_v10  ;;  %9387 = vmatprep.mubr.msk.f32.mxu0 %vm563_vm0, %v214_v3  ;;  %v231_v10 = vld [vmem:[%s13551_s0 + $0x5c8] sm:$0xff] }
 0x15c   :  { %10018 = vmatpush3.bf16.msra.mxu1 %v11859_v16  ;;  %v218_v16 = vld [vmem:[%s13551_s0 + $0x560] sm:$0xff] }
 0x15d   :  { %v9230_v15 = vpop.f32.mrb[62].mxu0  ;;  %v10019_v17 = vpack.c.bf16 %v4790_v12, %v4789_v13  ;;  %v232_v12 = vld [vmem:[%s13551_s0 + $0x5d0] sm:$0xff] }
 0x15e   :  { %v4792_v18 = vmax.f32 %v9230_v15, 0.0  ;;  %v2480_v2 = vpop.f32.mrb[63].mxu0  ;;  %9388 = vmatmul.mubr.msk.f32.gmra.mrb[168].mxu0 %vm563_vm0, %v215_v14 }
 0x15f   :  { %v4791_v19 = vmax.f32 %v2480_v2, 0.0  ;;  %10020 = vmatprep.subr.bf16.mxu1 %v10019_v17  ;;  %9390 = vmatprep.mubr.msk.f32.mxu0 %vm563_vm0, %v216_v9  ;;  %v233_v17 = vld [vmem:[%s13551_s0 + $0x5d8] sm:$0xff] }
 0x160   :  { %10022 = vmatpush3.bf16.msra.mxu1 %v11869_v23  ;;  %v220_v23 = vld [vmem:[%s13551_s0 + $0x570] sm:$0xff] }
 0x161   :  { %v9233_v22 = vpop.f32.mrb[64].mxu0  ;;  %v10023_v24 = vpack.c.bf16 %v4792_v18, %v4791_v19  ;;  %v234_v18 = vld [vmem:[%s13551_s0 + $0x5e0] sm:$0xff] }
 0x162   :  { %v4794_v25 = vmax.f32 %v9233_v22, 0.0  ;;  %v2490_v11 = vpop.f32.mrb[65].mxu0  ;;  %9391 = vmatmul.mubr.msk.f32.gmra.mrb[170].mxu0 %vm563_vm0, %v217_v21 }
 0x163   :  { %v4793_v26 = vmax.f32 %v2490_v11, 0.0  ;;  %10024 = vmatprep.subr.bf16.mxu1 %v10023_v24  ;;  %9393 = vmatprep.mubr.msk.f32.mxu0 %vm563_vm0, %v218_v16  ;;  %v235_v24 = vld [vmem:[%s13551_s0 + $0x5e8] sm:$0xff] }
 0x164   :  { %10026 = vmatpush3.bf16.msra.mxu1 %v11879_v30 }
 0x165   :  { %v11964_v31 = vpack.c.bf16 %v4794_v25, %v4793_v26  ;;  %v9236_v32 = vpop.f32.mrb[66].mxu0  ;;  %v236_v25 = vld [vmem:[%s13551_s0 + $0x5f0] sm:$0xff] }
 0x166   :  { %v4796_v33 = vmax.f32 %v9236_v32, 0.0  ;;  %v2500_v34 = vpop.f32.mrb[67].mxu0  ;;  %9394 = vmatmul.mubr.msk.f32.gmra.mrb[172].mxu0 %vm563_vm0, %v219_v27  ;;  %v237_v32 = vld [vmem:[%s13551_s0 + $0x5f8] sm:$0xff] }
 0x167   :  { %v4795_v30 = vmax.f32 %v2500_v34, 0.0  ;;  %9396 = vmatprep.mubr.msk.f32.mxu0 %vm563_vm0, %v220_v23  ;;  %5445 = vmatmul.mubr.f32.vlgmr.msra.gmra.mrb[128].mxu1 %v5243_v28 }
 0x168   :  { %5449 = vmatprep.mubr.f32.mxu1 %v5276_v20  ;;  %v238_v20 = vld [vmem:[%s13551_s0 + $0x600] sm:$0xff] }
 0x169   :  { %v11980_v40 = vpack.c.bf16 %v4796_v33, %v4795_v30  ;;  %v9239_v29 = vpop.f32.mrb[68].mxu0 }
 0x16a   :  { %v4798_v43 = vmax.f32 %v9239_v29, 0.0  ;;  %v2510_v44 = vpop.f32.mrb[69].mxu0  ;;  %9397 = vmatmul.mubr.msk.f32.gmra.mrb[174].mxu0 %vm563_vm0, %v221_v35 }
 0x16b   :  { %v4797_v45 = vmax.f32 %v2510_v44, 0.0  ;;  %9399 = vmatprep.mubr.msk.f32.mxu0 %vm563_vm0, %v222_v36  ;;  %5450 = vmatmul.mubr.f32.gmra.mrb[130].mxu1 %v5275_v37  ;;  %v239_v37 = vld [vmem:[%s13551_s0 + $0x608] sm:$0xff] }
 0x16c   :  { %5519 = vmatprep.mubr.f32.mxu1 %v5246_v41 }
 0x16d   :  { %v11993_v47 = vpack.c.bf16 %v4798_v43, %v4797_v45  ;;  %v9242_v49 = vpop.f32.mrb[70].mxu0 }
 0x16e   :  { %v4800_v50 = vmax.f32 %v9242_v49, 0.0  ;;  %v2520_v42 = vpop.f32.mrb[71].mxu0  ;;  %9400 = vmatmul.mubr.msk.f32.gmra.mrb[176].mxu0 %vm563_vm0, %v223_v46  ;;  %v241_v46 = vld [vmem:[%s13551_s0 + $0x618] sm:$0xff] }
 0x16f   :  { %v4799_v52 = vmax.f32 %v2520_v42, 0.0  ;;  %9402 = vmatprep.mubr.msk.f32.mxu0 %vm563_vm0, %v224_v38 }
 0x171   :  { %v12003_v55 = vpack.c.bf16 %v4800_v50, %v4799_v52  ;;  %v9245_v56 = vpop.f32.mrb[72].mxu0 }
 0x172   :  { %v4802_v58 = vmax.f32 %v9245_v56, 0.0  ;;  %v2530_v51 = vpop.f32.mrb[73].mxu0  ;;  %9403 = vmatmul.mubr.msk.f32.gmra.mrb[178].mxu0 %vm563_vm0, %v225_v53  ;;  %v243_v53 = vld [vmem:[%s13551_s0 + $0x628] sm:$0xff] }
 0x173   :  { %v4801_v59 = vmax.f32 %v2530_v51, 0.0  ;;  %9405 = vmatprep.mubr.msk.f32.mxu0 %vm563_vm0, %v226_v54 }
 0x175   :  { %v12013_v39 = vpack.c.bf16 %v4802_v58, %v4801_v59  ;;  %v9248_v63 = vpop.f32.mrb[74].mxu0 }
 0x176   :  { %v4804_v0 = vmax.f32 %v9248_v63, 0.0  ;;  %v2540_v60 = vpop.f32.mrb[75].mxu0  ;;  %9406 = vmatmul.mubr.msk.f32.gmra.mrb[180].mxu0 %vm563_vm0, %v227_v61  ;;  %v245_v61 = vld [vmem:[%s13551_s0 + $0x638] sm:$0xff] }
 0x177   :  { %v4803_v1 = vmax.f32 %v2540_v60, 0.0  ;;  %9408 = vmatprep.mubr.msk.f32.mxu0 %vm563_vm0, %v228_v62 }
 0x179   :  { %v12023_v48 = vpack.c.bf16 %v4804_v0, %v4803_v1  ;;  %v9251_v6 = vpop.f32.mrb[76].mxu0 }
 0x17a   :  { %v4806_v7 = vmax.f32 %v9251_v6, 0.0  ;;  %v2550_v3 = vpop.f32.mrb[77].mxu0  ;;  %9409 = vmatmul.mubr.msk.f32.gmra.mrb[182].mxu0 %vm563_vm0, %v229_v4  ;;  %v247_v4 = vld [vmem:[%s13551_s0 + $0x648] sm:$0xff] }
 0x17b   :  { %v4805_v8 = vmax.f32 %v2550_v3, 0.0  ;;  %9411 = vmatprep.mubr.msk.f32.mxu0 %vm563_vm0, %v230_v5 }
 0x17d   :  { %v12033_v57 = vpack.c.bf16 %v4806_v7, %v4805_v8  ;;  %v9254_v13 = vpop.f32.mrb[78].mxu0 }
 0x17e   :  { %v4808_v14 = vmax.f32 %v9254_v13, 0.0  ;;  %v2560_v9 = vpop.f32.mrb[79].mxu0  ;;  %9412 = vmatmul.mubr.msk.f32.gmra.mrb[184].mxu0 %vm563_vm0, %v231_v10  ;;  %v249_v10 = vld [vmem:[%s13551_s0 + $0x658] sm:$0xff] }
 0x17f   :  { %v4807_v15 = vmax.f32 %v2560_v9, 0.0  ;;  %9414 = vmatprep.mubr.msk.f32.mxu0 %vm563_vm0, %v232_v12 }
 0x181   :  { %v12043_v2 = vpack.c.bf16 %v4808_v14, %v4807_v15  ;;  %v9257_v19 = vpop.f32.mrb[80].mxu0 }
 0x182   :  { %v4810_v21 = vmax.f32 %v9257_v19, 0.0  ;;  %v2570_v16 = vpop.f32.mrb[81].mxu0  ;;  %9415 = vmatmul.mubr.msk.f32.gmra.mrb[186].mxu0 %vm563_vm0, %v233_v17  ;;  %v251_v17 = vld [vmem:[%s13551_s0 + $0x668] sm:$0xff] }
 0x183   :  { %v4809_v22 = vmax.f32 %v2570_v16, 0.0  ;;  %9417 = vmatprep.mubr.msk.f32.mxu0 %vm563_vm0, %v234_v18  ;;  %v5245_v18 = vld [vmem:[%s13553_s2 + $0x20] sm:$0xff]  ;;  %v5278_v16 = vld [vmem:[%s13553_s2 + $0x128] sm:$0xff] }
 0x185   :  { %v9260_v11 = vpop.f32.mrb[82].mxu0  ;;  %v10027_v26 = vpack.c.bf16 %v4810_v21, %v4809_v22 }
 0x186   :  { %v4812_v27 = vmax.f32 %v9260_v11, 0.0  ;;  %v2580_v23 = vpop.f32.mrb[83].mxu0  ;;  %9418 = vmatmul.mubr.msk.f32.gmra.mrb[188].mxu0 %vm563_vm0, %v235_v24  ;;  %v254_v11 = vld [vmem:[%s13551_s0 + $0x680] sm:$0xff] }
 0x187   :  { %v4811_v28 = vmax.f32 %v2580_v23, 0.0  ;;  %10028 = vmatprep.subr.bf16.mxu1 %v10027_v26  ;;  %9420 = vmatprep.mubr.msk.f32.mxu0 %vm563_vm0, %v236_v25  ;;  %v253_v25 = vld [vmem:[%s13551_s0 + $0x678] sm:$0xff]  ;;  %v5277_v26 = vld [vmem:[%s13553_s2 + $0x120] sm:$0xff] }
 0x188   :  { %10030 = vmatpush3.bf16.msra.mxu1 %v11964_v31  ;;  %v240_v31 = vld [vmem:[%s13551_s0 + $0x610] sm:$0xff] }
 0x189   :  { %v9263_v33 = vpop.f32.mrb[84].mxu0  ;;  %v10031_v34 = vpack.c.bf16 %v4812_v27, %v4811_v28  ;;  %v5248_v28 = vld [vmem:[%s13553_s2 + $0x38] sm:$0xff] }
 0x18a   :  { %v4814_v30 = vmax.f32 %v9263_v33, 0.0  ;;  %v2590_v35 = vpop.f32.mrb[85].mxu0  ;;  %9421 = vmatmul.mubr.msk.f32.gmra.mrb[190].mxu0 %vm563_vm0, %v237_v32 }
 0x18b   :  { %v4813_v36 = vmax.f32 %v2590_v35, 0.0  ;;  %10032 = vmatprep.subr.bf16.mxu1 %v10031_v34  ;;  %9423 = vmatprep.mubr.msk.f32.mxu0 %vm563_vm0, %v238_v20  ;;  %v255_v34 = vld [vmem:[%s13551_s0 + $0x688] sm:$0xff] }
 0x18c   :  { %10034 = vmatpush3.bf16.msra.mxu1 %v11980_v40  ;;  %v242_v40 = vld [vmem:[%s13551_s0 + $0x620] sm:$0xff] }
 0x18d   :  { %v9266_v29 = vpop.f32.mrb[86].mxu0  ;;  %v10035_v41 = vpack.c.bf16 %v4814_v30, %v4813_v36  ;;  %v256_v30 = vld [vmem:[%s13551_s0 + $0x690] sm:$0xff] }
 0x18e   :  { %v4816_v43 = vmax.f32 %v9266_v29, 0.0  ;;  %v2600_v44 = vpop.f32.mrb[87].mxu0  ;;  %9424 = vmatmul.mubr.msk.f32.gmra.mrb[192].mxu0 %vm563_vm0, %v239_v37 }
 0x18f   :  { %v4815_v45 = vmax.f32 %v2600_v44, 0.0  ;;  %10036 = vmatprep.subr.bf16.mxu1 %v10035_v41  ;;  %9426 = vmatprep.mubr.msk.f32.mxu0 %vm563_vm0, %v240_v31  ;;  %v257_v41 = vld [vmem:[%s13551_s0 + $0x698] sm:$0xff] }
 0x190   :  { %10038 = vmatpush3.bf16.msra.mxu1 %v11993_v47  ;;  %v244_v47 = vld [vmem:[%s13551_s0 + $0x630] sm:$0xff] }
 0x191   :  { %v9269_v38 = vpop.f32.mrb[88].mxu0  ;;  %v10039_v49 = vpack.c.bf16 %v4816_v43, %v4815_v45  ;;  %v258_v43 = vld [vmem:[%s13551_s0 + $0x6a0] sm:$0xff] }
 0x192   :  { %v4818_v50 = vmax.f32 %v9269_v38, 0.0  ;;  %v2610_v42 = vpop.f32.mrb[89].mxu0  ;;  %9427 = vmatmul.mubr.msk.f32.gmra.mrb[194].mxu0 %vm563_vm0, %v241_v46 }
 0x193   :  { %v4817_v52 = vmax.f32 %v2610_v42, 0.0  ;;  %10040 = vmatprep.subr.bf16.mxu1 %v10039_v49  ;;  %9429 = vmatprep.mubr.msk.f32.mxu0 %vm563_vm0, %v242_v40  ;;  %v259_v49 = vld [vmem:[%s13551_s0 + $0x6a8] sm:$0xff] }
 0x194   :  { %10042 = vmatpush3.bf16.msra.mxu1 %v12003_v55  ;;  %v246_v55 = vld [vmem:[%s13551_s0 + $0x640] sm:$0xff] }
 0x195   :  { %v9272_v54 = vpop.f32.mrb[90].mxu0  ;;  %v10043_v56 = vpack.c.bf16 %v4818_v50, %v4817_v52  ;;  %v260_v50 = vld [vmem:[%s13551_s0 + $0x6b0] sm:$0xff] }
 0x196   :  { %v4820_v58 = vmax.f32 %v9272_v54, 0.0  ;;  %v2620_v51 = vpop.f32.mrb[91].mxu0  ;;  %9430 = vmatmul.mubr.msk.f32.gmra.mrb[196].mxu0 %vm563_vm0, %v243_v53 }
 0x197   :  { %v4819_v59 = vmax.f32 %v2620_v51, 0.0  ;;  %10044 = vmatprep.subr.bf16.mxu1 %v10043_v56  ;;  %9432 = vmatprep.mubr.msk.f32.mxu0 %vm563_vm0, %v244_v47  ;;  %v261_v56 = vld [vmem:[%s13551_s0 + $0x6b8] sm:$0xff] }
 0x198   :  { %10046 = vmatpush3.bf16.msra.mxu1 %v12013_v39  ;;  %v248_v39 = vld [vmem:[%s13551_s0 + $0x650] sm:$0xff] }
 0x199   :  { %v9275_v62 = vpop.f32.mrb[92].mxu0  ;;  %v10047_v63 = vpack.c.bf16 %v4820_v58, %v4819_v59  ;;  %v262_v58 = vld [vmem:[%s13551_s0 + $0x6c0] sm:$0xff] }
 0x19a   :  { %v4822_v0 = vmax.f32 %v9275_v62, 0.0  ;;  %v2630_v60 = vpop.f32.mrb[93].mxu0  ;;  %9433 = vmatmul.mubr.msk.f32.gmra.mrb[198].mxu0 %vm563_vm0, %v245_v61 }
 0x19b   :  { %v4821_v1 = vmax.f32 %v2630_v60, 0.0  ;;  %10048 = vmatprep.subr.bf16.mxu1 %v10047_v63  ;;  %9435 = vmatprep.mubr.msk.f32.mxu0 %vm563_vm0, %v246_v55  ;;  %v263_v63 = vld [vmem:[%s13551_s0 + $0x6c8] sm:$0xff] }
 0x19c   :  { %10050 = vmatpush3.bf16.msra.mxu1 %v12023_v48  ;;  %v250_v48 = vld [vmem:[%s13551_s0 + $0x660] sm:$0xff] }
 0x19d   :  { %v9278_v5 = vpop.f32.mrb[94].mxu0  ;;  %v10051_v6 = vpack.c.bf16 %v4822_v0, %v4821_v1  ;;  %v264_v0 = vld [vmem:[%s13551_s0 + $0x6d0] sm:$0xff] }
 0x19e   :  { %v4824_v7 = vmax.f32 %v9278_v5, 0.0  ;;  %v2640_v3 = vpop.f32.mrb[95].mxu0  ;;  %9436 = vmatmul.mubr.msk.f32.gmra.mrb[200].mxu0 %vm563_vm0, %v247_v4 }
 0x19f   :  { %v4823_v8 = vmax.f32 %v2640_v3, 0.0  ;;  %10052 = vmatprep.subr.bf16.mxu1 %v10051_v6  ;;  %9438 = vmatprep.mubr.msk.f32.mxu0 %vm563_vm0, %v248_v39  ;;  %v265_v6 = vld [vmem:[%s13551_s0 + $0x6d8] sm:$0xff] }
 0x1a0   :  { %10054 = vmatpush3.bf16.msra.mxu1 %v12033_v57  ;;  %v252_v57 = vld [vmem:[%s13551_s0 + $0x670] sm:$0xff] }
 0x1a1   :  { %v9281_v12 = vpop.f32.mrb[96].mxu0  ;;  %v10055_v13 = vpack.c.bf16 %v4824_v7, %v4823_v8  ;;  %v266_v7 = vld [vmem:[%s13551_s0 + $0x6e0] sm:$0xff] }
 0x1a2   :  { %v4826_v14 = vmax.f32 %v9281_v12, 0.0  ;;  %v2650_v9 = vpop.f32.mrb[97].mxu0  ;;  %9439 = vmatmul.mubr.msk.f32.gmra.mrb[202].mxu0 %vm563_vm0, %v249_v10 }
 0x1a3   :  { %v4825_v15 = vmax.f32 %v2650_v9, 0.0  ;;  %10056 = vmatprep.subr.bf16.mxu1 %v10055_v13  ;;  %9441 = vmatprep.mubr.msk.f32.mxu0 %vm563_vm0, %v250_v48  ;;  %v267_v13 = vld [vmem:[%s13551_s0 + $0x6e8] sm:$0xff] }
 0x1a4   :  { %10058 = vmatpush3.bf16.msra.mxu1 %v12043_v2 }
 0x1a5   :  { %v12128_v19 = vpack.c.bf16 %v4826_v14, %v4825_v15  ;;  %v9284_v21 = vpop.f32.mrb[98].mxu0  ;;  %v268_v14 = vld [vmem:[%s13551_s0 + $0x6f0] sm:$0xff] }
 0x1a6   :  { %v4828_v22 = vmax.f32 %v9284_v21, 0.0  ;;  %v2660_v24 = vpop.f32.mrb[99].mxu0  ;;  %9442 = vmatmul.mubr.msk.f32.gmra.mrb[204].mxu0 %vm563_vm0, %v251_v17  ;;  %v269_v21 = vld [vmem:[%s13551_s0 + $0x6f8] sm:$0xff] }
 0x1a7   :  { %v4827_v2 = vmax.f32 %v2660_v24, 0.0  ;;  %9444 = vmatprep.mubr.msk.f32.mxu0 %vm563_vm0, %v252_v57  ;;  %5520 = vmatmul.mubr.f32.vlgmr.msra.gmra.mrb[132].mxu1 %v5245_v18 }
 0x1a8   :  { %5524 = vmatprep.mubr.f32.mxu1 %v5278_v16  ;;  %v270_v16 = vld [vmem:[%s13551_s0 + $0x700] sm:$0xff] }
 0x1a9   :  { %v12144_v27 = vpack.c.bf16 %v4828_v22, %v4827_v2  ;;  %v9287_v23 = vpop.f32.mrb[100].mxu0 }
 0x1aa   :  { %v4830_v32 = vmax.f32 %v9287_v23, 0.0  ;;  %v2670_v20 = vpop.f32.mrb[101].mxu0  ;;  %9445 = vmatmul.mubr.msk.f32.gmra.mrb[206].mxu0 %vm563_vm0, %v253_v25 }
 0x1ab   :  { %v4829_v33 = vmax.f32 %v2670_v20, 0.0  ;;  %9447 = vmatprep.mubr.msk.f32.mxu0 %vm563_vm0, %v254_v11  ;;  %5525 = vmatmul.mubr.f32.gmra.mrb[134].mxu1 %v5277_v26  ;;  %v271_v26 = vld [vmem:[%s13551_s0 + $0x708] sm:$0xff] }
 0x1ac   :  { %5594 = vmatprep.mubr.f32.mxu1 %v5248_v28 }
 0x1ad   :  { %v12157_v35 = vpack.c.bf16 %v4830_v32, %v4829_v33  ;;  %v9290_v36 = vpop.f32.mrb[102].mxu0 }
 0x1ae   :  { %v4832_v37 = vmax.f32 %v9290_v36, 0.0  ;;  %v2680_v31 = vpop.f32.mrb[103].mxu0  ;;  %9448 = vmatmul.mubr.msk.f32.gmra.mrb[208].mxu0 %vm563_vm0, %v255_v34  ;;  %v273_v34 = vld [vmem:[%s13551_s0 + $0x718] sm:$0xff] }
 0x1af   :  { %v4831_v29 = vmax.f32 %v2680_v31, 0.0  ;;  %9450 = vmatprep.mubr.msk.f32.mxu0 %vm563_vm0, %v256_v30 }
 0x1b1   :  { %v12167_v44 = vpack.c.bf16 %v4832_v37, %v4831_v29  ;;  %v9293_v45 = vpop.f32.mrb[104].mxu0 }
 0x1b2   :  { %v4834_v46 = vmax.f32 %v9293_v45, 0.0  ;;  %v2690_v40 = vpop.f32.mrb[105].mxu0  ;;  %9451 = vmatmul.mubr.msk.f32.gmra.mrb[210].mxu0 %vm563_vm0, %v257_v41  ;;  %v275_v41 = vld [vmem:[%s13551_s0 + $0x728] sm:$0xff] }
 0x1b3   :  { %v4833_v38 = vmax.f32 %v2690_v40, 0.0  ;;  %9453 = vmatprep.mubr.msk.f32.mxu0 %vm563_vm0, %v258_v43 }
 0x1b5   :  { %v12177_v42 = vpack.c.bf16 %v4834_v46, %v4833_v38  ;;  %v9296_v52 = vpop.f32.mrb[106].mxu0 }
 0x1b6   :  { %v4836_v53 = vmax.f32 %v9296_v52, 0.0  ;;  %v2700_v47 = vpop.f32.mrb[107].mxu0  ;;  %9454 = vmatmul.mubr.msk.f32.gmra.mrb[212].mxu0 %vm563_vm0, %v259_v49  ;;  %v277_v49 = vld [vmem:[%s13551_s0 + $0x738] sm:$0xff] }
 0x1b7   :  { %v4835_v54 = vmax.f32 %v2700_v47, 0.0  ;;  %9456 = vmatprep.mubr.msk.f32.mxu0 %vm563_vm0, %v260_v50 }
 0x1b9   :  { %v12187_v51 = vpack.c.bf16 %v4836_v53, %v4835_v54  ;;  %v9299_v59 = vpop.f32.mrb[108].mxu0 }
 0x1ba   :  { %v4838_v61 = vmax.f32 %v9299_v59, 0.0  ;;  %v2710_v55 = vpop.f32.mrb[109].mxu0  ;;  %9457 = vmatmul.mubr.msk.f32.gmra.mrb[214].mxu0 %vm563_vm0, %v261_v56  ;;  %v279_v56 = vld [vmem:[%s13551_s0 + $0x748] sm:$0xff] }
 0x1bb   :  { %v4837_v62 = vmax.f32 %v2710_v55, 0.0  ;;  %9459 = vmatprep.mubr.msk.f32.mxu0 %vm563_vm0, %v262_v58 }
 0x1bd   :  { %v12197_v60 = vpack.c.bf16 %v4838_v61, %v4837_v62  ;;  %v9302_v1 = vpop.f32.mrb[110].mxu0 }
 0x1be   :  { %v4840_v4 = vmax.f32 %v9302_v1, 0.0  ;;  %v2720_v39 = vpop.f32.mrb[111].mxu0  ;;  %9460 = vmatmul.mubr.msk.f32.gmra.mrb[216].mxu0 %vm563_vm0, %v263_v63  ;;  %v281_v63 = vld [vmem:[%s13551_s0 + $0x758] sm:$0xff] }
 0x1bf   :  { %v4839_v5 = vmax.f32 %v2720_v39, 0.0  ;;  %9462 = vmatprep.mubr.msk.f32.mxu0 %vm563_vm0, %v264_v0 }
 0x1c1   :  { %v12207_v3 = vpack.c.bf16 %v4840_v4, %v4839_v5  ;;  %v9305_v8 = vpop.f32.mrb[112].mxu0  ;;  %v9719_v5 = vpop.f32.mrb[0].mxu1 }
 0x1c2   :  { %v4842_v10 = vmax.f32 %v9305_v8, 0.0  ;;  %v2730_v48 = vpop.f32.mrb[113].mxu0  ;;  %9463 = vmatmul.mubr.msk.f32.gmra.mrb[218].mxu0 %vm563_vm0, %v265_v6  ;;  %v284_v8 = vld [vmem:[%s13551_s0 + $0x770] sm:$0xff] }
 0x1c3   :  { %v4841_v12 = vmax.f32 %v2730_v48, 0.0  ;;  %9465 = vmatprep.mubr.msk.f32.mxu0 %vm563_vm0, %v266_v7  ;;  %v283_v7 = vld [vmem:[%s13551_s0 + $0x768] sm:$0xff]  ;;  %v5118_v48 = vmax.f32 %v9719_v5, 0.0 }
 0x1c5   :  { %v9308_v9 = vpop.f32.mrb[114].mxu0  ;;  %v10059_v15 = vpack.c.bf16 %v4842_v10, %v4841_v12  ;;  %v5247_v10 = vld [vmem:[%s13553_s2 + $0x30] sm:$0xff] }
 0x1c6   :  { %v4844_v17 = vmax.f32 %v9308_v9, 0.0  ;;  %v2740_v57 = vpop.f32.mrb[115].mxu0  ;;  %9466 = vmatmul.mubr.msk.f32.gmra.mrb[220].mxu0 %vm563_vm0, %v267_v13  ;;  %v5280_v9 = vld [vmem:[%s13553_s2 + $0x138] sm:$0xff] }
 0x1c7   :  { %v4843_v18 = vmax.f32 %v2740_v57, 0.0  ;;  %10060 = vmatprep.subr.bf16.mxu1 %v10059_v15  ;;  %9468 = vmatprep.mubr.msk.f32.mxu0 %vm563_vm0, %v268_v14 }
 0x1c8   :  { %10062 = vmatpush3.bf16.msra.mxu1 %v12128_v19  ;;  %v272_v19 = vld [vmem:[%s13551_s0 + $0x710] sm:$0xff] }
 0x1c9   :  { %v9311_v22 = vpop.f32.mrb[116].mxu0  ;;  %v10063_v24 = vpack.c.bf16 %v4844_v17, %v4843_v18 }
 0x1ca   :  { %v4846_v2 = vmax.f32 %v9311_v22, 0.0  ;;  %v2750_v25 = vpop.f32.mrb[117].mxu0  ;;  %9469 = vmatmul.mubr.msk.f32.gmra.mrb[222].mxu0 %vm563_vm0, %v269_v21  ;;  %v285_v21 = vld [vmem:[%s13551_s0 + $0x778] sm:$0xff]  ;;  %v286_v22 = vld [vmem:[%s13551_s0 + $0x780] sm:$0xff] }
 0x1cb   :  { %v4845_v11 = vmax.f32 %v2750_v25, 0.0  ;;  %10064 = vmatprep.subr.bf16.mxu1 %v10063_v24  ;;  %9471 = vmatprep.mubr.msk.f32.mxu0 %vm563_vm0, %v270_v16  ;;  %v5279_v24 = vld [vmem:[%s13553_s2 + $0x130] sm:$0xff] }
 0x1cc   :  { %10066 = vmatpush3.bf16.msra.mxu1 %v12144_v27  ;;  %v274_v27 = vld [vmem:[%s13551_s0 + $0x720] sm:$0xff] }
 0x1cd   :  { %v9314_v23 = vpop.f32.mrb[118].mxu0  ;;  %v10067_v28 = vpack.c.bf16 %v4846_v2, %v4845_v11 }
 0x1ce   :  { %v4848_v32 = vmax.f32 %v9314_v23, 0.0  ;;  %v2760_v20 = vpop.f32.mrb[119].mxu0  ;;  %9472 = vmatmul.mubr.msk.f32.gmra.mrb[224].mxu0 %vm563_vm0, %v271_v26 }
 0x1cf   :  { %v4847_v33 = vmax.f32 %v2760_v20, 0.0  ;;  %10068 = vmatprep.subr.bf16.mxu1 %v10067_v28  ;;  %9474 = vmatprep.mubr.msk.f32.mxu0 %vm563_vm0, %v272_v19  ;;  %v5250_v19 = vld [vmem:[%s13553_s2 + $0x48] sm:$0xff] }
 0x1d0   :  { %10070 = vmatpush3.bf16.msra.mxu1 %v12157_v35  ;;  %v276_v35 = vld [vmem:[%s13551_s0 + $0x730] sm:$0xff] }
 0x1d1   :  { %v9317_v30 = vpop.f32.mrb[120].mxu0  ;;  %v10071_v36 = vpack.c.bf16 %v4848_v32, %v4847_v33 }
 0x1d2   :  { %v4850_v37 = vmax.f32 %v9317_v30, 0.0  ;;  %v2770_v31 = vpop.f32.mrb[121].mxu0  ;;  %9475 = vmatmul.mubr.msk.f32.gmra.mrb[226].mxu0 %vm563_vm0, %v273_v34  ;;  %v287_v34 = vld [vmem:[%s13551_s0 + $0x788] sm:$0xff]  ;;  %v288_v30 = vld [vmem:[%s13551_s0 + $0x790] sm:$0xff] }
 0x1d3   :  { %v4849_v29 = vmax.f32 %v2770_v31, 0.0  ;;  %10072 = vmatprep.subr.bf16.mxu1 %v10071_v36  ;;  %9477 = vmatprep.mubr.msk.f32.mxu0 %vm563_vm0, %v274_v27 }
 0x1d4   :  { %10074 = vmatpush3.bf16.msra.mxu1 %v12167_v44  ;;  %v278_v44 = vld [vmem:[%s13551_s0 + $0x740] sm:$0xff] }
 0x1d5   :  { %v9320_v43 = vpop.f32.mrb[122].mxu0  ;;  %v10075_v45 = vpack.c.bf16 %v4850_v37, %v4849_v29 }
 0x1d6   :  { %v4852_v46 = vmax.f32 %v9320_v43, 0.0  ;;  %v2780_v40 = vpop.f32.mrb[123].mxu0  ;;  %9478 = vmatmul.mubr.msk.f32.gmra.mrb[228].mxu0 %vm563_vm0, %v275_v41 }
 0x1d7   :  { %v4851_v38 = vmax.f32 %v2780_v40, 0.0  ;;  %10076 = vmatprep.subr.bf16.mxu1 %v10075_v45  ;;  %9480 = vmatprep.mubr.msk.f32.mxu0 %vm563_vm0, %v276_v35  ;;  %v289_v40 = vld [vmem:[%s13551_s0 + $0x798] sm:$0xff] }
 0x1d8   :  { %10078 = vmatpush3.bf16.msra.mxu1 %v12177_v42  ;;  %v280_v42 = vld [vmem:[%s13551_s0 + $0x750] sm:$0xff] }
 0x1d9   :  { %v9323_v50 = vpop.f32.mrb[124].mxu0  ;;  %v10079_v52 = vpack.c.bf16 %v4852_v46, %v4851_v38 }
 0x1da   :  { %v4854_v53 = vmax.f32 %v9323_v50, 0.0  ;;  %v2790_v47 = vpop.f32.mrb[125].mxu0  ;;  %9481 = vmatmul.mubr.msk.f32.gmra.mrb[230].mxu0 %vm563_vm0, %v277_v49  ;;  %v290_v49 = vld [vmem:[%s13551_s0 + $0x7a0] sm:$0xff] }
 0x1db   :  { %v4853_v54 = vmax.f32 %v2790_v47, 0.0  ;;  %10080 = vmatprep.subr.bf16.mxu1 %v10079_v52  ;;  %9483 = vmatprep.mubr.msk.f32.mxu0 %vm563_vm0, %v278_v44 }
 0x1dc   :  { %10082 = vmatpush3.bf16.msra.mxu1 %v12187_v51  ;;  %v282_v51 = vld [vmem:[%s13551_s0 + $0x760] sm:$0xff] }
 0x1dd   :  { %v9326_v58 = vpop.f32.mrb[126].mxu0  ;;  %v10083_v59 = vpack.c.bf16 %v4854_v53, %v4853_v54 }
 0x1de   :  { %v4856_v61 = vmax.f32 %v9326_v58, 0.0  ;;  %v2800_v55 = vpop.f32.mrb[127].mxu0  ;;  %9484 = vmatmul.mubr.msk.f32.gmra.mrb[232].mxu0 %vm563_vm0, %v279_v56 }
 0x1df   :  { %v4855_v62 = vmax.f32 %v2800_v55, 0.0  ;;  %10084 = vmatprep.subr.bf16.mxu1 %v10083_v59  ;;  %9486 = vmatprep.mubr.msk.f32.mxu0 %vm563_vm0, %v280_v42  ;;  %v291_v59 = vld [vmem:[%s13551_s0 + $0x7a8] sm:$0xff]  ;;  %v292_v55 = vld [vmem:[%s13551_s0 + $0x7b0] sm:$0xff] }
 0x1e0   :  { %10086 = vmatpush3.bf16.msra.mxu1 %v12197_v60  ;;  %v4110_v60 = vpop.f32.mrb[1].mxu1 }
 0x1e1   :  { %v9329_v0 = vpop.f32.mrb[128].mxu0  ;;  %v10087_v1 = vpack.c.bf16 %v4856_v61, %v4855_v62  ;;  %v5117_v12 = vmax.f32 %v4110_v60, 0.0  ;;  %v9722_v57 = vpop.f32.mrb[2].mxu1 }
 0x1e2   :  { %v4858_v4 = vmax.f32 %v9329_v0, 0.0  ;;  %v2810_v39 = vpop.f32.mrb[129].mxu0  ;;  %9487 = vmatmul.mubr.msk.f32.gmra.mrb[234].mxu0 %vm563_vm0, %v281_v63  ;;  %v4120_v16 = vpop.f32.mrb[3].mxu1  ;;  %v5120_v2 = vmax.f32 %v9722_v57, 0.0 }
 0x1e3   :  { %v4857_v6 = vmax.f32 %v2810_v39, 0.0  ;;  %10088 = vmatprep.subr.bf16.mxu1 %v10087_v1  ;;  %9489 = vmatprep.mubr.msk.f32.mxu0 %vm563_vm0, %v282_v51  ;;  %v5119_v25 = vmax.f32 %v4120_v16, 0.0  ;;  %v9725_v20 = vpop.f32.mrb[4].mxu1 }
 0x1e4   :  { %10090 = vmatpush3.bf16.msra.mxu1 %v12207_v3  ;;  %v12298_v3 = vpack.c.bf16 %v5118_v48, %v5117_v12  ;;  %v4130_v27 = vpop.f32.mrb[5].mxu1  ;;  %v5122_v36 = vmax.f32 %v9725_v20, 0.0 }
 0x1e5   :  { %v12292_v13 = vpack.c.bf16 %v4858_v4, %v4857_v6  ;;  %v9332_v14 = vpop.f32.mrb[130].mxu0  ;;  %v12316_v32 = vpack.c.bf16 %v5120_v2, %v5119_v25  ;;  %v5121_v37 = vmax.f32 %v4130_v27, 0.0  ;;  %v9728_v45 = vpop.f32.mrb[6].mxu1 }
 0x1e6   :  { %v4860_v15 = vmax.f32 %v9332_v14, 0.0  ;;  %v2820_v17 = vpop.f32.mrb[131].mxu0  ;;  %9490 = vmatmul.mubr.msk.f32.gmra.mrb[236].mxu0 %vm563_vm0, %v283_v7  ;;  %v4140_v38 = vpop.f32.mrb[7].mxu1  ;;  %v5124_v44 = vmax.f32 %v9728_v45, 0.0  ;;  %v293_v7 = vld [vmem:[%s13551_s0 + $0x7b8] sm:$0xff] }
 0x1e7   :  { %v4859_v18 = vmax.f32 %v2820_v17, 0.0  ;;  %9492 = vmatprep.mubr.msk.f32.mxu0 %vm563_vm0, %v284_v8  ;;  %5595 = vmatmul.mubr.f32.vlgmr.msra.gmra.mrb[136].mxu1 %v5247_v10  ;;  %v12328_v43 = vpack.c.bf16 %v5122_v36, %v5121_v37  ;;  %v5123_v50 = vmax.f32 %v4140_v38, 0.0  ;;  %v9731_v42 = vpop.f32.mrb[8].mxu1  ;;  %v294_v8 = vld [vmem:[%s13551_s0 + $0x7c0] sm:$0xff] }
 0x1e8   :  { %5599 = vmatprep.mubr.f32.mxu1 %v5280_v9  ;;  %v4150_v61 = vpop.f32.mrb[9].mxu1  ;;  %v5126_v62 = vmax.f32 %v9731_v42, 0.0 }
 0x1e9   :  { %v12310_v11 = vpack.c.bf16 %v4860_v15, %v4859_v18  ;;  %v9335_v26 = vpop.f32.mrb[132].mxu0  ;;  %v12340_v56 = vpack.c.bf16 %v5124_v44, %v5123_v50  ;;  %v5125_v63 = vmax.f32 %v4150_v61, 0.0  ;;  %v9734_v5 = vpop.f32.mrb[10].mxu1  ;;  %v300_v50 = vld [vmem:[%s13551_s0 + $0x7f0] sm:$0xff] }
 0x1ea   :  { %v4862_v23 = vmax.f32 %v9335_v26, 0.0  ;;  %v2830_v28 = vpop.f32.mrb[133].mxu0  ;;  %9493 = vmatmul.mubr.msk.f32.gmra.mrb[238].mxu0 %vm563_vm0, %v285_v21  ;;  %v4160_v60 = vpop.f32.mrb[11].mxu1  ;;  %v5128_v10 = vmax.f32 %v9734_v5, 0.0  ;;  %v295_v21 = vld [vmem:[%s13551_s0 + $0x7c8] sm:$0xff] }
 0x1eb   :  { %v4861_v33 = vmax.f32 %v2830_v28, 0.0  ;;  %9495 = vmatprep.mubr.msk.f32.mxu0 %vm563_vm0, %v286_v22  ;;  %5600 = vmatmul.mubr.f32.gmra.mrb[138].mxu1 %v5279_v24  ;;  %v12352_v39 = vpack.c.bf16 %v5126_v62, %v5125_v63  ;;  %v5127_v48 = vmax.f32 %v4160_v60, 0.0  ;;  %v9737_v57 = vpop.f32.mrb[12].mxu1  ;;  %v296_v22 = vld [vmem:[%s13551_s0 + $0x7d0] sm:$0xff]  ;;  %v301_v63 = vld [vmem:[%s13551_s0 + $0x7f8] sm:$0xff] }
 0x1ec   :  { %5669 = vmatprep.mubr.f32.mxu1 %v5250_v19  ;;  %v4170_v16 = vpop.f32.mrb[13].mxu1  ;;  %v5130_v24 = vmax.f32 %v9737_v57, 0.0 }
 0x1ed   :  { %v12325_v31 = vpack.c.bf16 %v4862_v23, %v4861_v33  ;;  %v9338_v29 = vpop.f32.mrb[134].mxu0  ;;  %v12364_v17 = vpack.c.bf16 %v5128_v10, %v5127_v48  ;;  %v5129_v2 = vmax.f32 %v4170_v16, 0.0  ;;  %v9740_v20 = vpop.f32.mrb[14].mxu1 }
 0x1ee   :  { %v4864_v41 = vmax.f32 %v9338_v29, 0.0  ;;  %v2840_v35 = vpop.f32.mrb[135].mxu0  ;;  %9496 = vmatmul.mubr.msk.f32.gmra.mrb[240].mxu0 %vm563_vm0, %v287_v34  ;;  %v297_v34 = vld [vmem:[%s13551_s0 + $0x7d8] sm:$0xff]  ;;  %v4180_v27 = vpop.f32.mrb[15].mxu1  ;;  %v5132_v36 = vmax.f32 %v9740_v20, 0.0  ;;  %v306_v20 = vld [vmem:[%s13551_s0 + $0x820] sm:$0xff] }
 0x1ef   :  { %v4863_v46 = vmax.f32 %v2840_v35, 0.0  ;;  %9498 = vmatprep.mubr.msk.f32.mxu0 %vm563_vm0, %v288_v30  ;;  %v12376_v28 = vpack.c.bf16 %v5130_v24, %v5129_v2  ;;  %v298_v30 = vld [vmem:[%s13551_s0 + $0x7e0] sm:$0xff]  ;;  %v5131_v37 = vmax.f32 %v4180_v27, 0.0 }
 0x1f1   :  { %v12337_v52 = vpack.c.bf16 %v4864_v41, %v4863_v46  ;;  %v9341_v53 = vpop.f32.mrb[136].mxu0  ;;  %v12388_v46 = vpack.c.bf16 %v5132_v36, %v5131_v37 }
 0x1f2   :  { %v4866_v47 = vmax.f32 %v9341_v53, 0.0  ;;  %v2850_v54 = vpop.f32.mrb[137].mxu0  ;;  %9499 = vmatmul.mubr.msk.f32.gmra.mrb[242].mxu0 %vm563_vm0, %v289_v40  ;;  %v9743_v40 = vpop.f32.mrb[16].mxu1 }
 0x1f3   :  { %v4865_v58 = vmax.f32 %v2850_v54, 0.0  ;;  %9501 = vmatprep.mubr.msk.f32.mxu0 %vm563_vm0, %v290_v49  ;;  %v299_v49 = vld [vmem:[%s13551_s0 + $0x7e8] sm:$0xff]  ;;  %v4190_v44 = vpop.f32.mrb[17].mxu1  ;;  %v5134_v53 = vmax.f32 %v9743_v40, 0.0 }
 0x1f5   :  { %v12349_v51 = vpack.c.bf16 %v4866_v47, %v4865_v58  ;;  %v9344_v0 = vpop.f32.mrb[138].mxu0  ;;  %v5133_v47 = vmax.f32 %v4190_v44, 0.0 }
 0x1f6   :  { %v4868_v1 = vmax.f32 %v9344_v0, 0.0  ;;  %v2860_v4 = vpop.f32.mrb[139].mxu0  ;;  %9502 = vmatmul.mubr.msk.f32.gmra.mrb[244].mxu0 %vm563_vm0, %v291_v59 }
 0x1f7   :  { %v4867_v6 = vmax.f32 %v2860_v4, 0.0  ;;  %9504 = vmatprep.mubr.msk.f32.mxu0 %vm563_vm0, %v292_v55  ;;  %v12398_v61 = vpack.c.bf16 %v5134_v53, %v5133_v47  ;;  %v9746_v55 = vpop.f32.mrb[18].mxu1 }
 0x1f8   :  { %v4200_v0 = vpop.f32.mrb[19].mxu1  ;;  %v5136_v4 = vmax.f32 %v9746_v55, 0.0 }
 0x1f9   :  { %v12361_v12 = vpack.c.bf16 %v4868_v1, %v4867_v6  ;;  %v9347_v14 = vpop.f32.mrb[140].mxu0  ;;  %v302_v1 = vld [vmem:[%s13551_s0 + $0x800] sm:$0xff]  ;;  %v5135_v5 = vmax.f32 %v4200_v0, 0.0  ;;  %v9749_v48 = vpop.f32.mrb[20].mxu1 }
 0x1fa   :  { %v4870_v9 = vmax.f32 %v9347_v14, 0.0  ;;  %v2870_v15 = vpop.f32.mrb[141].mxu0  ;;  %9505 = vmatmul.mubr.msk.f32.gmra.mrb[246].mxu0 %vm563_vm0, %v293_v7  ;;  %v5138_v57 = vmax.f32 %v9749_v48, 0.0 }
 0x1fb   :  { %v4869_v18 = vmax.f32 %v2870_v15, 0.0  ;;  %9507 = vmatprep.mubr.msk.f32.mxu0 %vm563_vm0, %v294_v8  ;;  %v12409_v10 = vpack.c.bf16 %v5136_v4, %v5135_v5  ;;  %v304_v15 = vld [vmem:[%s13551_s0 + $0x810] sm:$0xff] }
 0x1fd   :  { %v12373_v25 = vpack.c.bf16 %v4870_v9, %v4869_v18  ;;  %v9350_v26 = vpop.f32.mrb[142].mxu0  ;;  %v4210_v9 = vpop.f32.mrb[21].mxu1 }
 0x1fe   :  { %v4872_v19 = vmax.f32 %v9350_v26, 0.0  ;;  %v2880_v23 = vpop.f32.mrb[143].mxu0  ;;  %9508 = vmatmul.mubr.msk.f32.gmra.mrb[248].mxu0 %vm563_vm0, %v295_v21  ;;  %v5137_v18 = vmax.f32 %v4210_v9, 0.0  ;;  %v9752_v26 = vpop.f32.mrb[22].mxu1 }
 0x1ff   :  { %v4871_v33 = vmax.f32 %v2880_v23, 0.0  ;;  %9510 = vmatprep.mubr.msk.f32.mxu0 %vm563_vm0, %v296_v22  ;;  %v4220_v23 = vpop.f32.mrb[23].mxu1 }
 0x200   :  { %v12420_v2 = vpack.c.bf16 %v5138_v57, %v5137_v18 }
 0x201   :  { %v12385_v29 = vpack.c.bf16 %v4872_v19, %v4871_v33  ;;  %v9353_v41 = vpop.f32.mrb[144].mxu0  ;;  %v5140_v33 = vmax.f32 %v9752_v26, 0.0 }
 0x202   :  { %v4874_v35 = vmax.f32 %v9353_v41, 0.0  ;;  %v2890_v45 = vpop.f32.mrb[145].mxu0  ;;  %9511 = vmatmul.mubr.msk.f32.gmra.mrb[250].mxu0 %vm563_vm0, %v297_v34  ;;  %v5139_v34 = vmax.f32 %v4220_v23, 0.0 }
 0x203   :  { %v4873_v38 = vmax.f32 %v2890_v45, 0.0  ;;  %9513 = vmatprep.mubr.msk.f32.mxu0 %vm563_vm0, %v298_v30 }
 0x204   :  { %v12431_v41 = vpack.c.bf16 %v5140_v33, %v5139_v34 }
 0x205   :  { %v10091_v54 = vpack.c.bf16 %v4874_v35, %v4873_v38  ;;  %v9356_v42 = vpop.f32.mrb[146].mxu0  ;;  %v9755_v35 = vpop.f32.mrb[24].mxu1  ;;  %v308_v38 = vld [vmem:[%s13551_s0 + $0x830] sm:$0xff] }
 0x206   :  { %v4876_v58 = vmax.f32 %v9356_v42, 0.0  ;;  %v2900_v59 = vpop.f32.mrb[147].mxu0  ;;  %9514 = vmatmul.mubr.msk.f32.gmra.mrb[252].mxu0 %vm563_vm0, %v299_v49  ;;  %v4230_v40 = vpop.f32.mrb[25].mxu1  ;;  %v5142_v49 = vmax.f32 %v9755_v35, 0.0 }
 0x207   :  { %v4875_v62 = vmax.f32 %v2900_v59, 0.0  ;;  %10092 = vmatprep.subr.bf16.mxu1 %v10091_v54  ;;  %9516 = vmatprep.mubr.msk.f32.mxu0 %vm563_vm0, %v300_v50  ;;  %v5141_v44 = vmax.f32 %v4230_v40, 0.0 }
 0x208   :  { %10094 = vmatpush3.bf16.msra.mxu1 %v12292_v13  ;;  %v303_v13 = vld [vmem:[%s13551_s0 + $0x808] sm:$0xff] }
 0x209   :  { %v10095_v6 = vpack.c.bf16 %v4876_v58, %v4875_v62  ;;  %v9359_v7 = vpop.f32.mrb[148].mxu0  ;;  %v12442_v42 = vpack.c.bf16 %v5142_v49, %v5141_v44  ;;  %v9758_v58 = vpop.f32.mrb[26].mxu1  ;;  %v310_v62 = vld [vmem:[%s13551_s0 + $0x840] sm:$0xff] }
 0x20a   :  { %v4878_v60 = vmax.f32 %v9359_v7, 0.0  ;;  %v2910_v8 = vpop.f32.mrb[149].mxu0  ;;  %9517 = vmatmul.mubr.msk.f32.gmra.mrb[254].mxu0 %vm563_vm0, %v301_v63  ;;  %v4240_v55 = vpop.f32.mrb[27].mxu1  ;;  %v5144_v63 = vmax.f32 %v9758_v58, 0.0 }
 0x20b   :  { %v4877_v14 = vmax.f32 %v2910_v8, 0.0  ;;  %10096 = vmatprep.subr.bf16.mxu1 %v10095_v6  ;;  %9519 = vmatprep.mubr.msk.f32.mxu0 %vm563_vm0, %v302_v1  ;;  %v5143_v0 = vmax.f32 %v4240_v55, 0.0  ;;  %v318_v55 = vld [vmem:[%s13551_s0 + $0x880] sm:$0xff] }
 0x20c   :  { %10098 = vmatpush3.bf16.msra.mxu1 %v12310_v11  ;;  %v305_v11 = vld [vmem:[%s13551_s0 + $0x818] sm:$0xff] }
 0x20d   :  { %v10099_v21 = vpack.c.bf16 %v4878_v60, %v4877_v14  ;;  %v9362_v16 = vpop.f32.mrb[150].mxu0  ;;  %v12453_v7 = vpack.c.bf16 %v5144_v63, %v5143_v0  ;;  %v9761_v60 = vpop.f32.mrb[28].mxu1  ;;  %v312_v14 = vld [vmem:[%s13551_s0 + $0x850] sm:$0xff] }
 0x20e   :  { %v4880_v22 = vmax.f32 %v9362_v16, 0.0  ;;  %v2920_v24 = vpop.f32.mrb[151].mxu0  ;;  %9520 = vmatmul.mubr.msk.f32.gmra.mrb[0].mxu0 %vm563_vm0, %v303_v13  ;;  %v4250_v48 = vpop.f32.mrb[29].mxu1  ;;  %v5146_v13 = vmax.f32 %v9761_v60, 0.0 }
 0x20f   :  { %v4879_v19 = vmax.f32 %v2920_v24, 0.0  ;;  %10100 = vmatprep.subr.bf16.mxu1 %v10099_v21  ;;  %9522 = vmatprep.mubr.msk.f32.mxu0 %vm563_vm0, %v304_v15  ;;  %v5145_v9 = vmax.f32 %v4250_v48, 0.0 }
 0x210   :  { %10102 = vmatpush3.bf16.msra.mxu1 %v12325_v31  ;;  %v307_v31 = vld [vmem:[%s13551_s0 + $0x828] sm:$0xff] }
 0x211   :  { %v10103_v27 = vpack.c.bf16 %v4880_v22, %v4879_v19  ;;  %v9365_v30 = vpop.f32.mrb[152].mxu0  ;;  %v12464_v16 = vpack.c.bf16 %v5146_v13, %v5145_v9  ;;  %v9764_v22 = vpop.f32.mrb[30].mxu1  ;;  %v314_v19 = vld [vmem:[%s13551_s0 + $0x860] sm:$0xff]  ;;  %v320_v9 = vld [vmem:[%s13551_s0 + $0x890] sm:$0xff] }
 0x212   :  { %v4882_v36 = vmax.f32 %v9365_v30, 0.0  ;;  %v2930_v37 = vpop.f32.mrb[153].mxu0  ;;  %9523 = vmatmul.mubr.msk.f32.gmra.mrb[2].mxu0 %vm563_vm0, %v305_v11  ;;  %v4260_v26 = vpop.f32.mrb[31].mxu1  ;;  %v5148_v11 = vmax.f32 %v9764_v22, 0.0 }
 0x213   :  { %v4881_v45 = vmax.f32 %v2930_v37, 0.0  ;;  %10104 = vmatprep.subr.bf16.mxu1 %v10103_v27  ;;  %9525 = vmatprep.mubr.msk.f32.mxu0 %vm563_vm0, %v306_v20  ;;  %v5147_v23 = vmax.f32 %v4260_v26, 0.0 }
 0x214   :  { %10106 = vmatpush3.bf16.msra.mxu1 %v12337_v52  ;;  %v309_v52 = vld [vmem:[%s13551_s0 + $0x838] sm:$0xff] }
 0x215   :  { %v10107_v50 = vpack.c.bf16 %v4882_v36, %v4881_v45  ;;  %v9368_v53 = vpop.f32.mrb[154].mxu0  ;;  %v12475_v30 = vpack.c.bf16 %v5148_v11, %v5147_v23  ;;  %v9767_v36 = vpop.f32.mrb[32].mxu1  ;;  %v316_v45 = vld [vmem:[%s13551_s0 + $0x870] sm:$0xff]  ;;  %v321_v11 = vld [vmem:[%s13551_s0 + $0x898] sm:$0xff] }
 0x216   :  { %v4884_v47 = vmax.f32 %v9368_v53, 0.0  ;;  %v2940_v54 = vpop.f32.mrb[155].mxu0  ;;  %9526 = vmatmul.mubr.msk.f32.gmra.mrb[4].mxu0 %vm563_vm0, %v307_v31  ;;  %v4270_v35 = vpop.f32.mrb[33].mxu1  ;;  %v5249_v31 = vld [vmem:[%s13553_s2 + $0x40] sm:$0xff]  ;;  %v5150_v40 = vmax.f32 %v9767_v36, 0.0 }
 0x217   :  { %v4883_v59 = vmax.f32 %v2940_v54, 0.0  ;;  %10108 = vmatprep.subr.bf16.mxu1 %v10107_v50  ;;  %9528 = vmatprep.mubr.msk.f32.mxu0 %vm563_vm0, %v308_v38  ;;  %v5149_v38 = vmax.f32 %v4270_v35, 0.0  ;;  %v5282_v50 = vld [vmem:[%s13553_s2 + $0x148] sm:$0xff]  ;;  %v9770_v54 = vpop.f32.mrb[34].mxu1 }
 0x218   :  { %10110 = vmatpush3.bf16.msra.mxu1 %v12349_v51  ;;  %v311_v51 = vld [vmem:[%s13551_s0 + $0x848] sm:$0xff]  ;;  %v5152_v63 = vmax.f32 %v9770_v54, 0.0 }
 0x219   :  { %v10111_v1 = vpack.c.bf16 %v4884_v47, %v4883_v59  ;;  %v9371_v4 = vpop.f32.mrb[156].mxu0  ;;  %v317_v59 = vld [vmem:[%s13551_s0 + $0x878] sm:$0xff] }
 0x21a   :  { %v4886_v5 = vmax.f32 %v9371_v4, 0.0  ;;  %v2950_v6 = vpop.f32.mrb[157].mxu0  ;;  %9529 = vmatmul.mubr.msk.f32.gmra.mrb[6].mxu0 %vm563_vm0, %v309_v52  ;;  %v4280_v52 = vpop.f32.mrb[35].mxu1 }
 0x21b   :  { %v4885_v8 = vmax.f32 %v2950_v6, 0.0  ;;  %10112 = vmatprep.subr.bf16.mxu1 %v10111_v1  ;;  %9531 = vmatprep.mubr.msk.f32.mxu0 %vm563_vm0, %v310_v62  ;;  %v5281_v62 = vld [vmem:[%s13553_s2 + $0x140] sm:$0xff]  ;;  %v5151_v0 = vmax.f32 %v4280_v52, 0.0 }
 0x21c   :  { %10114 = vmatpush3.bf16.msra.mxu1 %v12361_v12  ;;  %v313_v12 = vld [vmem:[%s13551_s0 + $0x858] sm:$0xff] }
 0x21d   :  { %v10115_v15 = vpack.c.bf16 %v4886_v5, %v4885_v8  ;;  %v9374_v57 = vpop.f32.mrb[158].mxu0  ;;  %v5252_v5 = vld [vmem:[%s13553_s2 + $0x58] sm:$0xff]  ;;  %v12512_v8 = vpack.c.bf16 %v5152_v63, %v5151_v0 }
 0x21e   :  { %v4888_v18 = vmax.f32 %v9374_v57, 0.0  ;;  %v2960_v21 = vpop.f32.mrb[159].mxu0  ;;  %9532 = vmatmul.mubr.msk.f32.gmra.mrb[8].mxu0 %vm563_vm0, %v311_v51  ;;  %v9773_v51 = vpop.f32.mrb[36].mxu1  ;;  %v325_v63 = vld [vmem:[%s13551_s0 + $0x8b8] sm:$0xff] }
 0x21f   :  { %v4887_v24 = vmax.f32 %v2960_v21, 0.0  ;;  %10116 = vmatprep.subr.bf16.mxu1 %v10115_v15  ;;  %9534 = vmatprep.mubr.msk.f32.mxu0 %vm563_vm0, %v312_v14  ;;  %v319_v14 = vld [vmem:[%s13551_s0 + $0x888] sm:$0xff]  ;;  %v4290_v13 = vpop.f32.mrb[37].mxu1  ;;  %v5154_v15 = vmax.f32 %v9773_v51, 0.0 }
 0x220   :  { %10118 = vmatpush3.bf16.msra.mxu1 %v12373_v25  ;;  %v315_v25 = vld [vmem:[%s13551_s0 + $0x868] sm:$0xff]  ;;  %v5153_v57 = vmax.f32 %v4290_v13, 0.0  ;;  %v9776_v26 = vpop.f32.mrb[38].mxu1 }
 0x221   :  { %v10119_v20 = vpack.c.bf16 %v4888_v18, %v4887_v24  ;;  %v9377_v33 = vpop.f32.mrb[160].mxu0  ;;  %v4300_v23 = vpop.f32.mrb[39].mxu1 }
 0x222   :  { %v4890_v34 = vmax.f32 %v9377_v33, 0.0  ;;  %v2970_v27 = vpop.f32.mrb[161].mxu0  ;;  %9535 = vmatmul.mubr.msk.f32.gmra.mrb[10].mxu0 %vm563_vm0, %v313_v12  ;;  %v12524_v12 = vpack.c.bf16 %v5154_v15, %v5153_v57  ;;  %v5156_v33 = vmax.f32 %v9776_v26, 0.0  ;;  %v327_v57 = vld [vmem:[%s13551_s0 + $0x8c8] sm:$0xff] }
 0x223   :  { %v4889_v37 = vmax.f32 %v2970_v27, 0.0  ;;  %10120 = vmatprep.subr.bf16.mxu1 %v10119_v20  ;;  %9537 = vmatprep.mubr.msk.f32.mxu0 %vm563_vm0, %v314_v19  ;;  %v322_v20 = vld [vmem:[%s13551_s0 + $0x8a0] sm:$0xff] }
 0x224   :  { %10122 = vmatpush3.bf16.msra.mxu1 %v12385_v29  ;;  %v12494_v29 = vpack.c.bf16 %v5150_v40, %v5149_v38  ;;  %v323_v40 = vld [vmem:[%s13551_s0 + $0x8a8] sm:$0xff] }
 0x225   :  { %v12488_v49 = vpack.c.bf16 %v4890_v34, %v4889_v37  ;;  %v9380_v44 = vpop.f32.mrb[162].mxu0  ;;  %v5155_v34 = vmax.f32 %v4300_v23, 0.0 }
 0x226   :  { %v4892_v53 = vmax.f32 %v9380_v44, 0.0  ;;  %v2980_v47 = vpop.f32.mrb[163].mxu0  ;;  %9538 = vmatmul.mubr.msk.f32.gmra.mrb[12].mxu0 %vm563_vm0, %v315_v25  ;;  %v324_v44 = vld [vmem:[%s13551_s0 + $0x8b0] sm:$0xff] }
 0x227   :  { %v4891_v58 = vmax.f32 %v2980_v47, 0.0  ;;  %9540 = vmatprep.mubr.msk.f32.mxu0 %vm563_vm0, %v316_v45  ;;  %5670 = vmatmul.mubr.f32.vlgmr.msra.gmra.mrb[140].mxu1 %v5249_v31  ;;  %v12536_v35 = vpack.c.bf16 %v5156_v33, %v5155_v34  ;;  %v9779_v45 = vpop.f32.mrb[40].mxu1 }
 0x228   :  { %5674 = vmatprep.mubr.f32.mxu1 %v5282_v50  ;;  %v4310_v38 = vpop.f32.mrb[41].mxu1  ;;  %v5158_v50 = vmax.f32 %v9779_v45, 0.0  ;;  %v330_v45 = vld [vmem:[%s13551_s0 + $0x8e0] sm:$0xff] }
 0x229   :  { %v12506_v1 = vpack.c.bf16 %v4892_v53, %v4891_v58  ;;  %v9383_v4 = vpop.f32.mrb[164].mxu0  ;;  %v5157_v53 = vmax.f32 %v4310_v38, 0.0 }
 0x22a   :  { %v4894_v6 = vmax.f32 %v9383_v4, 0.0  ;;  %v2990_v60 = vpop.f32.mrb[165].mxu0  ;;  %9541 = vmatmul.mubr.msk.f32.gmra.mrb[14].mxu0 %vm563_vm0, %v317_v59  ;;  %v326_v4 = vld [vmem:[%s13551_s0 + $0x8c0] sm:$0xff] }
 0x22b   :  { %v4893_v48 = vmax.f32 %v2990_v60, 0.0  ;;  %9543 = vmatprep.mubr.msk.f32.mxu0 %vm563_vm0, %v318_v55  ;;  %5675 = vmatmul.mubr.f32.gmra.mrb[142].mxu1 %v5281_v62  ;;  %v12548_v52 = vpack.c.bf16 %v5158_v50, %v5157_v53  ;;  %v9782_v55 = vpop.f32.mrb[42].mxu1 }
 0x22c   :  { %5744 = vmatprep.mubr.f32.mxu1 %v5252_v5  ;;  %v4320_v0 = vpop.f32.mrb[43].mxu1  ;;  %v5160_v5 = vmax.f32 %v9782_v55, 0.0  ;;  %v331_v55 = vld [vmem:[%s13551_s0 + $0x8e8] sm:$0xff] }
 0x22d   :  { %v12521_v18 = vpack.c.bf16 %v4894_v6, %v4893_v48  ;;  %v9386_v21 = vpop.f32.mrb[166].mxu0  ;;  %v5159_v6 = vmax.f32 %v4320_v0, 0.0 }
 0x22e   :  { %v4896_v22 = vmax.f32 %v9386_v21, 0.0  ;;  %v3000_v24 = vpop.f32.mrb[167].mxu0  ;;  %9544 = vmatmul.mubr.msk.f32.gmra.mrb[16].mxu0 %vm563_vm0, %v319_v14 }
 0x22f   :  { %v4895_v19 = vmax.f32 %v3000_v24, 0.0  ;;  %9546 = vmatprep.mubr.msk.f32.mxu0 %vm563_vm0, %v320_v9  ;;  %v12560_v13 = vpack.c.bf16 %v5160_v5, %v5159_v6  ;;  %v9785_v9 = vpop.f32.mrb[44].mxu1 }
 0x230   :  { %v4330_v21 = vpop.f32.mrb[45].mxu1  ;;  %v5162_v24 = vmax.f32 %v9785_v9, 0.0 }
 0x231   :  { %v12533_v27 = vpack.c.bf16 %v4896_v22, %v4895_v19  ;;  %v9389_v36 = vpop.f32.mrb[168].mxu0  ;;  %v328_v22 = vld [vmem:[%s13551_s0 + $0x8d0] sm:$0xff]  ;;  %v5161_v26 = vmax.f32 %v4330_v21, 0.0  ;;  %v9788_v34 = vpop.f32.mrb[46].mxu1 }
 0x232   :  { %v4898_v37 = vmax.f32 %v9389_v36, 0.0  ;;  %v3010_v25 = vpop.f32.mrb[169].mxu0  ;;  %9547 = vmatmul.mubr.msk.f32.gmra.mrb[18].mxu0 %vm563_vm0, %v321_v11 }
 0x233   :  { %v4897_v31 = vmax.f32 %v3010_v25, 0.0  ;;  %9549 = vmatprep.mubr.msk.f32.mxu0 %vm563_vm0, %v322_v20  ;;  %v12572_v33 = vpack.c.bf16 %v5162_v24, %v5161_v26  ;;  %v4340_v25 = vpop.f32.mrb[47].mxu1 }
 0x235   :  { %v12545_v47 = vpack.c.bf16 %v4898_v37, %v4897_v31  ;;  %v9392_v54 = vpop.f32.mrb[170].mxu0  ;;  %v329_v37 = vld [vmem:[%s13551_s0 + $0x8d8] sm:$0xff]  ;;  %v5164_v31 = vmax.f32 %v9788_v34, 0.0 }
 0x236   :  { %v4900_v58 = vmax.f32 %v9392_v54, 0.0  ;;  %v3020_v59 = vpop.f32.mrb[171].mxu0  ;;  %9550 = vmatmul.mubr.msk.f32.gmra.mrb[20].mxu0 %vm563_vm0, %v323_v40  ;;  %v5163_v40 = vmax.f32 %v4340_v25, 0.0 }
 0x237   :  { %v4899_v62 = vmax.f32 %v3020_v59, 0.0  ;;  %9552 = vmatprep.mubr.msk.f32.mxu0 %vm563_vm0, %v324_v44 }
 0x238   :  { %v12584_v54 = vpack.c.bf16 %v5164_v31, %v5163_v40  ;;  %v336_v31 = vld [vmem:[%s13551_s0 + $0x910] sm:$0xff] }
 0x239   :  { %v12557_v60 = vpack.c.bf16 %v4900_v58, %v4899_v62  ;;  %v9395_v51 = vpop.f32.mrb[172].mxu0  ;;  %v9791_v58 = vpop.f32.mrb[48].mxu1 }
 0x23a   :  { %v4902_v48 = vmax.f32 %v9395_v51, 0.0  ;;  %v3030_v14 = vpop.f32.mrb[173].mxu0  ;;  %9553 = vmatmul.mubr.msk.f32.gmra.mrb[22].mxu0 %vm563_vm0, %v325_v63  ;;  %v4350_v62 = vpop.f32.mrb[49].mxu1  ;;  %v332_v63 = vld [vmem:[%s13551_s0 + $0x8f0] sm:$0xff]  ;;  %v5166_v0 = vmax.f32 %v9791_v58, 0.0 }
 0x23b   :  { %v4901_v15 = vmax.f32 %v3030_v14, 0.0  ;;  %9555 = vmatprep.mubr.msk.f32.mxu0 %vm563_vm0, %v326_v4  ;;  %v5165_v4 = vmax.f32 %v4350_v62, 0.0  ;;  %v9794_v9 = vpop.f32.mrb[50].mxu1 }
 0x23c   :  { %v4360_v21 = vpop.f32.mrb[51].mxu1  ;;  %v5168_v24 = vmax.f32 %v9794_v9, 0.0 }
 0x23d   :  { %v12569_v19 = vpack.c.bf16 %v4902_v48, %v4901_v15  ;;  %v9398_v11 = vpop.f32.mrb[174].mxu0  ;;  %v12594_v14 = vpack.c.bf16 %v5166_v0, %v5165_v4  ;;  %v5167_v26 = vmax.f32 %v4360_v21, 0.0  ;;  %v338_v4 = vld [vmem:[%s13551_s0 + $0x920] sm:$0xff] }
 0x23e   :  { %v4904_v23 = vmax.f32 %v9398_v11, 0.0  ;;  %v3040_v20 = vpop.f32.mrb[175].mxu0  ;;  %9556 = vmatmul.mubr.msk.f32.gmra.mrb[24].mxu0 %vm563_vm0, %v327_v57  ;;  %v333_v57 = vld [vmem:[%s13551_s0 + $0x8f8] sm:$0xff] }
 0x23f   :  { %v4903_v36 = vmax.f32 %v3040_v20, 0.0  ;;  %9558 = vmatprep.mubr.msk.f32.mxu0 %vm563_vm0, %v328_v22  ;;  %v334_v22 = vld [vmem:[%s13551_s0 + $0x900] sm:$0xff] }
 0x241   :  { %v12581_v38 = vpack.c.bf16 %v4904_v23, %v4903_v36  ;;  %v9401_v44 = vpop.f32.mrb[176].mxu0  ;;  %v12605_v36 = vpack.c.bf16 %v5168_v24, %v5167_v26  ;;  %v340_v26 = vld [vmem:[%s13551_s0 + $0x930] sm:$0xff] }
 0x242   :  { %v4906_v50 = vmax.f32 %v9401_v44, 0.0  ;;  %v3050_v53 = vpop.f32.mrb[177].mxu0  ;;  %9559 = vmatmul.mubr.msk.f32.gmra.mrb[26].mxu0 %vm563_vm0, %v329_v37  ;;  %v9797_v37 = vpop.f32.mrb[52].mxu1 }
 0x243   :  { %v4905_v59 = vmax.f32 %v3050_v53, 0.0  ;;  %9561 = vmatprep.mubr.msk.f32.mxu0 %vm563_vm0, %v330_v45  ;;  %v4370_v45 = vpop.f32.mrb[53].mxu1  ;;  %v5170_v40 = vmax.f32 %v9797_v37, 0.0 }
 0x244   :  { %v5169_v44 = vmax.f32 %v4370_v45, 0.0  ;;  %v9800_v62 = vpop.f32.mrb[54].mxu1 }
 0x245   :  { %v10123_v5 = vpack.c.bf16 %v4906_v50, %v4905_v59  ;;  %v9404_v6 = vpop.f32.mrb[178].mxu0  ;;  %v4380_v0 = vpop.f32.mrb[55].mxu1 }
 0x246   :  { %v4908_v51 = vmax.f32 %v9404_v6, 0.0  ;;  %v3060_v48 = vpop.f32.mrb[179].mxu0  ;;  %9562 = vmatmul.mubr.msk.f32.gmra.mrb[28].mxu0 %vm563_vm0, %v331_v55  ;;  %v12616_v55 = vpack.c.bf16 %v5170_v40, %v5169_v44  ;;  %v5171_v6 = vmax.f32 %v4380_v0, 0.0  ;;  %v9803_v21 = vpop.f32.mrb[56].mxu1  ;;  %v342_v44 = vld [vmem:[%s13551_s0 + $0x940] sm:$0xff] }
 0x247   :  { %v4907_v15 = vmax.f32 %v3060_v48, 0.0  ;;  %10124 = vmatprep.subr.bf16.mxu1 %v10123_v5  ;;  %9564 = vmatprep.mubr.msk.f32.mxu0 %vm563_vm0, %v332_v63  ;;  %v5172_v5 = vmax.f32 %v9800_v62, 0.0  ;;  %v4390_v24 = vpop.f32.mrb[57].mxu1 }
 0x248   :  { %10126 = vmatpush3.bf16.msra.mxu1 %v12488_v49  ;;  %v335_v49 = vld [vmem:[%s13551_s0 + $0x908] sm:$0xff]  ;;  %v9806_v45 = vpop.f32.mrb[58].mxu1 }
 0x249   :  { %v10127_v11 = vpack.c.bf16 %v4908_v51, %v4907_v15  ;;  %v9407_v23 = vpop.f32.mrb[180].mxu0  ;;  %v4400_v40 = vpop.f32.mrb[59].mxu1 }
 0x24a   :  { %v4910_v20 = vmax.f32 %v9407_v23, 0.0  ;;  %v3070_v34 = vpop.f32.mrb[181].mxu0  ;;  %9565 = vmatmul.mubr.msk.f32.gmra.mrb[30].mxu0 %vm563_vm0, %v333_v57  ;;  %v12627_v57 = vpack.c.bf16 %v5172_v5, %v5171_v6  ;;  %v5173_v23 = vmax.f32 %v4390_v24, 0.0  ;;  %v9809_v0 = vpop.f32.mrb[60].mxu1  ;;  %v344_v6 = vld [vmem:[%s13551_s0 + $0x950] sm:$0xff] }
 0x24b   :  { %v4909_v25 = vmax.f32 %v3070_v34, 0.0  ;;  %10128 = vmatprep.subr.bf16.mxu1 %v10127_v11  ;;  %9567 = vmatprep.mubr.msk.f32.mxu0 %vm563_vm0, %v334_v22  ;;  %v5174_v11 = vmax.f32 %v9803_v21, 0.0  ;;  %v4410_v5 = vpop.f32.mrb[61].mxu1 }
 0x24c   :  { %10130 = vmatpush3.bf16.msra.mxu1 %v12506_v1  ;;  %v337_v1 = vld [vmem:[%s13551_s0 + $0x918] sm:$0xff]  ;;  %v9812_v24 = vpop.f32.mrb[62].mxu1 }
 0x24d   :  { %v10131_v50 = vpack.c.bf16 %v4910_v20, %v4909_v25  ;;  %v9410_v53 = vpop.f32.mrb[182].mxu0 }
 0x24e   :  { %v4912_v58 = vmax.f32 %v9410_v53, 0.0  ;;  %v3080_v59 = vpop.f32.mrb[183].mxu0  ;;  %9568 = vmatmul.mubr.msk.f32.gmra.mrb[32].mxu0 %vm563_vm0, %v335_v49  ;;  %v12638_v49 = vpack.c.bf16 %v5174_v11, %v5173_v23  ;;  %v5175_v53 = vmax.f32 %v4400_v40, 0.0  ;;  %v4420_v11 = vpop.f32.mrb[63].mxu1  ;;  %v346_v23 = vld [vmem:[%s13551_s0 + $0x960] sm:$0xff] }
 0x24f   :  { %v4911_v63 = vmax.f32 %v3080_v59, 0.0  ;;  %10132 = vmatprep.subr.bf16.mxu1 %v10131_v50  ;;  %9570 = vmatprep.mubr.msk.f32.mxu0 %vm563_vm0, %v336_v31  ;;  %v5176_v50 = vmax.f32 %v9806_v45, 0.0  ;;  %v9815_v40 = vpop.f32.mrb[64].mxu1 }
 0x250   :  { %10134 = vmatpush3.bf16.msra.mxu1 %v12521_v18  ;;  %v339_v18 = vld [vmem:[%s13551_s0 + $0x928] sm:$0xff] }
 0x251   :  { %v10135_v51 = vpack.c.bf16 %v4912_v58, %v4911_v63  ;;  %v9413_v48 = vpop.f32.mrb[184].mxu0 }
 0x252   :  { %v4914_v9 = vmax.f32 %v9413_v48, 0.0  ;;  %v3090_v15 = vpop.f32.mrb[185].mxu0  ;;  %9571 = vmatmul.mubr.msk.f32.gmra.mrb[34].mxu0 %vm563_vm0, %v337_v1  ;;  %v12649_v1 = vpack.c.bf16 %v5176_v50, %v5175_v53  ;;  %v5177_v48 = vmax.f32 %v4410_v5, 0.0  ;;  %v4430_v50 = vpop.f32.mrb[65].mxu1  ;;  %v348_v53 = vld [vmem:[%s13551_s0 + $0x970] sm:$0xff] }
 0x253   :  { %v4913_v22 = vmax.f32 %v3090_v15, 0.0  ;;  %10136 = vmatprep.subr.bf16.mxu1 %v10135_v51  ;;  %9573 = vmatprep.mubr.msk.f32.mxu0 %vm563_vm0, %v338_v4  ;;  %v5178_v51 = vmax.f32 %v9809_v0, 0.0 }
 0x254   :  { %10138 = vmatpush3.bf16.msra.mxu1 %v12533_v27  ;;  %v341_v27 = vld [vmem:[%s13551_s0 + $0x938] sm:$0xff] }
 0x255   :  { %v10139_v20 = vpack.c.bf16 %v4914_v9, %v4913_v22  ;;  %v9416_v34 = vpop.f32.mrb[186].mxu0 }
 0x256   :  { %v4916_v37 = vmax.f32 %v9416_v34, 0.0  ;;  %v3100_v25 = vpop.f32.mrb[187].mxu0  ;;  %9574 = vmatmul.mubr.msk.f32.gmra.mrb[36].mxu0 %vm563_vm0, %v339_v18  ;;  %v12660_v18 = vpack.c.bf16 %v5178_v51, %v5177_v48  ;;  %v5179_v34 = vmax.f32 %v4420_v11, 0.0  ;;  %v349_v48 = vld [vmem:[%s13551_s0 + $0x978] sm:$0xff]  ;;  %v5254_v11 = vld [vmem:[%s13553_s2 + $0x68] sm:$0xff] }
 0x257   :  { %v4915_v31 = vmax.f32 %v3100_v25, 0.0  ;;  %10140 = vmatprep.subr.bf16.mxu1 %v10139_v20  ;;  %9576 = vmatprep.mubr.msk.f32.mxu0 %vm563_vm0, %v340_v26  ;;  %v5180_v20 = vmax.f32 %v9812_v24, 0.0 }
 0x258   :  { %10142 = vmatpush3.bf16.msra.mxu1 %v12545_v47  ;;  %v343_v47 = vld [vmem:[%s13551_s0 + $0x948] sm:$0xff] }
 0x259   :  { %v10143_v58 = vpack.c.bf16 %v4916_v37, %v4915_v31  ;;  %v9419_v59 = vpop.f32.mrb[188].mxu0 }
 0x25a   :  { %v4918_v62 = vmax.f32 %v9419_v59, 0.0  ;;  %v3110_v63 = vpop.f32.mrb[189].mxu0  ;;  %9577 = vmatmul.mubr.msk.f32.gmra.mrb[38].mxu0 %vm563_vm0, %v341_v27  ;;  %v12671_v27 = vpack.c.bf16 %v5180_v20, %v5179_v34  ;;  %v5182_v59 = vmax.f32 %v9815_v40, 0.0  ;;  %v352_v40 = vld [vmem:[%s13551_s0 + $0x990] sm:$0xff] }
 0x25b   :  { %v4917_v4 = vmax.f32 %v3110_v63, 0.0  ;;  %10144 = vmatprep.subr.bf16.mxu1 %v10143_v58  ;;  %9579 = vmatprep.mubr.msk.f32.mxu0 %vm563_vm0, %v342_v44  ;;  %v5251_v58 = vld [vmem:[%s13553_s2 + $0x50] sm:$0xff] }
 0x25c   :  { %10146 = vmatpush3.bf16.msra.mxu1 %v12557_v60  ;;  %v345_v60 = vld [vmem:[%s13551_s0 + $0x958] sm:$0xff] }
 0x25d   :  { %v10147_v9 = vpack.c.bf16 %v4918_v62, %v4917_v4  ;;  %v9422_v15 = vpop.f32.mrb[190].mxu0  ;;  %v5181_v62 = vmax.f32 %v4430_v50, 0.0  ;;  %v5284_v4 = vld [vmem:[%s13553_s2 + $0x158] sm:$0xff] }
 0x25e   :  { %v4920_v21 = vmax.f32 %v9422_v15, 0.0  ;;  %v3120_v22 = vpop.f32.mrb[191].mxu0  ;;  %9580 = vmatmul.mubr.msk.f32.gmra.mrb[40].mxu0 %vm563_vm0, %v343_v47  ;;  %v350_v15 = vld [vmem:[%s13551_s0 + $0x980] sm:$0xff] }
 0x25f   :  { %v4919_v26 = vmax.f32 %v3120_v22, 0.0  ;;  %10148 = vmatprep.subr.bf16.mxu1 %v10147_v9  ;;  %9582 = vmatprep.mubr.msk.f32.mxu0 %vm563_vm0, %v344_v6  ;;  %v9818_v6 = vpop.f32.mrb[66].mxu1 }
 0x260   :  { %10150 = vmatpush3.bf16.msra.mxu1 %v12569_v19  ;;  %v347_v19 = vld [vmem:[%s13551_s0 + $0x968] sm:$0xff]  ;;  %v4440_v9 = vpop.f32.mrb[67].mxu1  ;;  %v5184_v22 = vmax.f32 %v9818_v6, 0.0  ;;  %v354_v6 = vld [vmem:[%s13551_s0 + $0x9a0] sm:$0xff] }
 0x261   :  { %v10151_v37 = vpack.c.bf16 %v4920_v21, %v4919_v26  ;;  %v9425_v25 = vpop.f32.mrb[192].mxu0  ;;  %v5283_v21 = vld [vmem:[%s13553_s2 + $0x150] sm:$0xff]  ;;  %v5183_v24 = vmax.f32 %v4440_v9, 0.0 }
 0x262   :  { %v4922_v45 = vmax.f32 %v9425_v25, 0.0  ;;  %v3130_v31 = vpop.f32.mrb[193].mxu0  ;;  %9583 = vmatmul.mubr.msk.f32.gmra.mrb[42].mxu0 %vm563_vm0, %v345_v60 }
 0x263   :  { %v4921_v44 = vmax.f32 %v3130_v31, 0.0  ;;  %10152 = vmatprep.subr.bf16.mxu1 %v10151_v37  ;;  %9585 = vmatprep.mubr.msk.f32.mxu0 %vm563_vm0, %v346_v23  ;;  %v12708_v34 = vpack.c.bf16 %v5184_v22, %v5183_v24  ;;  %v9821_v37 = vpop.f32.mrb[68].mxu1 }
 0x264   :  { %10154 = vmatpush3.bf16.msra.mxu1 %v12581_v38  ;;  %v12690_v38 = vpack.c.bf16 %v5182_v59, %v5181_v62  ;;  %v4450_v31 = vpop.f32.mrb[69].mxu1 }
 0x265   :  { %v12684_v63 = vpack.c.bf16 %v4922_v45, %v4921_v44  ;;  %v9428_v0 = vpop.f32.mrb[194].mxu0  ;;  %13567 = vst [vmem:[#allocation9_spill] sm:$0xff] %v12708_v34  ;;  %v351_v45 = vld [vmem:[%s13551_s0 + $0x988] sm:$0xff]  ;;  %v5186_v44 = vmax.f32 %v9821_v37, 0.0  ;;  %v356_v37 = vld [vmem:[%s13551_s0 + $0x9b0] sm:$0xff] }
 0x266   :  { %v4924_v47 = vmax.f32 %v9428_v0, 0.0  ;;  %v3140_v5 = vpop.f32.mrb[195].mxu0  ;;  %9586 = vmatmul.mubr.msk.f32.gmra.mrb[44].mxu0 %vm563_vm0, %v347_v19  ;;  %13566 = vst [vmem:[#allocation8_spill] sm:$0xff] %v12690_v38  ;;  %v5185_v19 = vmax.f32 %v4450_v31, 0.0  ;;  %v9824_v0 = vpop.f32.mrb[70].mxu1 }
 0x267   :  { %v4923_v51 = vmax.f32 %v3140_v5, 0.0  ;;  %9588 = vmatprep.mubr.msk.f32.mxu0 %vm563_vm0, %v348_v53  ;;  %5745 = vmatmul.mubr.f32.vlgmr.msra.gmra.mrb[144].mxu1 %v5251_v58  ;;  %v4460_v5 = vpop.f32.mrb[71].mxu1 }
 0x268   :  { %5749 = vmatprep.mubr.f32.mxu1 %v5284_v4  ;;  %v12720_v62 = vpack.c.bf16 %v5186_v44, %v5185_v19 }
 0x269   :  { %v12702_v26 = vpack.c.bf16 %v4924_v47, %v4923_v51  ;;  %v9431_v60 = vpop.f32.mrb[196].mxu0  ;;  %v353_v47 = vld [vmem:[%s13551_s0 + $0x998] sm:$0xff]  ;;  %v5188_v51 = vmax.f32 %v9824_v0, 0.0 }
 0x26a   :  { %v4926_v23 = vmax.f32 %v9431_v60, 0.0  ;;  %v3150_v20 = vpop.f32.mrb[197].mxu0  ;;  %9589 = vmatmul.mubr.msk.f32.gmra.mrb[46].mxu0 %vm563_vm0, %v349_v48  ;;  %13568 = vst [vmem:[#allocation10_spill] sm:$0xff] %v12720_v62  ;;  %v5187_v48 = vmax.f32 %v4460_v5, 0.0  ;;  %v9827_v60 = vpop.f32.mrb[72].mxu1  ;;  %v357_v0 = vld [vmem:[%s13551_s0 + $0x9b8] sm:$0xff] }
 0x26b   :  { %v4925_v25 = vmax.f32 %v3150_v20, 0.0  ;;  %9591 = vmatprep.mubr.msk.f32.mxu0 %vm563_vm0, %v350_v15  ;;  %5750 = vmatmul.mubr.f32.gmra.mrb[146].mxu1 %v5283_v21  ;;  %v4470_v20 = vpop.f32.mrb[73].mxu1 }
 0x26c   :  { %5819 = vmatprep.mubr.f32.mxu1 %v5254_v11  ;;  %v12732_v24 = vpack.c.bf16 %v5188_v51, %v5187_v48 }
 0x26d   :  { %v12717_v50 = vpack.c.bf16 %v4926_v23, %v4925_v25  ;;  %v9434_v53 = vpop.f32.mrb[198].mxu0  ;;  %v355_v23 = vld [vmem:[%s13551_s0 + $0x9a8] sm:$0xff]  ;;  %v5190_v25 = vmax.f32 %v9827_v60, 0.0 }
 0x26e   :  { %v4928_v58 = vmax.f32 %v9434_v53, 0.0  ;;  %v3160_v59 = vpop.f32.mrb[199].mxu0  ;;  %9592 = vmatmul.mubr.msk.f32.gmra.mrb[48].mxu0 %vm563_vm0, %v351_v45  ;;  %13569 = vst [vmem:[#allocation11_spill] sm:$0xff] %v12732_v24  ;;  %v5189_v45 = vmax.f32 %v4470_v20, 0.0 }
 0x26f   :  { %v4927_v4 = vmax.f32 %v3160_v59, 0.0  ;;  %9594 = vmatprep.mubr.msk.f32.mxu0 %vm563_vm0, %v352_v40 }
 0x270   :  { %v12744_v53 = vpack.c.bf16 %v5190_v25, %v5189_v45 }
 0x271   :  { %v12729_v9 = vpack.c.bf16 %v4928_v58, %v4927_v4  ;;  %v9437_v15 = vpop.f32.mrb[200].mxu0  ;;  %v9830_v58 = vpop.f32.mrb[74].mxu1 }
 0x272   :  { %v4930_v21 = vmax.f32 %v9437_v15, 0.0  ;;  %v3170_v22 = vpop.f32.mrb[201].mxu0  ;;  %9595 = vmatmul.mubr.msk.f32.gmra.mrb[50].mxu0 %vm563_vm0, %v353_v47  ;;  %13570 = vst [vmem:[#allocation12_spill] sm:$0xff] %v12744_v53  ;;  %v4480_v4 = vpop.f32.mrb[75].mxu1  ;;  %v358_v47 = vld [vmem:[%s13551_s0 + $0x9c0] sm:$0xff]  ;;  %v5192_v5 = vmax.f32 %v9830_v58, 0.0 }
 0x273   :  { %v4929_v11 = vmax.f32 %v3170_v22, 0.0  ;;  %9597 = vmatprep.mubr.msk.f32.mxu0 %vm563_vm0, %v354_v6  ;;  %v5191_v6 = vmax.f32 %v4480_v4, 0.0  ;;  %v9833_v60 = vpop.f32.mrb[76].mxu1 }
 0x274   :  { %v4490_v20 = vpop.f32.mrb[77].mxu1  ;;  %v5194_v25 = vmax.f32 %v9833_v60, 0.0 }
 0x275   :  { %v12741_v31 = vpack.c.bf16 %v4930_v21, %v4929_v11  ;;  %v9440_v40 = vpop.f32.mrb[202].mxu0  ;;  %v12756_v22 = vpack.c.bf16 %v5192_v5, %v5191_v6  ;;  %v5193_v45 = vmax.f32 %v4490_v20, 0.0  ;;  %v362_v6 = vld [vmem:[%s13551_s0 + $0x9e0] sm:$0xff] }
 0x276   :  { %v4932_v44 = vmax.f32 %v9440_v40, 0.0  ;;  %v3180_v19 = vpop.f32.mrb[203].mxu0  ;;  %9598 = vmatmul.mubr.msk.f32.gmra.mrb[52].mxu0 %vm563_vm0, %v355_v23  ;;  %v359_v23 = vld [vmem:[%s13551_s0 + $0x9c8] sm:$0xff] }
 0x277   :  { %v4931_v59 = vmax.f32 %v3180_v19, 0.0  ;;  %9600 = vmatprep.mubr.msk.f32.mxu0 %vm563_vm0, %v356_v37  ;;  %13571 = vst [vmem:[#allocation13_spill] sm:$0xff] %v12756_v22  ;;  %v360_v37 = vld [vmem:[%s13551_s0 + $0x9d0] sm:$0xff] }
 0x279   :  { %v12753_v51 = vpack.c.bf16 %v4932_v44, %v4931_v59  ;;  %v9443_v48 = vpop.f32.mrb[204].mxu0  ;;  %v12768_v59 = vpack.c.bf16 %v5194_v25, %v5193_v45  ;;  %v363_v45 = vld [vmem:[%s13551_s0 + $0x9e8] sm:$0xff] }
 0x27a   :  { %v4934_v15 = vmax.f32 %v9443_v48, 0.0  ;;  %v3190_v21 = vpop.f32.mrb[205].mxu0  ;;  %9601 = vmatmul.mubr.msk.f32.gmra.mrb[54].mxu0 %vm563_vm0, %v357_v0  ;;  %v9836_v0 = vpop.f32.mrb[78].mxu1 }
 0x27b   :  { %v4933_v11 = vmax.f32 %v3190_v21, 0.0  ;;  %9603 = vmatprep.mubr.msk.f32.mxu0 %vm563_vm0, %v358_v47  ;;  %v361_v47 = vld [vmem:[%s13551_s0 + $0x9d8] sm:$0xff]  ;;  %v4500_v5 = vpop.f32.mrb[79].mxu1  ;;  %v5196_v48 = vmax.f32 %v9836_v0, 0.0 }
 0x27d   :  { %v12765_v40 = vpack.c.bf16 %v4934_v15, %v4933_v11  ;;  %v9446_v44 = vpop.f32.mrb[206].mxu0  ;;  %v5195_v15 = vmax.f32 %v4500_v5, 0.0 }
 0x27e   :  { %v4936_v19 = vmax.f32 %v9446_v44, 0.0  ;;  %v3200_v58 = vpop.f32.mrb[207].mxu0  ;;  %9604 = vmatmul.mubr.msk.f32.gmra.mrb[56].mxu0 %vm563_vm0, %v359_v23 }
 0x27f   :  { %v4935_v4 = vmax.f32 %v3200_v58, 0.0  ;;  %9606 = vmatprep.mubr.msk.f32.mxu0 %vm563_vm0, %v360_v37  ;;  %v12780_v20 = vpack.c.bf16 %v5196_v48, %v5195_v15  ;;  %v9839_v37 = vpop.f32.mrb[80].mxu1 }
 0x280   :  { %v4510_v44 = vpop.f32.mrb[81].mxu1  ;;  %v5198_v58 = vmax.f32 %v9839_v37, 0.0 }
 0x281   :  { %v12777_v21 = vpack.c.bf16 %v4936_v19, %v4935_v4  ;;  %v9449_v60 = vpop.f32.mrb[208].mxu0  ;;  %v364_v19 = vld [vmem:[%s13551_s0 + $0x9f0] sm:$0xff]  ;;  %v5197_v0 = vmax.f32 %v4510_v44, 0.0 }
 0x282   :  { %v4938_v11 = vmax.f32 %v9449_v60, 0.0  ;;  %v3210_v23 = vpop.f32.mrb[209].mxu0  ;;  %9607 = vmatmul.mubr.msk.f32.gmra.mrb[58].mxu0 %vm563_vm0, %v361_v47 }
 0x283   :  { %v4937_v25 = vmax.f32 %v3210_v23, 0.0  ;;  %9609 = vmatprep.mubr.msk.f32.mxu0 %vm563_vm0, %v362_v6  ;;  %v12790_v15 = vpack.c.bf16 %v5198_v58, %v5197_v0  ;;  %v9842_v6 = vpop.f32.mrb[82].mxu1  ;;  %v365_v23 = vld [vmem:[%s13551_s0 + $0x9f8] sm:$0xff] }
 0x284   :  { %v4520_v22 = vpop.f32.mrb[83].mxu1  ;;  %v5200_v37 = vmax.f32 %v9842_v6, 0.0 }
 0x285   :  { %v10155_v4 = vpack.c.bf16 %v4938_v11, %v4937_v25  ;;  %v9452_v5 = vpop.f32.mrb[210].mxu0  ;;  %v366_v11 = vld [vmem:[%s13551_s0 + $0xa00] sm:$0xff]  ;;  %v5199_v25 = vmax.f32 %v4520_v22, 0.0  ;;  %v368_v22 = vld [vmem:[%s13551_s0 + $0xa10] sm:$0xff] }
 0x286   :  { %v4940_v47 = vmax.f32 %v9452_v5, 0.0  ;;  %v3220_v48 = vpop.f32.mrb[211].mxu0  ;;  %9610 = vmatmul.mubr.msk.f32.gmra.mrb[60].mxu0 %vm563_vm0, %v363_v45 }
 0x287   :  { %v4939_v60 = vmax.f32 %v3220_v48, 0.0  ;;  %10156 = vmatprep.subr.bf16.mxu1 %v10155_v4  ;;  %9612 = vmatprep.mubr.msk.f32.mxu0 %vm563_vm0, %v364_v19  ;;  %v12801_v19 = vpack.c.bf16 %v5200_v37, %v5199_v25  ;;  %v9845_v4 = vpop.f32.mrb[84].mxu1 }
 0x288   :  { %10158 = vmatpush3.bf16.msra.mxu1 %v12684_v63  ;;  %v367_v63 = vld [vmem:[%s13551_s0 + $0xa08] sm:$0xff]  ;;  %v4530_v48 = vpop.f32.mrb[85].mxu1 }
 0x289   :  { %v10159_v45 = vpack.c.bf16 %v4940_v47, %v4939_v60  ;;  %v9455_v44 = vpop.f32.mrb[212].mxu0  ;;  %13572 = vst [vmem:[#allocation14_spill] sm:$0xff] %v12801_v19  ;;  %v5202_v47 = vmax.f32 %v9845_v4, 0.0  ;;  %v5201_v6 = vmax.f32 %v4530_v48, 0.0 }
 0x28a   :  { %v4942_v58 = vmax.f32 %v9455_v44, 0.0  ;;  %v3230_v0 = vpop.f32.mrb[213].mxu0  ;;  %9613 = vmatmul.mubr.msk.f32.gmra.mrb[62].mxu0 %vm563_vm0, %v365_v23 }
 0x28b   :  { %v4941_v5 = vmax.f32 %v3230_v0, 0.0  ;;  %10160 = vmatprep.subr.bf16.mxu1 %v10159_v45  ;;  %9615 = vmatprep.mubr.msk.f32.mxu0 %vm563_vm0, %v366_v11  ;;  %v12812_v11 = vpack.c.bf16 %v5202_v47, %v5201_v6  ;;  %v9848_v45 = vpop.f32.mrb[86].mxu1 }
 0x28c   :  { %10162 = vmatpush3.bf16.msra.mxu1 %v12702_v26  ;;  %v369_v26 = vld [vmem:[%s13551_s0 + $0xa18] sm:$0xff]  ;;  %v4540_v0 = vpop.f32.mrb[87].mxu1  ;;  %v5204_v4 = vmax.f32 %v9848_v45, 0.0 }
 0x28d   :  { %v10163_v60 = vpack.c.bf16 %v4942_v58, %v4941_v5  ;;  %v9458_v23 = vpop.f32.mrb[214].mxu0  ;;  %13573 = vst [vmem:[#allocation15_spill] sm:$0xff] %v12812_v11  ;;  %v370_v58 = vld [vmem:[%s13551_s0 + $0xa20] sm:$0xff]  ;;  %v5203_v5 = vmax.f32 %v4540_v0, 0.0 }
 0x28e   :  { %v4944_v37 = vmax.f32 %v9458_v23, 0.0  ;;  %v3240_v25 = vpop.f32.mrb[215].mxu0  ;;  %9616 = vmatmul.mubr.msk.f32.gmra.mrb[64].mxu0 %vm563_vm0, %v367_v63 }
 0x28f   :  { %v4943_v44 = vmax.f32 %v3240_v25, 0.0  ;;  %10164 = vmatprep.subr.bf16.mxu1 %v10163_v60  ;;  %9618 = vmatprep.mubr.msk.f32.mxu0 %vm563_vm0, %v368_v22  ;;  %v12823_v22 = vpack.c.bf16 %v5204_v4, %v5203_v5  ;;  %v9851_v60 = vpop.f32.mrb[88].mxu1 }
 0x290   :  { %10166 = vmatpush3.bf16.msra.mxu1 %v12717_v50  ;;  %v371_v50 = vld [vmem:[%s13551_s0 + $0xa28] sm:$0xff]  ;;  %v4550_v25 = vpop.f32.mrb[89].mxu1  ;;  %v5206_v45 = vmax.f32 %v9851_v60, 0.0 }
 0x291   :  { %v10167_v63 = vpack.c.bf16 %v4944_v37, %v4943_v44  ;;  %v9461_v48 = vpop.f32.mrb[216].mxu0  ;;  %13574 = vst [vmem:[#allocation16_spill] sm:$0xff] %v12823_v22  ;;  %v372_v37 = vld [vmem:[%s13551_s0 + $0xa30] sm:$0xff]  ;;  %v5205_v44 = vmax.f32 %v4550_v25, 0.0 }
 0x292   :  { %v4946_v47 = vmax.f32 %v9461_v48, 0.0  ;;  %v3250_v6 = vpop.f32.mrb[217].mxu0  ;;  %9619 = vmatmul.mubr.msk.f32.gmra.mrb[66].mxu0 %vm563_vm0, %v369_v26 }
 0x293   :  { %v4945_v23 = vmax.f32 %v3250_v6, 0.0  ;;  %10168 = vmatprep.subr.bf16.mxu1 %v10167_v63  ;;  %9621 = vmatprep.mubr.msk.f32.mxu0 %vm563_vm0, %v370_v58  ;;  %v12834_v58 = vpack.c.bf16 %v5206_v45, %v5205_v44  ;;  %v9854_v63 = vpop.f32.mrb[90].mxu1 }
 0x294   :  { %10170 = vmatpush3.bf16.msra.mxu1 %v12729_v9  ;;  %v373_v9 = vld [vmem:[%s13551_s0 + $0xa38] sm:$0xff]  ;;  %v4560_v6 = vpop.f32.mrb[91].mxu1  ;;  %v5208_v60 = vmax.f32 %v9854_v63, 0.0 }
 0x295   :  { %v10171_v26 = vpack.c.bf16 %v4946_v47, %v4945_v23  ;;  %v9464_v0 = vpop.f32.mrb[218].mxu0  ;;  %13575 = vst [vmem:[#allocation17_spill] sm:$0xff] %v12834_v58  ;;  %v374_v47 = vld [vmem:[%s13551_s0 + $0xa40] sm:$0xff]  ;;  %v5207_v23 = vmax.f32 %v4560_v6, 0.0 }
 0x296   :  { %v4948_v4 = vmax.f32 %v9464_v0, 0.0  ;;  %v3260_v5 = vpop.f32.mrb[219].mxu0  ;;  %9622 = vmatmul.mubr.msk.f32.gmra.mrb[68].mxu0 %vm563_vm0, %v371_v50 }
 0x297   :  { %v4947_v48 = vmax.f32 %v3260_v5, 0.0  ;;  %10172 = vmatprep.subr.bf16.mxu1 %v10171_v26  ;;  %9624 = vmatprep.mubr.msk.f32.mxu0 %vm563_vm0, %v372_v37  ;;  %v12845_v37 = vpack.c.bf16 %v5208_v60, %v5207_v23  ;;  %v9857_v26 = vpop.f32.mrb[92].mxu1 }
 0x298   :  { %10174 = vmatpush3.bf16.msra.mxu1 %v12741_v31  ;;  %v375_v31 = vld [vmem:[%s13551_s0 + $0xa48] sm:$0xff]  ;;  %v4570_v5 = vpop.f32.mrb[93].mxu1  ;;  %v5210_v63 = vmax.f32 %v9857_v26, 0.0 }
 0x299   :  { %v10175_v50 = vpack.c.bf16 %v4948_v4, %v4947_v48  ;;  %v9467_v25 = vpop.f32.mrb[220].mxu0  ;;  %13576 = vst [vmem:[#allocation18_spill] sm:$0xff] %v12845_v37  ;;  %v376_v4 = vld [vmem:[%s13551_s0 + $0xa50] sm:$0xff]  ;;  %v5209_v48 = vmax.f32 %v4570_v5, 0.0 }
 0x29a   :  { %v4950_v45 = vmax.f32 %v9467_v25, 0.0  ;;  %v3270_v44 = vpop.f32.mrb[221].mxu0  ;;  %9625 = vmatmul.mubr.msk.f32.gmra.mrb[70].mxu0 %vm563_vm0, %v373_v9 }
 0x29b   :  { %v4949_v0 = vmax.f32 %v3270_v44, 0.0  ;;  %10176 = vmatprep.subr.bf16.mxu1 %v10175_v50  ;;  %9627 = vmatprep.mubr.msk.f32.mxu0 %vm563_vm0, %v374_v47  ;;  %v12856_v47 = vpack.c.bf16 %v5210_v63, %v5209_v48  ;;  %v9860_v50 = vpop.f32.mrb[94].mxu1 }
 0x29c   :  { %10178 = vmatpush3.bf16.msra.mxu1 %v12753_v51  ;;  %v377_v51 = vld [vmem:[%s13551_s0 + $0xa58] sm:$0xff]  ;;  %v4580_v44 = vpop.f32.mrb[95].mxu1  ;;  %v5212_v26 = vmax.f32 %v9860_v50, 0.0  ;;  %v380_v50 = vld [vmem:[%s13551_s0 + $0xa70] sm:$0xff] }
 0x29d   :  { %v10179_v9 = vpack.c.bf16 %v4950_v45, %v4949_v0  ;;  %v9470_v6 = vpop.f32.mrb[222].mxu0  ;;  %13577 = vst [vmem:[#allocation19_spill] sm:$0xff] %v12856_v47  ;;  %v378_v45 = vld [vmem:[%s13551_s0 + $0xa60] sm:$0xff]  ;;  %v5211_v0 = vmax.f32 %v4580_v44, 0.0  ;;  %v385_v47 = vld [vmem:[%s13551_s0 + $0xa98] sm:$0xff] }
 0x29e   :  { %v4952_v60 = vmax.f32 %v9470_v6, 0.0  ;;  %v3280_v23 = vpop.f32.mrb[223].mxu0  ;;  %9628 = vmatmul.mubr.msk.f32.gmra.mrb[72].mxu0 %vm563_vm0, %v375_v31 }
 0x29f   :  { %v4951_v25 = vmax.f32 %v3280_v23, 0.0  ;;  %10180 = vmatprep.subr.bf16.mxu1 %v10179_v9  ;;  %9630 = vmatprep.mubr.msk.f32.mxu0 %vm563_vm0, %v376_v4  ;;  %v12867_v4 = vpack.c.bf16 %v5212_v26, %v5211_v0  ;;  %v9863_v9 = vpop.f32.mrb[96].mxu1  ;;  %v5286_v26 = vld [vmem:[%s13553_s2 + $0x168] sm:$0xff] }
 0x2a0   :  { %10182 = vmatpush3.bf16.msra.mxu1 %v12765_v40  ;;  %v379_v40 = vld [vmem:[%s13551_s0 + $0xa68] sm:$0xff]  ;;  %v4590_v23 = vpop.f32.mrb[97].mxu1 }
 0x2a1   :  { %v10183_v31 = vpack.c.bf16 %v4952_v60, %v4951_v25  ;;  %v9473_v5 = vpop.f32.mrb[224].mxu0  ;;  %13578 = vst [vmem:[#allocation20_spill] sm:$0xff] %v12867_v4  ;;  %v5253_v60 = vld [vmem:[%s13553_s2 + $0x60] sm:$0xff]  ;;  %v5214_v25 = vmax.f32 %v9863_v9, 0.0 }
 0x2a2   :  { %v4954_v63 = vmax.f32 %v9473_v5, 0.0  ;;  %v3290_v48 = vpop.f32.mrb[225].mxu0  ;;  %9631 = vmatmul.mubr.msk.f32.gmra.mrb[74].mxu0 %vm563_vm0, %v377_v51  ;;  %v5213_v51 = vmax.f32 %v4590_v23, 0.0  ;;  %v9866_v5 = vpop.f32.mrb[98].mxu1 }
 0x2a3   :  { %v4953_v6 = vmax.f32 %v3290_v48, 0.0  ;;  %10184 = vmatprep.subr.bf16.mxu1 %v10183_v31  ;;  %9633 = vmatprep.mubr.msk.f32.mxu0 %vm563_vm0, %v378_v45  ;;  %v4600_v9 = vpop.f32.mrb[99].mxu1  ;;  %v5216_v23 = vmax.f32 %v9866_v5, 0.0 }
 0x2a4   :  { %10186 = vmatpush3.bf16.msra.mxu1 %v12777_v21  ;;  %v12886_v21 = vpack.c.bf16 %v5214_v25, %v5213_v51  ;;  %v5215_v25 = vmax.f32 %v4600_v9, 0.0 }
 0x2a5   :  { %v12880_v44 = vpack.c.bf16 %v4954_v63, %v4953_v6  ;;  %v9476_v45 = vpop.f32.mrb[226].mxu0  ;;  %v381_v63 = vld [vmem:[%s13551_s0 + $0xa78] sm:$0xff]  ;;  %v382_v6 = vld [vmem:[%s13551_s0 + $0xa80] sm:$0xff] }
 0x2a6   :  { %v4956_v0 = vmax.f32 %v9476_v45, 0.0  ;;  %v3300_v31 = vpop.f32.mrb[227].mxu0  ;;  %9634 = vmatmul.mubr.msk.f32.gmra.mrb[76].mxu0 %vm563_vm0, %v379_v40  ;;  %13579 = vst [vmem:[#allocation21_spill] sm:$0xff] %v12886_v21  ;;  %v5285_v40 = vld [vmem:[%s13553_s2 + $0x160] sm:$0xff]  ;;  %v9869_v21 = vpop.f32.mrb[100].mxu1 }
 0x2a7   :  { %v4955_v48 = vmax.f32 %v3300_v31, 0.0  ;;  %5820 = vmatmul.mubr.f32.vlgmr.msra.gmra.mrb[148].mxu1 %v5253_v60  ;;  %9636 = vmatprep.mubr.msk.f32.mxu0 %vm563_vm0, %v380_v50  ;;  %v5256_v50 = vld [vmem:[%s13553_s2 + $0x78] sm:$0xff]  ;;  %v4610_v5 = vpop.f32.mrb[101].mxu1  ;;  %v5218_v9 = vmax.f32 %v9869_v21, 0.0 }
 0x2a8   :  { %5824 = vmatprep.mubr.f32.mxu1 %v5286_v26  ;;  %v12904_v26 = vpack.c.bf16 %v5216_v23, %v5215_v25 }
 0x2a9   :  { %v12898_v51 = vpack.c.bf16 %v4956_v0, %v4955_v48  ;;  %v9479_v60 = vpop.f32.mrb[228].mxu0  ;;  %v383_v0 = vld [vmem:[%s13551_s0 + $0xa88] sm:$0xff]  ;;  %v384_v48 = vld [vmem:[%s13551_s0 + $0xa90] sm:$0xff] }
 0x2aa   :  { %v4958_v45 = vmax.f32 %v9479_v60, 0.0  ;;  %v3310_v31 = vpop.f32.mrb[229].mxu0  ;;  %9637 = vmatmul.mubr.msk.f32.gmra.mrb[78].mxu0 %vm563_vm0, %v381_v63  ;;  %13580 = vst [vmem:[#allocation22_spill] sm:$0xff] %v12904_v26  ;;  %v5217_v60 = vmax.f32 %v4610_v5, 0.0 }
 0x2ab   :  { %v4957_v4 = vmax.f32 %v3310_v31, 0.0  ;;  %9639 = vmatprep.mubr.msk.f32.mxu0 %vm563_vm0, %v382_v6  ;;  %5825 = vmatmul.mubr.f32.gmra.mrb[150].mxu1 %v5285_v40  ;;  %v9872_v40 = vpop.f32.mrb[102].mxu1 }
 0x2ac   :  { %5894 = vmatprep.mubr.f32.mxu1 %v5256_v50  ;;  %v12916_v6 = vpack.c.bf16 %v5218_v9, %v5217_v60  ;;  %v4620_v50 = vpop.f32.mrb[103].mxu1  ;;  %v5220_v21 = vmax.f32 %v9872_v40, 0.0 }
 0x2ad   :  { %v12913_v63 = vpack.c.bf16 %v4958_v45, %v4957_v4  ;;  %v9482_v23 = vpop.f32.mrb[230].mxu0  ;;  %v386_v4 = vld [vmem:[%s13551_s0 + $0xaa0] sm:$0xff]  ;;  %v5219_v45 = vmax.f32 %v4620_v50, 0.0 }
 0x2ae   :  { %v4960_v25 = vmax.f32 %v9482_v23, 0.0  ;;  %v3320_v31 = vpop.f32.mrb[231].mxu0  ;;  %9640 = vmatmul.mubr.msk.f32.gmra.mrb[80].mxu0 %vm563_vm0, %v383_v0  ;;  %13581 = vst [vmem:[#allocation23_spill] sm:$0xff] %v12916_v6  ;;  %v387_v6 = vld [vmem:[%s13551_s0 + $0xaa8] sm:$0xff] }
 0x2af   :  { %v4959_v26 = vmax.f32 %v3320_v31, 0.0  ;;  %9642 = vmatprep.mubr.msk.f32.mxu0 %vm563_vm0, %v384_v48  ;;  %v12928_v23 = vpack.c.bf16 %v5220_v21, %v5219_v45  ;;  %v9875_v48 = vpop.f32.mrb[104].mxu1 }
 0x2b0   :  { %v4630_v37 = vpop.f32.mrb[105].mxu1 }
 0x2b1   :  { %v12925_v5 = vpack.c.bf16 %v4960_v25, %v4959_v26  ;;  %v9485_v0 = vpop.f32.mrb[232].mxu0  ;;  %13582 = vst [vmem:[#allocation24_spill] sm:$0xff] %v12928_v23  ;;  %v388_v26 = vld [vmem:[%s13551_s0 + $0xab0] sm:$0xff]  ;;  %v5222_v25 = vmax.f32 %v9875_v48, 0.0  ;;  %v5221_v40 = vmax.f32 %v4630_v37, 0.0  ;;  %v389_v23 = vld [vmem:[%s13551_s0 + $0xab8] sm:$0xff] }
 0x2b2   :  { %v4962_v9 = vmax.f32 %v9485_v0, 0.0  ;;  %v3330_v60 = vpop.f32.mrb[233].mxu0  ;;  %9643 = vmatmul.mubr.msk.f32.gmra.mrb[82].mxu0 %vm563_vm0, %v385_v47  ;;  %v390_v37 = vld [vmem:[%s13551_s0 + $0xac0] sm:$0xff] }
 0x2b3   :  { %v4961_v31 = vmax.f32 %v3330_v60, 0.0  ;;  %9645 = vmatprep.mubr.msk.f32.mxu0 %vm563_vm0, %v386_v4  ;;  %v12940_v0 = vpack.c.bf16 %v5222_v25, %v5221_v40  ;;  %v9878_v4 = vpop.f32.mrb[106].mxu1 }
 0x2b4   :  { %v4640_v53 = vpop.f32.mrb[107].mxu1 }
 0x2b5   :  { %v12937_v50 = vpack.c.bf16 %v4962_v9, %v4961_v31  ;;  %v9488_v47 = vpop.f32.mrb[234].mxu0  ;;  %13583 = vst [vmem:[#allocation25_spill] sm:$0xff] %v12940_v0  ;;  %v5224_v9 = vmax.f32 %v9878_v4, 0.0  ;;  %v5223_v48 = vmax.f32 %v4640_v53, 0.0  ;;  %v391_v0 = vld [vmem:[%s13551_s0 + $0xac8] sm:$0xff]  ;;  %v392_v53 = vld [vmem:[%s13551_s0 + $0xad0] sm:$0xff] }
 0x2b6   :  { %v4964_v21 = vmax.f32 %v9488_v47, 0.0  ;;  %v3340_v45 = vpop.f32.mrb[235].mxu0  ;;  %9646 = vmatmul.mubr.msk.f32.gmra.mrb[84].mxu0 %vm563_vm0, %v387_v6 }
 0x2b7   :  { %v4963_v60 = vmax.f32 %v3340_v45, 0.0  ;;  %9648 = vmatprep.mubr.msk.f32.mxu0 %vm563_vm0, %v388_v26  ;;  %v12952_v47 = vpack.c.bf16 %v5224_v9, %v5223_v48  ;;  %v9881_v26 = vpop.f32.mrb[108].mxu1 }
 0x2b8   :  { %v4650_v58 = vpop.f32.mrb[109].mxu1 }
 0x2b9   :  { %v12949_v31 = vpack.c.bf16 %v4964_v21, %v4963_v60  ;;  %v9491_v6 = vpop.f32.mrb[236].mxu0  ;;  %13584 = vst [vmem:[#allocation26_spill] sm:$0xff] %v12952_v47  ;;  %v5226_v21 = vmax.f32 %v9881_v26, 0.0  ;;  %v5225_v4 = vmax.f32 %v4650_v58, 0.0  ;;  %v393_v47 = vld [vmem:[%s13551_s0 + $0xad8] sm:$0xff]  ;;  %v394_v58 = vld [vmem:[%s13551_s0 + $0xae0] sm:$0xff] }
 0x2ba   :  { %v4966_v25 = vmax.f32 %v9491_v6, 0.0  ;;  %v3350_v40 = vpop.f32.mrb[237].mxu0  ;;  %9649 = vmatmul.mubr.msk.f32.gmra.mrb[86].mxu0 %vm563_vm0, %v389_v23 }
 0x2bb   :  { %v4965_v45 = vmax.f32 %v3350_v40, 0.0  ;;  %9651 = vmatprep.mubr.msk.f32.mxu0 %vm563_vm0, %v390_v37  ;;  %v12964_v6 = vpack.c.bf16 %v5226_v21, %v5225_v4  ;;  %v9884_v37 = vpop.f32.mrb[110].mxu1 }
 0x2bc   :  { %v4660_v24 = vpop.f32.mrb[111].mxu1 }
 0x2bd   :  { %v12961_v60 = vpack.c.bf16 %v4966_v25, %v4965_v45  ;;  %v9494_v23 = vpop.f32.mrb[238].mxu0  ;;  %13585 = vst [vmem:[#allocation27_spill] sm:$0xff] %v12964_v6  ;;  %v5228_v25 = vmax.f32 %v9884_v37, 0.0  ;;  %v5227_v26 = vmax.f32 %v4660_v24, 0.0  ;;  %v395_v6 = vld [vmem:[%s13551_s0 + $0xae8] sm:$0xff]  ;;  %v396_v24 = vld [vmem:[%s13551_s0 + $0xaf0] sm:$0xff] }
 0x2be   :  { %v4968_v9 = vmax.f32 %v9494_v23, 0.0  ;;  %v3360_v48 = vpop.f32.mrb[239].mxu0  ;;  %9652 = vmatmul.mubr.msk.f32.gmra.mrb[88].mxu0 %vm563_vm0, %v391_v0 }
 0x2bf   :  { %v4967_v40 = vmax.f32 %v3360_v48, 0.0  ;;  %9654 = vmatprep.mubr.msk.f32.mxu0 %vm563_vm0, %v392_v53  ;;  %v12976_v23 = vpack.c.bf16 %v5228_v25, %v5227_v26  ;;  %v9887_v53 = vpop.f32.mrb[112].mxu1 }
 0x2c0   :  { %v4670_v22 = vpop.f32.mrb[113].mxu1 }
 0x2c1   :  { %v12973_v45 = vpack.c.bf16 %v4968_v9, %v4967_v40  ;;  %v9497_v0 = vpop.f32.mrb[240].mxu0  ;;  %13586 = vst [vmem:[#allocation28_spill] sm:$0xff] %v12976_v23  ;;  %v5230_v9 = vmax.f32 %v9887_v53, 0.0  ;;  %v5229_v37 = vmax.f32 %v4670_v22, 0.0  ;;  %v9890_v40 = vpop.f32.mrb[114].mxu1  ;;  %v397_v22 = vld [vmem:[%s13551_s0 + $0xaf8] sm:$0xff] }
 0x2c2   :  { %v4970_v21 = vmax.f32 %v9497_v0, 0.0  ;;  %v3370_v4 = vpop.f32.mrb[241].mxu0  ;;  %9655 = vmatmul.mubr.msk.f32.gmra.mrb[90].mxu0 %vm563_vm0, %v393_v47  ;;  %v5232_v25 = vmax.f32 %v9890_v40, 0.0  ;;  %v4680_v26 = vpop.f32.mrb[115].mxu1  ;;  %v398_v53 = vld [vmem:[%s13551_s0 + $0xb00] sm:$0xff] }
 0x2c3   :  { %v4969_v48 = vmax.f32 %v3370_v4, 0.0  ;;  %9657 = vmatprep.mubr.msk.f32.mxu0 %vm563_vm0, %v394_v58  ;;  %v12986_v58 = vpack.c.bf16 %v5230_v9, %v5229_v37  ;;  %v5231_v62 = vmax.f32 %v4680_v26, 0.0  ;;  %v9893_v11 = vpop.f32.mrb[116].mxu1 }
 0x2c4   :  { %v5234_v40 = vmax.f32 %v9893_v11, 0.0 }
 0x2c5   :  { %v10187_v0 = vpack.c.bf16 %v4970_v21, %v4969_v48  ;;  %v9500_v47 = vpop.f32.mrb[242].mxu0  ;;  %13587 = vst [vmem:[#allocation29_spill] sm:$0xff] %v12986_v58  ;;  %v4690_v21 = vpop.f32.mrb[117].mxu1 }
 0x2c6   :  { %v4972_v23 = vmax.f32 %v9500_v47, 0.0  ;;  %v3380_v4 = vpop.f32.mrb[243].mxu0  ;;  %9658 = vmatmul.mubr.msk.f32.gmra.mrb[92].mxu0 %vm563_vm0, %v395_v6  ;;  %v12996_v6 = vpack.c.bf16 %v5232_v25, %v5231_v62  ;;  %v9896_v48 = vpop.f32.mrb[118].mxu1  ;;  %v399_v62 = vld [vmem:[%s13551_s0 + $0xb08] sm:$0xff] }
 0x2c7   :  { %v4971_v34 = vmax.f32 %v3380_v4, 0.0  ;;  %10188 = vmatprep.subr.bf16.mxu1 %v10187_v0  ;;  %9660 = vmatprep.mubr.msk.f32.mxu0 %vm563_vm0, %v396_v24  ;;  %v5233_v0 = vmax.f32 %v4690_v21, 0.0  ;;  %v5236_v47 = vmax.f32 %v9896_v48, 0.0  ;;  %v4700_v24 = vpop.f32.mrb[119].mxu1 }
 0x2c8   :  { %10190 = vmatpush3.bf16.msra.mxu1 %v12880_v44  ;;  %13588 = vst [vmem:[#allocation30_spill] sm:$0xff] %v12996_v6  ;;  %v5235_v58 = vmax.f32 %v4700_v24, 0.0  ;;  %v9899_v19 = vpop.f32.mrb[120].mxu1 }
 0x2c9   :  { %v10191_v9 = vpack.c.bf16 %v4972_v23, %v4971_v34  ;;  %v9503_v37 = vpop.f32.mrb[244].mxu0  ;;  %v13003_v34 = vpack.c.bf16 %v5234_v40, %v5233_v0  ;;  %v4710_v11 = vpop.f32.mrb[121].mxu1  ;;  %v400_v23 = vld [vmem:[%s13551_s0 + $0xb10] sm:$0xff] }
 0x2ca   :  { %v4974_v26 = vmax.f32 %v9503_v37, 0.0  ;;  %v3390_v4 = vpop.f32.mrb[245].mxu0  ;;  %9661 = vmatmul.mubr.msk.f32.gmra.mrb[94].mxu0 %vm563_vm0, %v397_v22  ;;  %v13009_v25 = vpack.c.bf16 %v5236_v47, %v5235_v58  ;;  %v9902_v22 = vpop.f32.mrb[122].mxu1  ;;  %v401_v58 = vld [vmem:[%s13551_s0 + $0xb18] sm:$0xff] }
 0x2cb   :  { %v4973_v44 = vmax.f32 %v3390_v4, 0.0  ;;  %10192 = vmatprep.subr.bf16.mxu1 %v10191_v9  ;;  %9663 = vmatprep.mubr.msk.f32.mxu0 %vm563_vm0, %v398_v53  ;;  %13589 = vst [vmem:[#allocation31_spill] sm:$0xff] %v13003_v34  ;;  %v5238_v9 = vmax.f32 %v9899_v19, 0.0  ;;  %v5237_v53 = vmax.f32 %v4710_v11, 0.0  ;;  %v5240_v37 = vmax.f32 %v9902_v22, 0.0  ;;  %v4720_v24 = vpop.f32.mrb[123].mxu1 }
 0x2cc   :  { %10194 = vmatpush3.bf16.msra.mxu1 %v12898_v51  ;;  %13590 = vst [vmem:[#allocation32_spill] sm:$0xff] %v13009_v25  ;;  %v5239_v40 = vmax.f32 %v4720_v24, 0.0  ;;  %v8520_v0 = vpop.f32.mrb[124].mxu1 }
 0x2cd   :  { %v10195_v21 = vpack.c.bf16 %v4974_v26, %v4973_v44  ;;  %v9506_v48 = vpop.f32.mrb[246].mxu0  ;;  %v13016_v47 = vpack.c.bf16 %v5238_v9, %v5237_v53  ;;  %v8521_v19 = vpop.f32.mrb[125].mxu1  ;;  %v402_v26 = vld [vmem:[%s13551_s0 + $0xb20] sm:$0xff] }
 0x2ce   :  { %v4976_v4 = vmax.f32 %v9506_v48, 0.0  ;;  %v3400_v6 = vpop.f32.mrb[247].mxu0  ;;  %9664 = vmatmul.mubr.msk.f32.gmra.mrb[96].mxu0 %vm563_vm0, %v399_v62  ;;  %v13022_v44 = vpack.c.bf16 %v5240_v37, %v5239_v40  ;;  %v8523_v62 = vpop.f32.mrb[126].mxu1  ;;  %v8522_v22 = vadd.f32 %v8521_v19, %v8520_v0 }
 0x2cf   :  { %v4975_v51 = vmax.f32 %v3400_v6, 0.0  ;;  %10196 = vmatprep.subr.bf16.mxu1 %v10195_v21  ;;  %9666 = vmatprep.mubr.msk.f32.mxu0 %vm563_vm0, %v400_v23  ;;  %13591 = vst [vmem:[#allocation33_spill] sm:$0xff] %v13016_v47  ;;  %v8524_v23 = vpop.f32.mrb[127].mxu1 }
 0x2d0   :  { %10198 = vmatpush3.bf16.msra.mxu1 %v12913_v63  ;;  %13592 = vst [vmem:[#allocation34_spill] sm:$0xff] %v13022_v44  ;;  %v8525_v9 = vadd.f32 %v8524_v23, %v8523_v62  ;;  %v8558_v53 = vpop.f32.mrb[128].mxu1  ;;  %v403_v63 = vld [vmem:[%s13551_s0 + $0xb28] sm:$0xff] }
 0x2d1   :  { %v10199_v6 = vpack.c.bf16 %v4976_v4, %v4975_v51  ;;  %v9509_v11 = vpop.f32.mrb[248].mxu0  ;;  %v8559_v37 = vpop.f32.mrb[129].mxu1  ;;  %v404_v4 = vld [vmem:[%s13551_s0 + $0xb30] sm:$0xff] }
 0x2d2   :  { %v4978_v21 = vmax.f32 %v9509_v11, 0.0  ;;  %v3410_v48 = vpop.f32.mrb[249].mxu0  ;;  %9667 = vmatmul.mubr.msk.f32.gmra.mrb[98].mxu0 %vm563_vm0, %v401_v58  ;;  %v8561_v40 = vpop.f32.mrb[130].mxu1  ;;  %v8560_v58 = vadd.f32 %v8559_v37, %v8558_v53 }
 0x2d3   :  { %v4977_v24 = vmax.f32 %v3410_v48, 0.0  ;;  %10200 = vmatprep.subr.bf16.mxu1 %v10199_v6  ;;  %9669 = vmatprep.mubr.msk.f32.mxu0 %vm563_vm0, %v402_v26  ;;  %v8562_v19 = vpop.f32.mrb[131].mxu1 }
 0x2d4   :  { %10202 = vmatpush3.bf16.msra.mxu1 %v12925_v5  ;;  %v8563_v26 = vadd.f32 %v8562_v19, %v8561_v40  ;;  %v8596_v11 = vpop.f32.mrb[132].mxu1  ;;  %v405_v5 = vld [vmem:[%s13551_s0 + $0xb38] sm:$0xff]  ;;  %v5447_v48 = vadd.f32 %v8560_v58, %v8522_v22 }
 0x2d5   :  { %v10203_v0 = vpack.c.bf16 %v4978_v21, %v4977_v24  ;;  %v9512_v51 = vpop.f32.mrb[250].mxu0  ;;  %v8597_v44 = vpop.f32.mrb[133].mxu1  ;;  %v406_v21 = vld [vmem:[%s13551_s0 + $0xb40] sm:$0xff] }
 0x2d6   :  { %v4980_v62 = vmax.f32 %v9512_v51, 0.0  ;;  %v3420_v6 = vpop.f32.mrb[251].mxu0  ;;  %9670 = vmatmul.mubr.msk.f32.gmra.mrb[100].mxu0 %vm563_vm0, %v403_v63  ;;  %v5452_v53 = vadd.f32 %v8563_v26, %v8525_v9  ;;  %v8599_v24 = vpop.f32.mrb[134].mxu1  ;;  %v8598_v40 = vadd.f32 %v8597_v44, %v8596_v11  ;;  %v408_v44 = vld [vmem:[%s13551_s0 + $0xb50] sm:$0xff] }
 0x2d7   :  { %v4979_v23 = vmax.f32 %v3420_v6, 0.0  ;;  %10204 = vmatprep.subr.bf16.mxu1 %v10203_v0  ;;  %9672 = vmatprep.mubr.msk.f32.mxu0 %vm563_vm0, %v404_v4  ;;  %v8600_v0 = vpop.f32.mrb[135].mxu1 }
 0x2d8   :  { %10206 = vmatpush3.bf16.msra.mxu1 %v12937_v50  ;;  %v8601_v19 = vadd.f32 %v8600_v0, %v8599_v24  ;;  %v8634_v6 = vpop.f32.mrb[136].mxu1  ;;  %v407_v50 = vld [vmem:[%s13551_s0 + $0xb48] sm:$0xff]  ;;  %v5522_v9 = vadd.f32 %v8598_v40, %v5447_v48 }
 0x2d9   :  { %v10207_v63 = vpack.c.bf16 %v4980_v62, %v4979_v23  ;;  %v9515_v37 = vpop.f32.mrb[252].mxu0  ;;  %v8635_v58 = vpop.f32.mrb[137].mxu1 }
 0x2da   :  { %v4982_v51 = vmax.f32 %v9515_v37, 0.0  ;;  %v3430_v4 = vpop.f32.mrb[253].mxu0  ;;  %9673 = vmatmul.mubr.msk.f32.gmra.mrb[102].mxu0 %vm563_vm0, %v405_v5  ;;  %v5527_v62 = vadd.f32 %v8601_v19, %v5452_v53  ;;  %v8637_v26 = vpop.f32.mrb[138].mxu1  ;;  %v8636_v5 = vadd.f32 %v8635_v58, %v8634_v6  ;;  %v410_v53 = vld [vmem:[%s13551_s0 + $0xb60] sm:$0xff] }
 0x2db   :  { %v4981_v22 = vmax.f32 %v3430_v4, 0.0  ;;  %10208 = vmatprep.subr.bf16.mxu1 %v10207_v63  ;;  %9675 = vmatprep.mubr.msk.f32.mxu0 %vm563_vm0, %v406_v21  ;;  %v8638_v24 = vpop.f32.mrb[139].mxu1 }
 0x2dc   :  { %10210 = vmatpush3.bf16.msra.mxu1 %v12949_v31  ;;  %v8639_v37 = vadd.f32 %v8638_v24, %v8637_v26  ;;  %v409_v31 = vld [vmem:[%s13551_s0 + $0xb58] sm:$0xff]  ;;  %v13056_v48 = vadd.f32 %v8636_v5, %v5522_v9  ;;  %v412_v9 = vld [vmem:[%s13551_s0 + $0xb70] sm:$0xff]  ;;  %v414_v24 = vld [vmem:[%s13551_s0 + $0xb80] sm:$0xff] }
 0x2dd   :  { %v10211_v11 = vpack.c.bf16 %v4982_v51, %v4981_v22  ;;  %v9518_v23 = vpop.f32.mrb[254].mxu0  ;;  %v5287_v5 = vld [vmem:[%s13553_s2 + $0x170] sm:$0xff] }
 0x2de   :  { %v4984_v63 = vmax.f32 %v9518_v23, 0.0  ;;  %v3440_v21 = vpop.f32.mrb[255].mxu0  ;;  %9676 = vmatmul.mubr.msk.f32.gmra.mrb[104].mxu0 %vm563_vm0, %v407_v50  ;;  %v13062_v40 = vadd.f32 %v8639_v37, %v5527_v62  ;;  %v5255_v50 = vld [vmem:[%s13553_s2 + $0x70] sm:$0xff]  ;;  %v5288_v62 = vld [vmem:[%s13553_s2 + $0x178] sm:$0xff]  ;;  %v5258_v37 = vld [vmem:[%s13553_s2 + $0x88] sm:$0xff] }
 0x2df   :  { %v4983_v0 = vmax.f32 %v3440_v21, 0.0  ;;  %10212 = vmatprep.subr.bf16.mxu1 %v10211_v11  ;;  %9678 = vmatprep.mubr.msk.f32.mxu0 %vm563_vm0, %v408_v44  ;;  %v413_v23 = vld [vmem:[%s13551_s0 + $0xb78] sm:$0xff] }
 0x2e0   :  { %10214 = vmatpush3.bf16.msra.mxu1 %v12961_v60  ;;  %v411_v60 = vld [vmem:[%s13551_s0 + $0xb68] sm:$0xff] }
 0x2e1   :  { %v10215_v51 = vpack.c.bf16 %v4984_v63, %v4983_v0  ;;  %v9521_v4 = vpop.f32.mrb[0].mxu0 }
 0x2e2   :  { %v4986_v19 = vmax.f32 %v9521_v4, 0.0  ;;  %v3450_v6 = vpop.f32.mrb[1].mxu0  ;;  %9679 = vmatmul.mubr.msk.f32.gmra.mrb[106].mxu0 %vm563_vm0, %v409_v31  ;;  %v416_v4 = vld [vmem:[%s13551_s0 + $0xb90] sm:$0xff] }
 0x2e3   :  { %v4985_v22 = vmax.f32 %v3450_v6, 0.0  ;;  %10216 = vmatprep.subr.bf16.mxu1 %v10215_v51  ;;  %9681 = vmatprep.mubr.msk.f32.mxu0 %vm563_vm0, %v410_v53  ;;  %v415_v51 = vld [vmem:[%s13551_s0 + $0xb88] sm:$0xff] }
 0x2e4   :  { %10218 = vmatpush3.bf16.msra.mxu1 %v12973_v45 }
 0x2e5   :  { %v13076_v58 = vpack.c.bf16 %v4986_v19, %v4985_v22  ;;  %v9524_v44 = vpop.f32.mrb[2].mxu0 }
 0x2e6   :  { %v4988_v26 = vmax.f32 %v9524_v44, 0.0  ;;  %v3460_v11 = vpop.f32.mrb[3].mxu0  ;;  %9682 = vmatmul.mubr.msk.f32.gmra.mrb[108].mxu0 %vm563_vm0, %v411_v60  ;;  %v418_v44 = vld [vmem:[%s13551_s0 + $0xba0] sm:$0xff] }
 0x2e7   :  { %v4987_v45 = vmax.f32 %v3460_v11, 0.0  ;;  %5895 = vmatmul.mubr.f32.vlgmr.msra.gmra.mrb[152].mxu1 %v5255_v50  ;;  %9684 = vmatprep.mubr.msk.f32.mxu0 %vm563_vm0, %v412_v9  ;;  %v417_v9 = vld [vmem:[%s13551_s0 + $0xb98] sm:$0xff] }
 0x2e8   :  { %5899 = vmatprep.mubr.f32.mxu1 %v5288_v62 }
 0x2e9   :  { %v13092_v63 = vpack.c.bf16 %v4988_v26, %v4987_v45  ;;  %v9527_v21 = vpop.f32.mrb[4].mxu0 }
 0x2ea   :  { %v4990_v0 = vmax.f32 %v9527_v21, 0.0  ;;  %v3470_v31 = vpop.f32.mrb[5].mxu0  ;;  %9685 = vmatmul.mubr.msk.f32.gmra.mrb[110].mxu0 %vm563_vm0, %v413_v23 }
 0x2eb   :  { %v4989_v53 = vmax.f32 %v3470_v31, 0.0  ;;  %5900 = vmatmul.mubr.f32.gmra.mrb[154].mxu1 %v5287_v5  ;;  %9687 = vmatprep.mubr.msk.f32.mxu0 %vm563_vm0, %v414_v24  ;;  %v419_v5 = vld [vmem:[%s13551_s0 + $0xba8] sm:$0xff]  ;;  %v420_v24 = vld [vmem:[%s13551_s0 + $0xbb0] sm:$0xff] }
 0x2ec   :  { %5969 = vmatprep.mubr.f32.mxu1 %v5258_v37 }
 0x2ed   :  { %v13105_v19 = vpack.c.bf16 %v4990_v0, %v4989_v53  ;;  %v9530_v6 = vpop.f32.mrb[6].mxu0 }
 0x2ee   :  { %v4992_v22 = vmax.f32 %v9530_v6, 0.0  ;;  %v3480_v60 = vpop.f32.mrb[7].mxu0  ;;  %9688 = vmatmul.mubr.msk.f32.gmra.mrb[112].mxu0 %vm563_vm0, %v415_v51  ;;  %v421_v51 = vld [vmem:[%s13551_s0 + $0xbb8] sm:$0xff] }
 0x2ef   :  { %v4991_v50 = vmax.f32 %v3480_v60, 0.0  ;;  %9690 = vmatprep.mubr.msk.f32.mxu0 %vm563_vm0, %v416_v4  ;;  %v422_v4 = vld [vmem:[%s13551_s0 + $0xbc0] sm:$0xff] }
 0x2f1   :  { %v13115_v62 = vpack.c.bf16 %v4992_v22, %v4991_v50  ;;  %v9533_v26 = vpop.f32.mrb[8].mxu0 }
 0x2f2   :  { %v4994_v11 = vmax.f32 %v9533_v26, 0.0  ;;  %v3490_v45 = vpop.f32.mrb[9].mxu0  ;;  %9691 = vmatmul.mubr.msk.f32.gmra.mrb[114].mxu0 %vm563_vm0, %v417_v9  ;;  %v423_v26 = vld [vmem:[%s13551_s0 + $0xbc8] sm:$0xff] }
 0x2f3   :  { %v4993_v23 = vmax.f32 %v3490_v45, 0.0  ;;  %9693 = vmatprep.mubr.msk.f32.mxu0 %vm563_vm0, %v418_v44  ;;  %v424_v45 = vld [vmem:[%s13551_s0 + $0xbd0] sm:$0xff] }
 0x2f5   :  { %v13125_v21 = vpack.c.bf16 %v4994_v11, %v4993_v23  ;;  %v9536_v37 = vpop.f32.mrb[10].mxu0 }
 0x2f6   :  { %v4996_v0 = vmax.f32 %v9536_v37, 0.0  ;;  %v3500_v31 = vpop.f32.mrb[11].mxu0  ;;  %9694 = vmatmul.mubr.msk.f32.gmra.mrb[116].mxu0 %vm563_vm0, %v419_v5 }
 0x2f7   :  { %v4995_v53 = vmax.f32 %v3500_v31, 0.0  ;;  %9696 = vmatprep.mubr.msk.f32.mxu0 %vm563_vm0, %v420_v24 }
 0x2f9   :  { %v13135_v6 = vpack.c.bf16 %v4996_v0, %v4995_v53  ;;  %v9539_v22 = vpop.f32.mrb[12].mxu0 }
 0x2fa   :  { %v4998_v60 = vmax.f32 %v9539_v22, 0.0  ;;  %v3510_v50 = vpop.f32.mrb[13].mxu0  ;;  %9697 = vmatmul.mubr.msk.f32.gmra.mrb[118].mxu0 %vm563_vm0, %v421_v51  ;;  %v8672_v9 = vpop.f32.mrb[140].mxu1 }
 0x2fb   :  { %v4997_v44 = vmax.f32 %v3510_v50, 0.0  ;;  %9699 = vmatprep.mubr.msk.f32.mxu0 %vm563_vm0, %v422_v4  ;;  %v8673_v11 = vpop.f32.mrb[141].mxu1  ;;  %v425_v4 = vld [vmem:[%s13551_s0 + $0xbd8] sm:$0xff] }
 0x2fc   :  { %v8674_v23 = vadd.f32 %v8673_v11, %v8672_v9 }
 0x2fd   :  { %v13145_v5 = vpack.c.bf16 %v4998_v60, %v4997_v44  ;;  %v9542_v24 = vpop.f32.mrb[14].mxu0  ;;  %v426_v60 = vld [vmem:[%s13551_s0 + $0xbe0] sm:$0xff] }
 0x2fe   :  { %v5000_v37 = vmax.f32 %v9542_v24, 0.0  ;;  %v3520_v0 = vpop.f32.mrb[15].mxu0  ;;  %9700 = vmatmul.mubr.msk.f32.gmra.mrb[120].mxu0 %vm563_vm0, %v423_v26  ;;  %v13149_v31 = vadd.f32 %v8674_v23, %v13056_v48  ;;  %v8675_v53 = vpop.f32.mrb[142].mxu1  ;;  %v427_v23 = vld [vmem:[%s13551_s0 + $0xbe8] sm:$0xff]  ;;  %v428_v24 = vld [vmem:[%s13551_s0 + $0xbf0] sm:$0xff] }
 0x2ff   :  { %v4999_v51 = vmax.f32 %v3520_v0, 0.0  ;;  %9702 = vmatprep.mubr.msk.f32.mxu0 %vm563_vm0, %v424_v45  ;;  %v8676_v22 = vpop.f32.mrb[143].mxu1 }
 0x300   :  { %v8677_v50 = vadd.f32 %v8676_v22, %v8675_v53  ;;  %v430_v22 = vld [vmem:[%s13551_s0 + $0xc00] sm:$0xff] }
 0x301   :  { %v13158_v9 = vpack.c.bf16 %v5000_v37, %v4999_v51  ;;  %v9545_v44 = vpop.f32.mrb[16].mxu0 }
 0x302   :  { %v5002_v26 = vmax.f32 %v9545_v44, 0.0  ;;  %v3530_v48 = vpop.f32.mrb[17].mxu0  ;;  %9703 = vmatmul.mubr.msk.f32.gmra.mrb[122].mxu0 %vm563_vm0, %v425_v4  ;;  %v13162_v11 = vadd.f32 %v8677_v50, %v13062_v40  ;;  %v429_v40 = vld [vmem:[%s13551_s0 + $0xbf8] sm:$0xff] }
 0x303   :  { %v5001_v45 = vmax.f32 %v3530_v48, 0.0  ;;  %9705 = vmatprep.mubr.msk.f32.mxu0 %vm563_vm0, %v426_v60 }
 0x305   :  { %v10219_v37 = vpack.c.bf16 %v5002_v26, %v5001_v45  ;;  %v9548_v0 = vpop.f32.mrb[18].mxu0  ;;  %v431_v45 = vld [vmem:[%s13551_s0 + $0xc08] sm:$0xff] }
 0x306   :  { %v5004_v53 = vmax.f32 %v9548_v0, 0.0  ;;  %v3540_v51 = vpop.f32.mrb[19].mxu0  ;;  %9706 = vmatmul.mubr.msk.f32.gmra.mrb[124].mxu0 %vm563_vm0, %v427_v23 }
 0x307   :  { %v5003_v4 = vmax.f32 %v3540_v51, 0.0  ;;  %10220 = vmatprep.subr.bf16.mxu1 %v10219_v37  ;;  %9708 = vmatprep.mubr.msk.f32.mxu0 %vm563_vm0, %v428_v24  ;;  %v433_v51 = vld [vmem:[%s13551_s0 + $0xc18] sm:$0xff] }
 0x308   :  { %10222 = vmatpush3.bf16.msra.mxu1 %v13076_v58  ;;  %v432_v58 = vld [vmem:[%s13551_s0 + $0xc10] sm:$0xff] }
 0x309   :  { %v10223_v60 = vpack.c.bf16 %v5004_v53, %v5003_v4  ;;  %v9551_v50 = vpop.f32.mrb[20].mxu0 }
 0x30a   :  { %v5006_v44 = vmax.f32 %v9551_v50, 0.0  ;;  %v3550_v26 = vpop.f32.mrb[21].mxu0  ;;  %9709 = vmatmul.mubr.msk.f32.gmra.mrb[126].mxu0 %vm563_vm0, %v429_v40 }
 0x30b   :  { %v5005_v48 = vmax.f32 %v3550_v26, 0.0  ;;  %10224 = vmatprep.subr.bf16.mxu1 %v10223_v60  ;;  %9711 = vmatprep.mubr.msk.f32.mxu0 %vm563_vm0, %v430_v22 }
 0x30c   :  { %10226 = vmatpush3.bf16.msra.mxu1 %v13092_v63 }
 0x30d   :  { %v10227_v23 = vpack.c.bf16 %v5006_v44, %v5005_v48  ;;  %v9554_v24 = vpop.f32.mrb[22].mxu0 }
 0x30e   :  { %v5008_v37 = vmax.f32 %v9554_v24, 0.0  ;;  %v3560_v0 = vpop.f32.mrb[23].mxu0  ;;  %9712 = vmatmul.mubr.msk.f32.gmra.mrb[128].mxu0 %vm563_vm0, %v431_v45 }
 0x30f   :  { %v5007_v53 = vmax.f32 %v3560_v0, 0.0  ;;  %10228 = vmatprep.subr.bf16.mxu1 %v10227_v23  ;;  %9714 = vmatprep.mubr.msk.f32.mxu0 %vm563_vm0, %v432_v58 }
 0x310   :  { %10230 = vmatpush3.bf16.msra.mxu1 %v13105_v19 }
 0x311   :  { %v10231_v63 = vpack.c.bf16 %v5008_v37, %v5007_v53  ;;  %v9557_v4 = vpop.f32.mrb[24].mxu0 }
 0x312   :  { %v5010_v40 = vmax.f32 %v9557_v4, 0.0  ;;  %v3570_v22 = vpop.f32.mrb[25].mxu0  ;;  %9715 = vmatmul.mubr.msk.f32.gmra.mrb[130].mxu0 %vm563_vm0, %v433_v51 }
 0x313   :  { %v5009_v60 = vmax.f32 %v3570_v22, 0.0  ;;  %10232 = vmatprep.subr.bf16.mxu1 %v10231_v63 }
 0x314   :  { %10234 = vmatpush3.bf16.msra.mxu1 %v13115_v62 }
 0x315   :  { %v10235_v50 = vpack.c.bf16 %v5010_v40, %v5009_v60  ;;  %v9560_v44 = vpop.f32.mrb[26].mxu0 }
 0x316   :  { %v5012_v26 = vmax.f32 %v9560_v44, 0.0  ;;  %v3580_v48 = vpop.f32.mrb[27].mxu0 }
 0x317   :  { %v5011_v45 = vmax.f32 %v3580_v48, 0.0  ;;  %10236 = vmatprep.subr.bf16.mxu1 %v10235_v50 }
 0x318   :  { %10238 = vmatpush3.bf16.msra.mxu1 %v13125_v21 }
 0x319   :  { %v10239_v58 = vpack.c.bf16 %v5012_v26, %v5011_v45  ;;  %v9563_v19 = vpop.f32.mrb[28].mxu0  ;;  %v5290_v26 = vld [vmem:[%s13553_s2 + $0x188] sm:$0xff] }
 0x31a   :  { %v5014_v23 = vmax.f32 %v9563_v19, 0.0  ;;  %v3590_v24 = vpop.f32.mrb[29].mxu0 }
 0x31b   :  { %v5013_v37 = vmax.f32 %v3590_v24, 0.0  ;;  %10240 = vmatprep.subr.bf16.mxu1 %v10239_v58  ;;  %v5289_v58 = vld [vmem:[%s13553_s2 + $0x180] sm:$0xff] }
 0x31c   :  { %10242 = vmatpush3.bf16.msra.mxu1 %v13135_v6  ;;  %v5257_v6 = vld [vmem:[%s13553_s2 + $0x80] sm:$0xff] }
 0x31d   :  { %v10243_v0 = vpack.c.bf16 %v5014_v23, %v5013_v37  ;;  %v9566_v53 = vpop.f32.mrb[30].mxu0  ;;  %v5260_v23 = vld [vmem:[%s13553_s2 + $0x98] sm:$0xff] }
 0x31e   :  { %v5016_v51 = vmax.f32 %v9566_v53, 0.0  ;;  %v3600_v62 = vpop.f32.mrb[31].mxu0 }
 0x31f   :  { %v5015_v63 = vmax.f32 %v3600_v62, 0.0  ;;  %10244 = vmatprep.subr.bf16.mxu1 %v10243_v0 }
 0x320   :  { %10246 = vmatpush3.bf16.msra.mxu1 %v13145_v5 }
 0x321   :  { %v10247_v4 = vpack.c.bf16 %v5016_v51, %v5015_v63  ;;  %v9569_v40 = vpop.f32.mrb[32].mxu0 }
 0x322   :  { %v5018_v22 = vmax.f32 %v9569_v40, 0.0  ;;  %v3610_v21 = vpop.f32.mrb[33].mxu0 }
 0x323   :  { %v5017_v60 = vmax.f32 %v3610_v21, 0.0  ;;  %10248 = vmatprep.subr.bf16.mxu1 %v10247_v4 }
 0x324   :  { %10250 = vmatpush3.bf16.msra.mxu1 %v13158_v9 }
 0x325   :  { %v10253_v50 = vpack.c.bf16 %v5018_v22, %v5017_v60  ;;  %v9572_v44 = vpop.f32.mrb[34].mxu0 }
 0x326   :  { %v5020_v48 = vmax.f32 %v9572_v44, 0.0  ;;  %v3620_v5 = vpop.f32.mrb[35].mxu0 }
 0x327   :  { %v5019_v45 = vmax.f32 %v3620_v5, 0.0  ;;  %5970 = vmatmul.mubr.f32.vlgmr.msra.gmra.mrb[156].mxu1 %v5257_v6 }
 0x328   :  { %5974 = vmatprep.mubr.f32.mxu1 %v5290_v26 }
 0x329   :  { %v10257_v9 = vpack.c.bf16 %v5020_v48, %v5019_v45  ;;  %v9575_v19 = vpop.f32.mrb[36].mxu0 }
 0x32a   :  { %v5022_v24 = vmax.f32 %v9575_v19, 0.0  ;;  %v3630_v37 = vpop.f32.mrb[37].mxu0 }
 0x32b   :  { %v5021_v0 = vmax.f32 %v3630_v37, 0.0  ;;  %5975 = vmatmul.mubr.f32.gmra.mrb[158].mxu1 %v5289_v58 }
 0x32c   :  { %6044 = vmatprep.mubr.f32.mxu1 %v5260_v23 }
 0x32d   :  { %v10261_v53 = vpack.c.bf16 %v5022_v24, %v5021_v0  ;;  %v9578_v51 = vpop.f32.mrb[38].mxu0 }
 0x32e   :  { %v5024_v62 = vmax.f32 %v9578_v51, 0.0  ;;  %v3640_v63 = vpop.f32.mrb[39].mxu0 }
 0x32f   :  { %v5023_v4 = vmax.f32 %v3640_v63, 0.0 }
 0x331   :  { %v10265_v40 = vpack.c.bf16 %v5024_v62, %v5023_v4  ;;  %v9581_v22 = vpop.f32.mrb[40].mxu0 }
 0x332   :  { %v5026_v21 = vmax.f32 %v9581_v22, 0.0  ;;  %v3650_v60 = vpop.f32.mrb[41].mxu0 }
 0x333   :  { %v5025_v6 = vmax.f32 %v3650_v60, 0.0 }
 0x335   :  { %v10269_v44 = vpack.c.bf16 %v5026_v21, %v5025_v6  ;;  %v9584_v26 = vpop.f32.mrb[42].mxu0 }
 0x336   :  { %v5028_v48 = vmax.f32 %v9584_v26, 0.0  ;;  %v3660_v5 = vpop.f32.mrb[43].mxu0 }
 0x337   :  { %v5027_v45 = vmax.f32 %v3660_v5, 0.0 }
 0x339   :  { %v13213_v19 = vpack.c.bf16 %v5028_v48, %v5027_v45  ;;  %v9587_v37 = vpop.f32.mrb[44].mxu0 }
 0x33a   :  { %v5030_v58 = vmax.f32 %v9587_v37, 0.0  ;;  %v3670_v23 = vpop.f32.mrb[45].mxu0  ;;  %v8710_v24 = vpop.f32.mrb[144].mxu1 }
 0x33b   :  { %v5029_v0 = vmax.f32 %v3670_v23, 0.0  ;;  %v8711_v51 = vpop.f32.mrb[145].mxu1 }
 0x33c   :  { %v8712_v47 = vadd.f32 %v8711_v51, %v8710_v24 }
 0x33d   :  { %v10277_v63 = vpack.c.bf16 %v5030_v58, %v5029_v0  ;;  %v9590_v62 = vpop.f32.mrb[46].mxu0 }
 0x33e   :  { %v5032_v4 = vmax.f32 %v9590_v62, 0.0  ;;  %v3680_v22 = vpop.f32.mrb[47].mxu0  ;;  %v13216_v60 = vadd.f32 %v8712_v47, %v13149_v31  ;;  %v8713_v21 = vpop.f32.mrb[146].mxu1 }
 0x33f   :  { %v5031_v6 = vmax.f32 %v3680_v22, 0.0  ;;  %v8714_v26 = vpop.f32.mrb[147].mxu1 }
 0x340   :  { %v8715_v5 = vadd.f32 %v8714_v26, %v8713_v21 }
 0x341   :  { %v10281_v48 = vpack.c.bf16 %v5032_v4, %v5031_v6  ;;  %v9593_v45 = vpop.f32.mrb[48].mxu0 }
 0x342   :  { %v5034_v25 = vmax.f32 %v9593_v45, 0.0  ;;  %v3690_v37 = vpop.f32.mrb[49].mxu0  ;;  %v13219_v34 = vadd.f32 %v8715_v5, %v13162_v11 }
 0x343   :  { %v5033_v23 = vmax.f32 %v3690_v37, 0.0 }
 0x345   :  { %v10251_v24 = vpack.c.bf16 %v5034_v25, %v5033_v23  ;;  %v9596_v58 = vpop.f32.mrb[50].mxu0 }
 0x346   :  { %v5036_v0 = vmax.f32 %v9596_v58, 0.0  ;;  %v3700_v51 = vpop.f32.mrb[51].mxu0 }
 0x347   :  { %v5035_v62 = vmax.f32 %v3700_v51, 0.0  ;;  %10252 = vmatprep.subr.bf16.mxu1 %v10251_v24 }
 0x348   :  { %10254 = vmatpush3.bf16.msra.mxu1 %v10253_v50 }
 0x349   :  { %v10255_v47 = vpack.c.bf16 %v5036_v0, %v5035_v62  ;;  %v9599_v31 = vpop.f32.mrb[52].mxu0 }
 0x34a   :  { %v5038_v22 = vmax.f32 %v9599_v31, 0.0  ;;  %v3710_v38 = vpop.f32.mrb[53].mxu0 }
 0x34b   :  { %v5037_v21 = vmax.f32 %v3710_v38, 0.0  ;;  %10256 = vmatprep.subr.bf16.mxu1 %v10255_v47 }
 0x34c   :  { %10258 = vmatpush3.bf16.msra.mxu1 %v10257_v9 }
 0x34d   :  { %v10259_v4 = vpack.c.bf16 %v5038_v22, %v5037_v21  ;;  %v9602_v6 = vpop.f32.mrb[54].mxu0 }
 0x34e   :  { %v5040_v26 = vmax.f32 %v9602_v6, 0.0  ;;  %v3720_v11 = vpop.f32.mrb[55].mxu0 }
 0x34f   :  { %v5039_v5 = vmax.f32 %v3720_v11, 0.0  ;;  %10260 = vmatprep.subr.bf16.mxu1 %v10259_v4 }
 0x350   :  { %10262 = vmatpush3.bf16.msra.mxu1 %v10261_v53 }
 0x351   :  { %v10263_v25 = vpack.c.bf16 %v5040_v26, %v5039_v5  ;;  %v9605_v45 = vpop.f32.mrb[56].mxu0 }
 0x352   :  { %v5042_v37 = vmax.f32 %v9605_v45, 0.0  ;;  %v3730_v23 = vpop.f32.mrb[57].mxu0  ;;  %v5259_v45 = vld [vmem:[%s13553_s2 + $0x90] sm:$0xff] }
 0x353   :  { %v5041_v24 = vmax.f32 %v3730_v23, 0.0  ;;  %10264 = vmatprep.subr.bf16.mxu1 %v10263_v25  ;;  %v5292_v23 = vld [vmem:[%s13553_s2 + $0x198] sm:$0xff] }
 0x354   :  { %10266 = vmatpush3.bf16.msra.mxu1 %v10265_v40 }
 0x355   :  { %v10267_v50 = vpack.c.bf16 %v5042_v37, %v5041_v24  ;;  %v9608_v58 = vpop.f32.mrb[58].mxu0 }
 0x356   :  { %v5044_v0 = vmax.f32 %v9608_v58, 0.0  ;;  %v3740_v38 = vpop.f32.mrb[59].mxu0  ;;  %v5291_v58 = vld [vmem:[%s13553_s2 + $0x190] sm:$0xff] }
 0x357   :  { %v5043_v51 = vmax.f32 %v3740_v38, 0.0  ;;  %10268 = vmatprep.subr.bf16.mxu1 %v10267_v50  ;;  %v5262_v38 = vld [vmem:[%s13553_s2 + $0xa8] sm:$0xff] }
 0x358   :  { %10270 = vmatpush3.bf16.msra.mxu1 %v10269_v44 }
 0x359   :  { %v10271_v9 = vpack.c.bf16 %v5044_v0, %v5043_v51  ;;  %v9611_v62 = vpop.f32.mrb[60].mxu0 }
 0x35a   :  { %v5046_v47 = vmax.f32 %v9611_v62, 0.0  ;;  %v3750_v31 = vpop.f32.mrb[61].mxu0 }
 0x35b   :  { %v5045_v22 = vmax.f32 %v3750_v31, 0.0  ;;  %10272 = vmatprep.subr.bf16.mxu1 %v10271_v9 }
 0x35c   :  { %10274 = vmatpush3.bf16.msra.mxu1 %v13213_v19 }
 0x35d   :  { %v10275_v53 = vpack.c.bf16 %v5046_v47, %v5045_v22  ;;  %v9614_v21 = vpop.f32.mrb[62].mxu0 }
 0x35e   :  { %v5048_v4 = vmax.f32 %v9614_v21, 0.0  ;;  %v3760_v6 = vpop.f32.mrb[63].mxu0 }
 0x35f   :  { %v5047_v40 = vmax.f32 %v3760_v6, 0.0  ;;  %10276 = vmatprep.subr.bf16.mxu1 %v10275_v53 }
 0x360   :  { %10278 = vmatpush3.bf16.msra.mxu1 %v10277_v63 }
 0x361   :  { %v10279_v26 = vpack.c.bf16 %v5048_v4, %v5047_v40  ;;  %v9617_v11 = vpop.f32.mrb[64].mxu0 }
 0x362   :  { %v5050_v5 = vmax.f32 %v9617_v11, 0.0  ;;  %v3770_v25 = vpop.f32.mrb[65].mxu0 }
 0x363   :  { %v5049_v44 = vmax.f32 %v3770_v25, 0.0  ;;  %10280 = vmatprep.subr.bf16.mxu1 %v10279_v26 }
 0x364   :  { %10282 = vmatpush3.bf16.msra.mxu1 %v10281_v48 }
 0x365   :  { %v10285_v37 = vpack.c.bf16 %v5050_v5, %v5049_v44  ;;  %v9620_v19 = vpop.f32.mrb[66].mxu0 }
 0x366   :  { %v5052_v24 = vmax.f32 %v9620_v19, 0.0  ;;  %v3780_v50 = vpop.f32.mrb[67].mxu0 }
 0x367   :  { %v5051_v63 = vmax.f32 %v3780_v50, 0.0  ;;  %6045 = vmatmul.mubr.f32.vlgmr.msra.gmra.mrb[160].mxu1 %v5259_v45 }
 0x368   :  { %6049 = vmatprep.mubr.f32.mxu1 %v5292_v23 }
 0x369   :  { %v10289_v48 = vpack.c.bf16 %v5052_v24, %v5051_v63  ;;  %v9623_v0 = vpop.f32.mrb[68].mxu0 }
 0x36a   :  { %v5054_v51 = vmax.f32 %v9623_v0, 0.0  ;;  %v3790_v9 = vpop.f32.mrb[69].mxu0 }
 0x36b   :  { %v5053_v62 = vmax.f32 %v3790_v9, 0.0  ;;  %6050 = vmatmul.mubr.f32.gmra.mrb[162].mxu1 %v5291_v58 }
 0x36c   :  { %6119 = vmatprep.mubr.f32.mxu1 %v5262_v38 }
 0x36d   :  { %v10293_v47 = vpack.c.bf16 %v5054_v51, %v5053_v62  ;;  %v9626_v31 = vpop.f32.mrb[70].mxu0 }
 0x36e   :  { %v5056_v22 = vmax.f32 %v9626_v31, 0.0  ;;  %v3800_v53 = vpop.f32.mrb[71].mxu0 }
 0x36f   :  { %v5055_v21 = vmax.f32 %v3800_v53, 0.0 }
 0x371   :  { %v10297_v4 = vpack.c.bf16 %v5056_v22, %v5055_v21  ;;  %v9629_v6 = vpop.f32.mrb[72].mxu0 }
 0x372   :  { %v5058_v40 = vmax.f32 %v9629_v6, 0.0  ;;  %v3810_v26 = vpop.f32.mrb[73].mxu0 }
 0x373   :  { %v5057_v11 = vmax.f32 %v3810_v26, 0.0 }
 0x375   :  { %v10301_v5 = vpack.c.bf16 %v5058_v40, %v5057_v11  ;;  %v9632_v25 = vpop.f32.mrb[74].mxu0 }
 0x376   :  { %v5060_v44 = vmax.f32 %v9632_v25, 0.0  ;;  %v3820_v45 = vpop.f32.mrb[75].mxu0 }
 0x377   :  { %v5059_v19 = vmax.f32 %v3820_v45, 0.0 }
 0x379   :  { %v13234_v23 = vpack.c.bf16 %v5060_v44, %v5059_v19  ;;  %v9635_v24 = vpop.f32.mrb[76].mxu0 }
 0x37a   :  { %v5062_v50 = vmax.f32 %v9635_v24, 0.0  ;;  %v3830_v63 = vpop.f32.mrb[77].mxu0  ;;  %v8748_v58 = vpop.f32.mrb[148].mxu1 }
 0x37b   :  { %v5061_v0 = vmax.f32 %v3830_v63, 0.0  ;;  %v8749_v38 = vpop.f32.mrb[149].mxu1 }
 0x37c   :  { %v8750_v51 = vadd.f32 %v8749_v38, %v8748_v58 }
 0x37d   :  { %v10309_v9 = vpack.c.bf16 %v5062_v50, %v5061_v0  ;;  %v9638_v62 = vpop.f32.mrb[78].mxu0 }
 0x37e   :  { %v13237_v31 = vadd.f32 %v8750_v51, %v13216_v60  ;;  %v5064_v22 = vmax.f32 %v9638_v62, 0.0  ;;  %v3840_v53 = vpop.f32.mrb[79].mxu0  ;;  %v8751_v21 = vpop.f32.mrb[150].mxu1 }
 0x37f   :  { %v5063_v6 = vmax.f32 %v3840_v53, 0.0  ;;  %v8752_v40 = vpop.f32.mrb[151].mxu1 }
 0x380   :  { %v8753_v26 = vadd.f32 %v8752_v40, %v8751_v21 }
 0x381   :  { %v10313_v11 = vpack.c.bf16 %v5064_v22, %v5063_v6  ;;  %v9641_v25 = vpop.f32.mrb[80].mxu0 }
 0x382   :  { %v5066_v44 = vmax.f32 %v9641_v25, 0.0  ;;  %v13240_v45 = vadd.f32 %v8753_v26, %v13219_v34  ;;  %v3850_v19 = vpop.f32.mrb[81].mxu0 }
 0x383   :  { %v5065_v24 = vmax.f32 %v3850_v19, 0.0 }
 0x385   :  { %v10283_v63 = vpack.c.bf16 %v5066_v44, %v5065_v24  ;;  %v9644_v50 = vpop.f32.mrb[82].mxu0 }
 0x386   :  { %v5068_v58 = vmax.f32 %v9644_v50, 0.0  ;;  %v3860_v0 = vpop.f32.mrb[83].mxu0 }
 0x387   :  { %v5067_v60 = vmax.f32 %v3860_v0, 0.0  ;;  %10284 = vmatprep.subr.bf16.mxu1 %v10283_v63 }
 0x388   :  { %10286 = vmatpush3.bf16.msra.mxu1 %v10285_v37 }
 0x389   :  { %v10287_v38 = vpack.c.bf16 %v5068_v58, %v5067_v60  ;;  %v9647_v51 = vpop.f32.mrb[84].mxu0 }
 0x38a   :  { %v5070_v62 = vmax.f32 %v9647_v51, 0.0  ;;  %v3870_v53 = vpop.f32.mrb[85].mxu0 }
 0x38b   :  { %v5069_v21 = vmax.f32 %v3870_v53, 0.0  ;;  %10288 = vmatprep.subr.bf16.mxu1 %v10287_v38 }
 0x38c   :  { %10290 = vmatpush3.bf16.msra.mxu1 %v10289_v48 }
 0x38d   :  { %v10291_v22 = vpack.c.bf16 %v5070_v62, %v5069_v21  ;;  %v9650_v6 = vpop.f32.mrb[86].mxu0 }
 0x38e   :  { %v5072_v34 = vmax.f32 %v9650_v6, 0.0  ;;  %v3880_v40 = vpop.f32.mrb[87].mxu0 }
 0x38f   :  { %v5071_v26 = vmax.f32 %v3880_v40, 0.0  ;;  %10292 = vmatprep.subr.bf16.mxu1 %v10291_v22 }
 0x390   :  { %10294 = vmatpush3.bf16.msra.mxu1 %v10293_v47 }
 0x391   :  { %v10295_v25 = vpack.c.bf16 %v5072_v34, %v5071_v26  ;;  %v9653_v44 = vpop.f32.mrb[88].mxu0 }
 0x392   :  { %v5074_v19 = vmax.f32 %v9653_v44, 0.0  ;;  %v3890_v24 = vpop.f32.mrb[89].mxu0  ;;  %v5261_v44 = vld [vmem:[%s13553_s2 + $0xa0] sm:$0xff] }
 0x393   :  { %v5073_v63 = vmax.f32 %v3890_v24, 0.0  ;;  %10296 = vmatprep.subr.bf16.mxu1 %v10295_v25  ;;  %v5294_v24 = vld [vmem:[%s13553_s2 + $0x1a8] sm:$0xff] }
 0x394   :  { %10298 = vmatpush3.bf16.msra.mxu1 %v10297_v4 }
 0x395   :  { %v10299_v37 = vpack.c.bf16 %v5074_v19, %v5073_v63  ;;  %v9656_v50 = vpop.f32.mrb[90].mxu0 }
 0x396   :  { %v5076_v58 = vmax.f32 %v9656_v50, 0.0  ;;  %v3900_v0 = vpop.f32.mrb[91].mxu0  ;;  %v5293_v50 = vld [vmem:[%s13553_s2 + $0x1a0] sm:$0xff] }
 0x397   :  { %v5075_v60 = vmax.f32 %v3900_v0, 0.0  ;;  %10300 = vmatprep.subr.bf16.mxu1 %v10299_v37  ;;  %v5264_v0 = vld [vmem:[%s13553_s2 + $0xb8] sm:$0xff] }
 0x398   :  { %10302 = vmatpush3.bf16.msra.mxu1 %v10301_v5 }
 0x399   :  { %v10303_v48 = vpack.c.bf16 %v5076_v58, %v5075_v60  ;;  %v9659_v38 = vpop.f32.mrb[92].mxu0 }
 0x39a   :  { %v5078_v51 = vmax.f32 %v9659_v38, 0.0  ;;  %v3910_v62 = vpop.f32.mrb[93].mxu0 }
 0x39b   :  { %v5077_v53 = vmax.f32 %v3910_v62, 0.0  ;;  %10304 = vmatprep.subr.bf16.mxu1 %v10303_v48 }
 0x39c   :  { %10306 = vmatpush3.bf16.msra.mxu1 %v13234_v23 }
 0x39d   :  { %v10307_v47 = vpack.c.bf16 %v5078_v51, %v5077_v53  ;;  %v9662_v21 = vpop.f32.mrb[94].mxu0 }
 0x39e   :  { %v5080_v22 = vmax.f32 %v9662_v21, 0.0  ;;  %v3920_v6 = vpop.f32.mrb[95].mxu0 }
 0x39f   :  { %v5079_v4 = vmax.f32 %v3920_v6, 0.0  ;;  %10308 = vmatprep.subr.bf16.mxu1 %v10307_v47 }
 0x3a0   :  { %10310 = vmatpush3.bf16.msra.mxu1 %v10309_v9 }
 0x3a1   :  { %v10311_v34 = vpack.c.bf16 %v5080_v22, %v5079_v4  ;;  %v9665_v40 = vpop.f32.mrb[96].mxu0 }
 0x3a2   :  { %v5082_v26 = vmax.f32 %v9665_v40, 0.0  ;;  %v3930_v25 = vpop.f32.mrb[97].mxu0 }
 0x3a3   :  { %v5081_v5 = vmax.f32 %v3930_v25, 0.0  ;;  %10312 = vmatprep.subr.bf16.mxu1 %v10311_v34 }
 0x3a4   :  { %10314 = vmatpush3.bf16.msra.mxu1 %v10313_v11 }
 0x3a5   :  { %v10317_v19 = vpack.c.bf16 %v5082_v26, %v5081_v5  ;;  %v9668_v23 = vpop.f32.mrb[98].mxu0 }
 0x3a6   :  { %v5084_v63 = vmax.f32 %v9668_v23, 0.0  ;;  %v3940_v37 = vpop.f32.mrb[99].mxu0 }
 0x3a7   :  { %v5083_v9 = vmax.f32 %v3940_v37, 0.0  ;;  %6120 = vmatmul.mubr.f32.vlgmr.msra.gmra.mrb[164].mxu1 %v5261_v44 }
 0x3a8   :  { %6124 = vmatprep.mubr.f32.mxu1 %v5294_v24 }
 0x3a9   :  { %v10321_v11 = vpack.c.bf16 %v5084_v63, %v5083_v9  ;;  %v9671_v58 = vpop.f32.mrb[100].mxu0 }
 0x3aa   :  { %v5086_v60 = vmax.f32 %v9671_v58, 0.0  ;;  %v3950_v48 = vpop.f32.mrb[101].mxu0 }
 0x3ab   :  { %v5085_v38 = vmax.f32 %v3950_v48, 0.0  ;;  %6125 = vmatmul.mubr.f32.gmra.mrb[166].mxu1 %v5293_v50 }
 0x3ac   :  { %6194 = vmatprep.mubr.f32.mxu1 %v5264_v0 }
 0x3ad   :  { %v10325_v51 = vpack.c.bf16 %v5086_v60, %v5085_v38  ;;  %v9674_v62 = vpop.f32.mrb[102].mxu0 }
 0x3ae   :  { %v5088_v53 = vmax.f32 %v9674_v62, 0.0  ;;  %v3960_v47 = vpop.f32.mrb[103].mxu0 }
 0x3af   :  { %v5087_v21 = vmax.f32 %v3960_v47, 0.0 }
 0x3b1   :  { %v10329_v22 = vpack.c.bf16 %v5088_v53, %v5087_v21  ;;  %v9677_v6 = vpop.f32.mrb[104].mxu0 }
 0x3b2   :  { %v5090_v4 = vmax.f32 %v9677_v6, 0.0  ;;  %v3970_v34 = vpop.f32.mrb[105].mxu0 }
 0x3b3   :  { %v5089_v40 = vmax.f32 %v3970_v34, 0.0 }
 0x3b5   :  { %v10333_v26 = vpack.c.bf16 %v5090_v4, %v5089_v40  ;;  %v9680_v25 = vpop.f32.mrb[106].mxu0 }
 0x3b6   :  { %v5092_v5 = vmax.f32 %v9680_v25, 0.0  ;;  %v3980_v44 = vpop.f32.mrb[107].mxu0 }
 0x3b7   :  { %v5091_v23 = vmax.f32 %v3980_v44, 0.0 }
 0x3b9   :  { %v13255_v24 = vpack.c.bf16 %v5092_v5, %v5091_v23  ;;  %v9683_v63 = vpop.f32.mrb[108].mxu0 }
 0x3ba   :  { %v5094_v37 = vmax.f32 %v9683_v63, 0.0  ;;  %v3990_v9 = vpop.f32.mrb[109].mxu0  ;;  %v8786_v50 = vpop.f32.mrb[152].mxu1 }
 0x3bb   :  { %v5093_v58 = vmax.f32 %v3990_v9, 0.0  ;;  %v8787_v0 = vpop.f32.mrb[153].mxu1 }
 0x3bc   :  { %v8788_v60 = vadd.f32 %v8787_v0, %v8786_v50 }
 0x3bd   :  { %v10341_v48 = vpack.c.bf16 %v5094_v37, %v5093_v58  ;;  %v9686_v38 = vpop.f32.mrb[110].mxu0 }
 0x3be   :  { %v13258_v62 = vadd.f32 %v8788_v60, %v13237_v31  ;;  %v5096_v53 = vmax.f32 %v9686_v38, 0.0  ;;  %v4000_v47 = vpop.f32.mrb[111].mxu0  ;;  %v8789_v21 = vpop.f32.mrb[154].mxu1 }
 0x3bf   :  { %v5095_v6 = vmax.f32 %v4000_v47, 0.0  ;;  %v8790_v4 = vpop.f32.mrb[155].mxu1 }
 0x3c0   :  { %v8791_v34 = vadd.f32 %v8790_v4, %v8789_v21 }
 0x3c1   :  { %v10345_v40 = vpack.c.bf16 %v5096_v53, %v5095_v6  ;;  %v9689_v25 = vpop.f32.mrb[112].mxu0 }
 0x3c2   :  { %v13261_v5 = vadd.f32 %v8791_v34, %v13240_v45  ;;  %v5098_v44 = vmax.f32 %v9689_v25, 0.0  ;;  %v4010_v23 = vpop.f32.mrb[113].mxu0 }
 0x3c3   :  { %v5097_v63 = vmax.f32 %v4010_v23, 0.0 }
 0x3c5   :  { %v10315_v9 = vpack.c.bf16 %v5098_v44, %v5097_v63  ;;  %v9692_v37 = vpop.f32.mrb[114].mxu0 }
 0x3c6   :  { %v5100_v50 = vmax.f32 %v9692_v37, 0.0  ;;  %v4020_v58 = vpop.f32.mrb[115].mxu0 }
 0x3c7   :  { %v5099_v31 = vmax.f32 %v4020_v58, 0.0  ;;  %10316 = vmatprep.subr.bf16.mxu1 %v10315_v9 }
 0x3c8   :  { %10318 = vmatpush3.bf16.msra.mxu1 %v10317_v19 }
 0x3c9   :  { %v10319_v0 = vpack.c.bf16 %v5100_v50, %v5099_v31  ;;  %v9695_v60 = vpop.f32.mrb[116].mxu0 }
 0x3ca   :  { %v5102_v38 = vmax.f32 %v9695_v60, 0.0  ;;  %v4030_v47 = vpop.f32.mrb[117].mxu0 }
 0x3cb   :  { %v5101_v21 = vmax.f32 %v4030_v47, 0.0  ;;  %10320 = vmatprep.subr.bf16.mxu1 %v10319_v0 }
 0x3cc   :  { %10322 = vmatpush3.bf16.msra.mxu1 %v10321_v11 }
 0x3cd   :  { %v10323_v53 = vpack.c.bf16 %v5102_v38, %v5101_v21  ;;  %v9698_v45 = vpop.f32.mrb[118].mxu0 }
 0x3ce   :  { %v5104_v6 = vmax.f32 %v9698_v45, 0.0  ;;  %v4040_v4 = vpop.f32.mrb[119].mxu0 }
 0x3cf   :  { %v5103_v34 = vmax.f32 %v4040_v4, 0.0  ;;  %10324 = vmatprep.subr.bf16.mxu1 %v10323_v53 }
 0x3d0   :  { %10326 = vmatpush3.bf16.msra.mxu1 %v10325_v51 }
 0x3d1   :  { %v10327_v25 = vpack.c.bf16 %v5104_v6, %v5103_v34  ;;  %v9701_v44 = vpop.f32.mrb[120].mxu0 }
 0x3d2   :  { %v5106_v23 = vmax.f32 %v9701_v44, 0.0  ;;  %v4050_v63 = vpop.f32.mrb[121].mxu0  ;;  %v5263_v44 = vld [vmem:[%s13553_s2 + $0xb0] sm:$0xff] }
 0x3d3   :  { %v5105_v9 = vmax.f32 %v4050_v63, 0.0  ;;  %10328 = vmatprep.subr.bf16.mxu1 %v10327_v25  ;;  %v5296_v63 = vld [vmem:[%s13553_s2 + $0x1b8] sm:$0xff] }
 0x3d4   :  { %10330 = vmatpush3.bf16.msra.mxu1 %v10329_v22 }
 0x3d5   :  { %v10331_v19 = vpack.c.bf16 %v5106_v23, %v5105_v9  ;;  %v9704_v37 = vpop.f32.mrb[122].mxu0 }
 0x3d6   :  { %v5108_v50 = vmax.f32 %v9704_v37, 0.0  ;;  %v4060_v58 = vpop.f32.mrb[123].mxu0 }
 0x3d7   :  { %v5107_v31 = vmax.f32 %v4060_v58, 0.0  ;;  %10332 = vmatprep.subr.bf16.mxu1 %v10331_v19 }
 0x3d8   :  { %10334 = vmatpush3.bf16.msra.mxu1 %v10333_v26 }
 0x3d9   :  { %v10335_v11 = vpack.c.bf16 %v5108_v50, %v5107_v31  ;;  %v9707_v0 = vpop.f32.mrb[124].mxu0 }
 0x3da   :  { %v5110_v60 = vmax.f32 %v9707_v0, 0.0  ;;  %v4070_v38 = vpop.f32.mrb[125].mxu0  ;;  %v13606_v0 = vld [vmem:[#allocation28_spill] sm:$0xff] }
 0x3db   :  { %v5109_v47 = vmax.f32 %v4070_v38, 0.0  ;;  %10336 = vmatprep.subr.bf16.mxu1 %v10335_v11  ;;  %v5301_v11 = vld [vmem:[%s13553_s2 + $0x1e0] sm:$0xff]  ;;  %v13607_v38 = vld [vmem:[#allocation20_spill] sm:$0xff] }
 0x3dc   :  { %10338 = vmatpush3.bf16.msra.mxu1 %v13255_v24 }
 0x3dd   :  { %v10339_v51 = vpack.c.bf16 %v5110_v60, %v5109_v47  ;;  %v9710_v21 = vpop.f32.mrb[126].mxu0  ;;  %v5272_v60 = vld [vmem:[%s13553_s2 + $0xf8] sm:$0xff] }
 0x3de   :  { %v5112_v53 = vmax.f32 %v9710_v21, 0.0  ;;  %v4080_v45 = vpop.f32.mrb[127].mxu0  ;;  %v13608_v47 = vld [vmem:[#allocation29_spill] sm:$0xff]  ;;  %v13610_v21 = vld [vmem:[#allocation30_spill] sm:$0xff] }
 0x3df   :  { %v5111_v22 = vmax.f32 %v4080_v45, 0.0  ;;  %10340 = vmatprep.subr.bf16.mxu1 %v10339_v51  ;;  %v13609_v51 = vld [vmem:[#allocation21_spill] sm:$0xff]  ;;  %v13612_v45 = vld [vmem:[#allocation31_spill] sm:$0xff] }
 0x3e0   :  { %10342 = vmatpush3.bf16.msra.mxu1 %v10341_v48 }
 0x3e1   :  { %v10343_v6 = vpack.c.bf16 %v5112_v53, %v5111_v22  ;;  %v9713_v4 = vpop.f32.mrb[128].mxu0  ;;  %v13611_v53 = vld [vmem:[#allocation22_spill] sm:$0xff]  ;;  %v13613_v22 = vld [vmem:[#allocation23_spill] sm:$0xff] }
 0x3e2   :  { %v5114_v34 = vmax.f32 %v9713_v4, 0.0  ;;  %v4090_v25 = vpop.f32.mrb[129].mxu0  ;;  %v13615_v4 = vld [vmem:[#allocation24_spill] sm:$0xff] }
 0x3e3   :  { %v5113_v26 = vmax.f32 %v4090_v25, 0.0  ;;  %10344 = vmatprep.subr.bf16.mxu1 %v10343_v6  ;;  %v13614_v6 = vld [vmem:[#allocation32_spill] sm:$0xff]  ;;  %v13617_v25 = vld [vmem:[#allocation25_spill] sm:$0xff] }
 0x3e4   :  { %10346 = vmatpush3.bf16.msra.mxu1 %v10345_v40  ;;  %v5295_v40 = vld [vmem:[%s13553_s2 + $0x1b0] sm:$0xff] }
 0x3e5   :  { %v10349_v23 = vpack.c.bf16 %v5114_v34, %v5113_v26  ;;  %v9716_v24 = vpop.f32.mrb[130].mxu0  ;;  %10348 = vmatprep.subr.bf16.mxu1 %v12376_v28  ;;  %v5266_v28 = vld [vmem:[%s13553_s2 + $0xc8] sm:$0xff]  ;;  %v13616_v34 = vld [vmem:[#allocation33_spill] sm:$0xff]  ;;  %v13618_v26 = vld [vmem:[#allocation34_spill] sm:$0xff] }
 0x3e6   :  { %v5116_v48 = vmax.f32 %v9716_v24, 0.0  ;;  %v4100_v9 = vpop.f32.mrb[131].mxu0  ;;  %v5304_v24 = vld [vmem:[%s13553_s2 + $0x1f8] sm:$0xff] }
 0x3e7   :  { %v5115_v19 = vmax.f32 %v4100_v9, 0.0  ;;  %6195 = vmatmul.mubr.f32.vlgmr.msra.gmra.mrb[168].mxu1 %v5263_v44  ;;  %v13619_v44 = vld [vmem:[#allocation26_spill] sm:$0xff] }
 0x3e8   :  { %10350 = vmatpush3.bf16.msra.mxu1 %v10349_v23  ;;  %6199 = vmatprep.mubr.f32.mxu1 %v5296_v63  ;;  %v5271_v23 = vld [vmem:[%s13553_s2 + $0xf0] sm:$0xff] }
 0x3e9   :  { %v10353_v37 = vpack.c.bf16 %v5116_v48, %v5115_v19  ;;  %10352 = vmatprep.subr.bf16.mxu1 %v12388_v46  ;;  %v5303_v63 = vld [vmem:[%s13553_s2 + $0x1f0] sm:$0xff] }
 0x3eb   :  { %6200 = vmatmul.mubr.f32.gmra.mrb[170].mxu1 %v5295_v40 }
 0x3ec   :  { %10354 = vmatpush3.bf16.msra.mxu1 %v10353_v37  ;;  %6269 = vmatprep.mubr.f32.mxu1 %v5266_v28 }
 0x3ed   :  { %10356 = vmatprep.subr.bf16.mxu1 %v12398_v61 }
 0x3f0   :  { %10358 = vmatpush3.bf16.msra.mxu1 %v12298_v3 }
 0x3f1   :  { %10360 = vmatprep.subr.bf16.mxu1 %v12409_v10 }
 0x3f4   :  { %10362 = vmatpush3.bf16.msra.mxu1 %v12316_v32 }
 0x3f5   :  { %10364 = vmatprep.subr.bf16.mxu1 %v12420_v2  ;;  %v5267_v2 = vld [vmem:[%s13553_s2 + $0xd0] sm:$0xff] }
 0x3f8   :  { %10366 = vmatpush3.bf16.msra.mxu1 %v12328_v43  ;;  %v5265_v43 = vld [vmem:[%s13553_s2 + $0xc0] sm:$0xff] }
 0x3f9   :  { %10368 = vmatprep.subr.bf16.mxu1 %v12431_v41  ;;  %v5300_v41 = vld [vmem:[%s13553_s2 + $0x1d8] sm:$0xff] }
 0x3fa   :  { %v8824_v46 = vpop.f32.mrb[156].mxu1 }
 0x3fb   :  { %v8825_v50 = vpop.f32.mrb[157].mxu1 }
 0x3fc   :  { %v8826_v58 = vadd.f32 %v8825_v50, %v8824_v46  ;;  %10370 = vmatpush3.bf16.msra.mxu1 %v12340_v56  ;;  %v5298_v56 = vld [vmem:[%s13553_s2 + $0x1c8] sm:$0xff] }
 0x3fd   :  { %10372 = vmatprep.subr.bf16.mxu1 %v12442_v42  ;;  %v5299_v42 = vld [vmem:[%s13553_s2 + $0x1d0] sm:$0xff] }
 0x3fe   :  { %v5972_v61 = vadd.f32 %v8826_v58, %v13258_v62  ;;  %v8827_v3 = vpop.f32.mrb[158].mxu1  ;;  %v5302_v62 = vld [vmem:[%s13553_s2 + $0x1e8] sm:$0xff]  ;;  %v6505_v58 = vld [vmem:[%s13554_s3] sm:$0xff] }
 0x3ff   :  { %v8828_v31 = vpop.f32.mrb[159].mxu1 }
 0x400   :  { %v8829_v10 = vadd.f32 %v8828_v31, %v8827_v3  ;;  %10374 = vmatpush3.bf16.msra.mxu1 %v12352_v39  ;;  %v5297_v39 = vld [vmem:[%s13553_s2 + $0x1c0] sm:$0xff] }
 0x401   :  { %10376 = vmatprep.subr.bf16.mxu1 %v12453_v7  ;;  %v5270_v7 = vld [vmem:[%s13553_s2 + $0xe8] sm:$0xff] }
 0x402   :  { %v5977_v32 = vadd.f32 %v8829_v10, %v13261_v5  ;;  %v13605_v5 = vld [vmem:[#allocation19_spill] sm:$0xff] }
 0x404   :  { %10378 = vmatpush3.bf16.msra.mxu1 %v12364_v17  ;;  %v5268_v17 = vld [vmem:[%s13553_s2 + $0xd8] sm:$0xff] }
 0x405   :  { %10380 = vmatprep.subr.bf16.mxu1 %v12572_v33 }
 0x407   :  { %6270 = vmatmul.mubr.f32.vlgmr.msra.gmra.mrb[172].mxu1 %v5265_v43  ;;  %v6507_v43 = vld [vmem:[%s13554_s3 + $0x10] sm:$0xff] }
 0x408   :  { %10382 = vmatpush3.bf16.msra.mxu1 %v12464_v16  ;;  %6274 = vmatprep.mubr.f32.mxu1 %v5298_v56  ;;  %v13593_v16 = vld [vmem:[#allocation8_spill] sm:$0xff]  ;;  %v6508_v56 = vld [vmem:[%s13554_s3 + $0x18] sm:$0xff] }
 0x409   :  { %10384 = vmatprep.subr.bf16.mxu1 %v12584_v54  ;;  %v13599_v54 = vld [vmem:[#allocation11_spill] sm:$0xff] }
 0x40b   :  { %6275 = vmatmul.mubr.f32.gmra.mrb[174].mxu1 %v5297_v39 }
 0x40c   :  { %10386 = vmatpush3.bf16.msra.mxu1 %v12475_v30  ;;  %6344 = vmatprep.mubr.f32.mxu1 %v5268_v17  ;;  %v13594_v30 = vld [vmem:[#allocation14_spill] sm:$0xff] }
 0x40d   :  { %10388 = vmatprep.subr.bf16.mxu1 %v12594_v14  ;;  %v13600_v14 = vld [vmem:[#allocation17_spill] sm:$0xff] }
 0x410   :  { %10390 = vmatpush3.bf16.msra.mxu1 %v12494_v29  ;;  %v13595_v29 = vld [vmem:[#allocation9_spill] sm:$0xff] }
 0x411   :  { %10392 = vmatprep.subr.bf16.mxu1 %v12605_v36 }
 0x414   :  { %10394 = vmatpush3.bf16.msra.mxu1 %v12512_v8  ;;  %v13596_v8 = vld [vmem:[#allocation15_spill] sm:$0xff] }
 0x415   :  { %10396 = vmatprep.subr.bf16.mxu1 %v12616_v55 }
 0x418   :  { %10398 = vmatpush3.bf16.msra.mxu1 %v12524_v12  ;;  %v13597_v12 = vld [vmem:[#allocation10_spill] sm:$0xff] }
 0x419   :  { %10400 = vmatprep.subr.bf16.mxu1 %v12627_v57 }
 0x41c   :  { %10402 = vmatpush3.bf16.msra.mxu1 %v12536_v35  ;;  %v13598_v35 = vld [vmem:[#allocation16_spill] sm:$0xff] }
 0x41d   :  { %10404 = vmatprep.subr.bf16.mxu1 %v12638_v49 }
 0x420   :  { %10406 = vmatpush3.bf16.msra.mxu1 %v12548_v52 }
 0x421   :  { %10408 = vmatprep.subr.bf16.mxu1 %v12649_v1  ;;  %v13601_v1 = vld [vmem:[#allocation12_spill] sm:$0xff] }
 0x424   :  { %10410 = vmatpush3.bf16.msra.mxu1 %v12560_v13 }
 0x425   :  { %10412 = vmatprep.subr.bf16.mxu1 %v12768_v59  ;;  %v13603_v59 = vld [vmem:[#allocation13_spill] sm:$0xff] }
 0x427   :  { %6345 = vmatmul.mubr.f32.vlgmr.msra.gmra.mrb[176].mxu1 %v5267_v2  ;;  %v10479_v2 = vpack.c.bf16 %v6508_v56, %v6507_v43 }
 0x428   :  { %10414 = vmatpush3.bf16.msra.mxu1 %v12660_v18  ;;  %6349 = vmatprep.mubr.f32.mxu1 %v5300_v41  ;;  %v13602_v18 = vld [vmem:[#allocation18_spill] sm:$0xff] }
 0x429   :  { %10416 = vmatprep.subr.bf16.mxu1 %v12780_v20  ;;  %v5269_v20 = vld [vmem:[%s13553_s2 + $0xe0] sm:$0xff] }
 0x42b   :  { %6350 = vmatmul.mubr.f32.gmra.mrb[178].mxu1 %v5299_v42 }
 0x42c   :  { %10418 = vmatpush3.bf16.msra.mxu1 %v12671_v27  ;;  %6419 = vmatprep.mubr.f32.mxu1 %v5270_v7 }
 0x42d   :  { %10420 = vmatprep.subr.bf16.mxu1 %v12790_v15  ;;  %v13604_v15 = vld [vmem:[#allocation27_spill] sm:$0xff] }
 0x430   :  { %10422 = vmatpush3.bf16.msra.mxu1 %v13593_v16 }
 0x431   :  { %10424 = vmatprep.subr.bf16.mxu1 %v13594_v30 }
 0x434   :  { %10426 = vmatpush3.bf16.msra.mxu1 %v13595_v29 }
 0x435   :  { %10428 = vmatprep.subr.bf16.mxu1 %v13596_v8 }
 0x438   :  { %10430 = vmatpush3.bf16.msra.mxu1 %v13597_v12 }
 0x439   :  { %10432 = vmatprep.subr.bf16.mxu1 %v13598_v35 }
 0x43a   :  { %v8862_v52 = vpop.f32.mrb[160].mxu1 }
 0x43b   :  { %v8863_v13 = vpop.f32.mrb[161].mxu1 }
 0x43c   :  { %v8864_v33 = vadd.f32 %v8863_v13, %v8862_v52  ;;  %10434 = vmatpush3.bf16.msra.mxu1 %v13599_v54 }
 0x43d   :  { %10436 = vmatprep.subr.bf16.mxu1 %v13600_v14 }
 0x43e   :  { %v6047_v36 = vadd.f32 %v8864_v33, %v5972_v61  ;;  %v8865_v55 = vpop.f32.mrb[162].mxu1  ;;  %v6506_v61 = vld [vmem:[%s13554_s3 + $0x8] sm:$0xff] }
 0x43f   :  { %v8866_v57 = vpop.f32.mrb[163].mxu1  ;;  %v10475_v31 = vpack.c.bf16 %v6506_v61, %v6505_v58  ;;  %v6665_v58 = vld [vmem:[%s13556_s5 + $0x10] sm:$0xff] }
 0x440   :  { %v8867_v49 = vadd.f32 %v8866_v57, %v8865_v55  ;;  %10438 = vmatpush3.bf16.msra.mxu1 %v13601_v1 }
 0x441   :  { %10440 = vmatprep.subr.bf16.mxu1 %v13602_v18 }
 0x442   :  { %v6052_v27 = vadd.f32 %v8867_v49, %v5977_v32 }
 0x444   :  { %10442 = vmatpush3.bf16.msra.mxu1 %v13603_v59 }
 0x445   :  { %10444 = vmatprep.subr.bf16.mxu1 %v13604_v15 }
 0x447   :  { %6420 = vmatmul.mubr.f32.vlgmr.msra.gmra.mrb[180].mxu1 %v5269_v20 }
 0x448   :  { %10446 = vmatpush3.bf16.msra.mxu1 %v13605_v5  ;;  %6424 = vmatprep.mubr.f32.mxu1 %v5302_v62 }
 0x449   :  { %10448 = vmatprep.subr.bf16.mxu1 %v13606_v0 }
 0x44b   :  { %6425 = vmatmul.mubr.f32.gmra.mrb[182].mxu1 %v5301_v11 }
 0x44c   :  { %10450 = vmatpush3.bf16.msra.mxu1 %v13607_v38  ;;  %6494 = vmatprep.mubr.f32.mxu1 %v5272_v60 }
 0x44d   :  { %10452 = vmatprep.subr.bf16.mxu1 %v13608_v47 }
 0x450   :  { %10454 = vmatpush3.bf16.msra.mxu1 %v13609_v51 }
 0x451   :  { %10456 = vmatprep.subr.bf16.mxu1 %v13610_v21 }
 0x454   :  { %10458 = vmatpush3.bf16.msra.mxu1 %v13611_v53 }
 0x455   :  { %10460 = vmatprep.subr.bf16.mxu1 %v13612_v45 }
 0x458   :  { %10462 = vmatpush3.bf16.msra.mxu1 %v13613_v22  ;;  %v7953_v22 = vld [vmem:[%s13555_s4] ss:$0 sm:$0xff] }
 0x459   :  { %10464 = vmatprep.subr.bf16.mxu1 %v13614_v6 }
 0x45c   :  { %10466 = vmatpush3.bf16.msra.mxu1 %v13615_v4 }
 0x45d   :  { %10468 = vmatprep.subr.bf16.mxu1 %v13616_v34 }
 0x460   :  { %10470 = vmatpush3.bf16.msra.mxu1 %v13617_v25 }
 0x461   :  { %10472 = vmatprep.subr.bf16.mxu1 %v13618_v26 }
 0x464   :  { %10474 = vmatpush3.bf16.msra.mxu1 %v13619_v44 }
 0x465   :  { %10476 = vmatprep.subr.bf16.mxu1 %v10475_v31 }
 0x467   :  { %6495 = vmatmul.mubr.f32.vlgmr.msra.gmra.mrb[184].mxu1 %v5271_v23 }
 0x468   :  { %6499 = vmatprep.mubr.f32.mxu1 %v5304_v24  ;;  %10478 = vmatpush3.bf16.msra.mxu1 %v10475_v31  ;;  %v6666_v31 = vld [vmem:[%s13556_s5 + $0x18] sm:$0xff] }
 0x469   :  { %10480 = vmatprep.subr.bf16.mxu1 %v10479_v2 }
 0x46b   :  { %6500 = vmatmul.mubr.f32.gmra.mrb[186].mxu1 %v5303_v63 }
 0x46c   :  { %10482 = vmatpush3.bf16.msra.mxu1 %v10479_v2 }
 0x47a   :  { %v8900_v48 = vpop.f32.mrb[164].mxu1 }
 0x47b   :  { %v8901_v9 = vpop.f32.mrb[165].mxu1 }
 0x47c   :  { %v8902_v19 = vadd.f32 %v8901_v9, %v8900_v48 }
 0x47e   :  { %v6122_v40 = vadd.f32 %v8902_v19, %v6047_v36  ;;  %v8903_v37 = vpop.f32.mrb[166].mxu1 }
 0x47f   :  { %v8904_v28 = vpop.f32.mrb[167].mxu1 }
 0x480   :  { %v8905_v46 = vadd.f32 %v8904_v28, %v8903_v37 }
 0x482   :  { %v6127_v50 = vadd.f32 %v8905_v46, %v6052_v27  ;;  %v6663_v46 = vld [vmem:[%s13556_s5] sm:$0xff] }
 0x4ba   :  { %v8938_v3 = vpop.f32.mrb[168].mxu1 }
 0x4bb   :  { %v8939_v10 = vpop.f32.mrb[169].mxu1 }
 0x4bc   :  { %v8940_v32 = vadd.f32 %v8939_v10, %v8938_v3  ;;  %v10487_v10 = vpack.c.bf16 %v6666_v31, %v6665_v58 }
 0x4be   :  { %v6197_v39 = vadd.f32 %v8940_v32, %v6122_v40  ;;  %v8941_v17 = vpop.f32.mrb[170].mxu1 }
 0x4bf   :  { %v8942_v41 = vpop.f32.mrb[171].mxu1 }
 0x4c0   :  { %v8943_v42 = vadd.f32 %v8942_v41, %v8941_v17 }
 0x4c2   :  { %v6202_v7 = vadd.f32 %v8943_v42, %v6127_v50  ;;  %v6664_v50 = vld [vmem:[%s13556_s5 + $0x8] sm:$0xff] }
 0x4c3   :  { %v10483_v3 = vpack.c.bf16 %v6664_v50, %v6663_v46 }
 0x4c5   :  { %10484 = vmatprep.subr.bf16.mxu1 %v10483_v3 }
 0x4da   :  { %v8976_v16 = vpop.f32.mrb[172].mxu1 }
 0x4db   :  { %v8977_v30 = vpop.f32.mrb[173].mxu1 }
 0x4dc   :  { %v8978_v29 = vadd.f32 %v8977_v30, %v8976_v16 }
 0x4de   :  { %v6272_v8 = vadd.f32 %v8978_v29, %v6197_v39  ;;  %v8979_v12 = vpop.f32.mrb[174].mxu1 }
 0x4df   :  { %v8980_v35 = vpop.f32.mrb[175].mxu1 }
 0x4e0   :  { %v8981_v52 = vadd.f32 %v8980_v35, %v8979_v12 }
 0x4e2   :  { %v6277_v13 = vadd.f32 %v8981_v52, %v6202_v7 }
 0x4fa   :  { %v9014_v33 = vpop.f32.mrb[176].mxu1 }
 0x4fb   :  { %v9015_v54 = vpop.f32.mrb[177].mxu1 }
 0x4fc   :  { %v9016_v14 = vadd.f32 %v9015_v54, %v9014_v33  ;;  %v6811_v54 = vld [vmem:[%s13557_s6] sm:$0xff] }
 0x4fe   :  { %v6347_v36 = vadd.f32 %v9016_v14, %v6272_v8  ;;  %v9017_v55 = vpop.f32.mrb[178].mxu1  ;;  %v6812_v14 = vld [vmem:[%s13557_s6 + $0x8] sm:$0xff] }
 0x4ff   :  { %v9018_v57 = vpop.f32.mrb[179].mxu1 }
 0x500   :  { %v9019_v49 = vadd.f32 %v9018_v57, %v9017_v55  ;;  %v6813_v55 = vld [vmem:[%s13557_s6 + $0x10] sm:$0xff]  ;;  %v6814_v57 = vld [vmem:[%s13557_s6 + $0x18] sm:$0xff] }
 0x502   :  { %v6352_v1 = vadd.f32 %v9019_v49, %v6277_v13  ;;  %v10495_v49 = vpack.c.bf16 %v6814_v57, %v6813_v55 }
 0x51a   :  { %v9052_v18 = vpop.f32.mrb[180].mxu1 }
 0x51b   :  { %v9053_v27 = vpop.f32.mrb[181].mxu1 }
 0x51c   :  { %v9054_v59 = vadd.f32 %v9053_v27, %v9052_v18 }
 0x51e   :  { %v6422_v20 = vadd.f32 %v9054_v59, %v6347_v36  ;;  %v9055_v15 = vpop.f32.mrb[182].mxu1  ;;  %v10491_v36 = vpack.c.bf16 %v6812_v14, %v6811_v54  ;;  %v6960_v14 = vld [vmem:[%s13558_s7 + $0x10] sm:$0xff] }
 0x51f   :  { %v9056_v62 = vpop.f32.mrb[183].mxu1 }
 0x520   :  { %v9057_v5 = vadd.f32 %v9056_v62, %v9055_v15 }
 0x522   :  { %v6427_v11 = vadd.f32 %v9057_v5, %v6352_v1 }
 0x53a   :  { %v9090_v0 = vpop.f32.mrb[184].mxu1 }
 0x53b   :  { %v9091_v60 = vpop.f32.mrb[185].mxu1 }
 0x53c   :  { %v9092_v38 = vadd.f32 %v9091_v60, %v9090_v0 }
 0x53e   :  { %v6497_v47 = vadd.f32 %v9092_v38, %v6422_v20  ;;  %v9093_v51 = vpop.f32.mrb[186].mxu1 }
 0x53f   :  { %v9094_v21 = vpop.f32.mrb[187].mxu1 }
 0x540   :  { %v9095_v53 = vadd.f32 %v9094_v21, %v9093_v51  ;;  %9911 = vmatprep.mubr.msk.f32.mxu1 %vm6516_vm2, %v6497_v47 }
 0x542   :  { %v6502_v45 = vadd.f32 %v9095_v53, %v6427_v11 }
 0x544   :  { %9912 = vmatmul.mubr.msk.f32.vlgmr.msra.gmra.mrb[188].mxu1 %vm6516_vm2, %v6502_v45 }
 0x545   :  { %10486 = vmatpush3.bf16.msra.mxu1 %v10483_v3 }
 0x546   :  { %10488 = vmatprep.subr.bf16.mxu1 %v10487_v10 }
 0x549   :  { %10490 = vmatpush3.bf16.msra.mxu1 %v10487_v10 }
 0x54a   :  { %10492 = vmatprep.subr.bf16.mxu1 %v10491_v36 }
 0x617   :  { %v9913_v6 = vpop.f32.mrb[188].mxu1 }
 0x618   :  { %v6595_v4 = vadd.f32 %v9913_v6, %v7953_v22  ;;  %v6589_v34 = vpop.f32.mrb[189].mxu1 }
 0x619   :  { %v13402_v25 = vadd.f32 %v7953_v22, %v6589_v34 }
 0x61a   :  { %v6619_v26 = vand.u32 2147483647, %v6595_v4  ;;  %v6599_v63 = vmul.f32 %v6595_v4, %v6595_v4  ;;  %v6613_v39 = vmax.f32 %v6595_v4, 0.0  ;;  %vm6615_vm4 = vcmp.ne.f32.partialorder %v6595_v4, %v6595_v4 }
 0x61b   :  { %v6598_v44 = vmul.f32 %v13402_v25, %v13402_v25  ;;  %vm6614_vm8 = vcmp.ne.f32.partialorder %v13402_v25, %v13402_v25 }
 0x61c   :  { %v6621_v23 = vsub.f32 0.0, %v6619_v26  ;;  %v6603_v9 = vsel %vm6516_vm2, %v6599_v63, 0.0 }
 0x61d   :  { %v6600_v24 = vsel %vm6516_vm2, %v6598_v44, 0.0 }
 0x61e   :  { %v6624_v48 = vmul.f32 1.442695, %v6621_v23  ;;  %6601 = vadd.xlane.f32.xlu0 %v6600_v24 }
 0x620   :  { %10545 = vpow2.f32 %v6624_v48 }
 0x622   :  { %6604 = vadd.xlane.f32.xlu0 %v6603_v9 }
 0x62a   :  { %v10546_v19 = vpop.eup %10545 }
 0x62b   :  { %v6635_v40 = vadd.f32 1.0, %v10546_v19  ;;  %v6638_v37 = vmul.f32 -0.5, %v10546_v19  ;;  %v6641_v61 = vand.u32 2147483647, %v10546_v19 }
 0x62d   :  { %10547 = vlog2.f32 %v6635_v40  ;;  %v6639_v28 = vadd.f32 1.0, %v6638_v37  ;;  %vm6642_vm3 = vcmp.lt.f32.partialorder %v6641_v61, 0.0004427343 }
 0x62f   :  { %v6640_v56 = vmul.f32 %v10546_v19, %v6639_v28 }
 0x637   :  { %v10548_v32 = vpop.eup %10547 }
 0x638   :  { %v6637_v43 = vmul.f32 0.6931472, %v10548_v32 }
 0x63a   :  { %v6643_v17 = vsel %vm6642_vm3, %v6640_v56, %v6637_v43  ;;  %v7958_v56 = vld [vmem:[%s13559_s8] ss:$0 sm:$0xff] }
 0x63b   :  { %v6645_v2 = vadd.f32 %v6643_v17, %v6613_v39 }
 0x63d   :  { %v6647_v41 = vsel %vm6615_vm4, %v6595_v4, %v6645_v2  ;;  %v7959_v2 = vld [vmem:[%s13560_s9] ss:$0 sm:$0xff] }
 0x63e   :  { %v13420_v42 = vadd.f32 1.0, %v6647_v41 }
 0x640   :  { %6656 = vrot.lane.b32.xlu0 %v13420_v42, %s10609_s29 }
 0x6ab   :  { %v6602_v7 = vpop.xlane.xlu0 %6601 }
 0x6ac   :  { %v6606_v16 = vadd.f32 1e-12, %v6602_v7 }
 0x6ae   :  { %10549 = vrsqrt.f32 %v6606_v16 }
 0x6af   :  { %v6605_v30 = vpop.xlane.xlu0 %6604 }
 0x6b0   :  { %v6607_v29 = vadd.f32 1e-12, %v6605_v30 }
 0x6b2   :  { %10551 = vrsqrt.f32 %v6607_v29 }
 0x6b3   :  { %v13424_v8 = vpop.permute.xlu0 %6656 }
 0x6b4   :  { %6662 = vst.msk [vmem:[%s13564_s13 + $0x8] sm:$0xff] %vm6660_vm5, %v13424_v8 }
 0x6b8   :  { %v10550_v12 = vpop.eup %10549 }
 0x6b9   :  { %v6610_v35 = vmul.f32 %v10550_v12, %v13402_v25 }
 0x6bb   :  { %9922 = vmatprep.mubr.msk.f32.mxu1 %vm6516_vm2, %v6610_v35  ;;  %6650 = vst.msk [vmem:[#allocation2] sm:$0xff] %vm6516_vm2, %v6610_v35 }
 0x6bc   :  { %v10552_v52 = vpop.eup %10551 }
 0x6bd   :  { %v6611_v13 = vmul.f32 %v10552_v52, %v6595_v4  ;;  %v6958_v52 = vld [vmem:[%s13558_s7] sm:$0xff] }
 0x6bf   :  { %9923 = vmatmul.mubr.msk.f32.vlgmr.msra.gmra.mrb[190].mxu1 %vm6516_vm2, %v6611_v13  ;;  %6651 = vst.msk [vmem:[#allocation2 + $0x8] sm:$0xff] %vm6516_vm2, %v6611_v13  ;;  %v13436_v33 = vmul.f32 %v6611_v13, %v6610_v35  ;;  %v6959_v13 = vld [vmem:[%s13558_s7 + $0x8] sm:$0xff] }
 0x6c0   :  { %10494 = vmatpush3.bf16.msra.mxu1 %v10491_v36  ;;  %v10499_v54 = vpack.c.bf16 %v6959_v13, %v6958_v52  ;;  %v6961_v36 = vld [vmem:[%s13558_s7 + $0x18] sm:$0xff] }
 0x6c1   :  { %10496 = vmatprep.subr.bf16.mxu1 %v10495_v49  ;;  %v10503_v55 = vpack.c.bf16 %v6961_v36, %v6960_v14 }
 0x6c4   :  { %10498 = vmatpush3.bf16.msra.mxu1 %v10495_v49 }
 0x6c5   :  { %10500 = vmatprep.subr.bf16.mxu1 %v10499_v54 }
 0x792   :  { %v9924_v1 = vpop.f32.mrb[190].mxu1 }
 0x793   :  { %v6772_v18 = vsel %vm6516_vm2, %v9924_v1, 0.0  ;;  %v6739_v27 = vpop.f32.mrb[191].mxu1 }
 0x794   :  { %v6773_v59 = vrot.slane %v6772_v18, 4  ;;  %v6750_v20 = vsel %vm6516_vm2, %v6739_v27, 0.0 }
 0x795   :  { %v6751_v15 = vrot.slane %v6750_v20, 4 }
 0x796   :  { %v6774_v62 = vadd.f32 %v6773_v59, %v6772_v18 }
 0x797   :  { %v6752_v5 = vadd.f32 %v6751_v15, %v6750_v20 }
 0x798   :  { %v6775_v11 = vrot.slane %v6774_v62, 2 }
 0x799   :  { %v6753_v0 = vrot.slane %v6752_v5, 2 }
 0x79a   :  { %v6776_v60 = vadd.f32 %v6775_v11, %v6774_v62 }
 0x79b   :  { %v6754_v38 = vadd.f32 %v6753_v0, %v6752_v5 }
 0x79c   :  { %v6777_v47 = vrot.slane %v6776_v60, 1 }
 0x79d   :  { %v6755_v51 = vrot.slane %v6754_v38, 1 }
 0x79e   :  { %v6778_v21 = vadd.f32 %v6777_v47, %v6776_v60 }
 0x79f   :  { %v6756_v53 = vadd.f32 %v6755_v51, %v6754_v38 }
 0x7a0   :  { %v6779_v45 = vmul.f32 0.125, %v6778_v21 }
 0x7a1   :  { %v6758_v22 = vmul.f32 0.125, %v6756_v53 }
 0x7a2   :  { %v6780_v6 = vsub.f32 %v9924_v1, %v6779_v45 }
 0x7a3   :  { %v6759_v4 = vsub.f32 %v6739_v27, %v6758_v22 }
 0x7a4   :  { %v6781_v34 = vmul.f32 %v6780_v6, %v6780_v6 }
 0x7a5   :  { %v6760_v26 = vmul.f32 %v6759_v4, %v6759_v4 }
 0x7a6   :  { %v6782_v44 = vsel %vm6516_vm2, %v6781_v34, 0.0 }
 0x7a7   :  { %v6783_v23 = vrot.slane %v6782_v44, 4  ;;  %v6761_v24 = vsel %vm6516_vm2, %v6760_v26, 0.0 }
 0x7a8   :  { %v6762_v63 = vrot.slane %v6761_v24, 4 }
 0x7a9   :  { %v6784_v48 = vadd.f32 %v6783_v23, %v6782_v44 }
 0x7aa   :  { %v6763_v9 = vadd.f32 %v6762_v63, %v6761_v24 }
 0x7ab   :  { %v6785_v19 = vrot.slane %v6784_v48, 2 }
 0x7ac   :  { %v6764_v40 = vrot.slane %v6763_v9, 2 }
 0x7ad   :  { %v6786_v37 = vadd.f32 %v6785_v19, %v6784_v48 }
 0x7ae   :  { %v6765_v28 = vadd.f32 %v6764_v40, %v6763_v9 }
 0x7af   :  { %v6787_v46 = vrot.slane %v6786_v37, 1 }
 0x7b0   :  { %v6766_v50 = vrot.slane %v6765_v28, 1 }
 0x7b1   :  { %v6788_v58 = vadd.f32 %v6787_v46, %v6786_v37 }
 0x7b2   :  { %v6767_v61 = vadd.f32 %v6766_v50, %v6765_v28 }
 0x7b3   :  { %v6789_v3 = vmul.f32 0.125, %v6788_v58 }
 0x7b4   :  { %v6768_v31 = vmul.f32 0.125, %v6767_v61 }
 0x7b5   :  { %v6790_v10 = vadd.f32 1e-05, %v6789_v3 }
 0x7b6   :  { %v6769_v32 = vadd.f32 1e-05, %v6768_v31 }
 0x7b7   :  { %10553 = vrsqrt.f32 %v6790_v10 }
 0x7b8   :  { %10555 = vrsqrt.f32 %v6769_v32  ;;  %v7962_v32 = vld [vmem:[%s13561_s10] ss:$0 sm:$0xff] }
 0x7c1   :  { %v10554_v43 = vpop.eup %10553 }
 0x7c2   :  { %v10556_v39 = vpop.eup %10555  ;;  %v6792_v17 = vmul.f32 %v10554_v43, %v6780_v6 }
 0x7c3   :  { %v6771_v41 = vmul.f32 %v10556_v39, %v6759_v4  ;;  %v7963_v39 = vld [vmem:[%s13562_s11] ss:$0 sm:$0xff] }
 0x7c4   :  { %v6800_v7 = vmul.f32 %v7958_v56, %v6792_v17 }
 0x7c5   :  { %v6799_v16 = vmul.f32 %v7958_v56, %v6771_v41 }
 0x7c6   :  { %v6808_v30 = vadd.f32 %v7959_v2, %v6800_v7 }
 0x7c7   :  { %v6807_v29 = vadd.f32 %v7959_v2, %v6799_v16 }
 0x7c8   :  { %v6810_v35 = vmax.f32 %v6808_v30, 0.0 }
 0x7c9   :  { %v6809_v12 = vmax.f32 %v6807_v29, 0.0 }
 0x7cb   :  { %9933 = vmatprep.mubr.msk.f32.mxu1 %vm6516_vm2, %v6809_v12 }
 0x7cc   :  { %9934 = vmatmul.mubr.msk.f32.vlgmr.msra.gmra.mrb[192].mxu1 %vm6516_vm2, %v6810_v35 }
 0x7cd   :  { %10502 = vmatpush3.bf16.msra.mxu1 %v10499_v54 }
 0x7ce   :  { %10504 = vmatprep.subr.bf16.mxu1 %v10503_v55 }
 0x7d1   :  { %10506 = vmatpush3.bf16.msra.mxu1 %v10503_v55 }
 0x89f   :  { %v9935_v57 = vpop.f32.mrb[192].mxu1 }
 0x8a0   :  { %v6919_v49 = vsel %vm6516_vm2, %v9935_v57, 0.0  ;;  %v6887_v1 = vpop.f32.mrb[193].mxu1 }
 0x8a1   :  { %v6920_v18 = vrot.slane %v6919_v49, 4  ;;  %v6898_v27 = vsel %vm6516_vm2, %v6887_v1, 0.0 }
 0x8a2   :  { %v6899_v59 = vrot.slane %v6898_v27, 4 }
 0x8a3   :  { %v6921_v20 = vadd.f32 %v6920_v18, %v6919_v49 }
 0x8a4   :  { %v6900_v15 = vadd.f32 %v6899_v59, %v6898_v27 }
 0x8a5   :  { %v6922_v62 = vrot.slane %v6921_v20, 2 }
 0x8a6   :  { %v6901_v5 = vrot.slane %v6900_v15, 2 }
 0x8a7   :  { %v6923_v11 = vadd.f32 %v6922_v62, %v6921_v20 }
 0x8a8   :  { %v6902_v0 = vadd.f32 %v6901_v5, %v6900_v15 }
 0x8a9   :  { %v6924_v60 = vrot.slane %v6923_v11, 1 }
 0x8aa   :  { %v6903_v38 = vrot.slane %v6902_v0, 1 }
 0x8ab   :  { %v6925_v47 = vadd.f32 %v6924_v60, %v6923_v11 }
 0x8ac   :  { %v6904_v51 = vadd.f32 %v6903_v38, %v6902_v0 }
 0x8ad   :  { %v6926_v21 = vmul.f32 0.125, %v6925_v47 }
 0x8ae   :  { %v6905_v53 = vmul.f32 0.125, %v6904_v51 }
 0x8af   :  { %v6927_v45 = vsub.f32 %v9935_v57, %v6926_v21 }
 0x8b0   :  { %v6906_v22 = vsub.f32 %v6887_v1, %v6905_v53 }
 0x8b1   :  { %v6928_v6 = vmul.f32 %v6927_v45, %v6927_v45 }
 0x8b2   :  { %v6907_v4 = vmul.f32 %v6906_v22, %v6906_v22 }
 0x8b3   :  { %v6929_v34 = vsel %vm6516_vm2, %v6928_v6, 0.0 }
 0x8b4   :  { %v6930_v26 = vrot.slane %v6929_v34, 4  ;;  %v6908_v44 = vsel %vm6516_vm2, %v6907_v4, 0.0 }
 0x8b5   :  { %v6909_v23 = vrot.slane %v6908_v44, 4 }
 0x8b6   :  { %v6931_v24 = vadd.f32 %v6930_v26, %v6929_v34 }
 0x8b7   :  { %v6910_v63 = vadd.f32 %v6909_v23, %v6908_v44 }
 0x8b8   :  { %v6932_v48 = vrot.slane %v6931_v24, 2 }
 0x8b9   :  { %v6911_v9 = vrot.slane %v6910_v63, 2 }
 0x8ba   :  { %v6933_v19 = vadd.f32 %v6932_v48, %v6931_v24 }
 0x8bb   :  { %v6912_v40 = vadd.f32 %v6911_v9, %v6910_v63 }
 0x8bc   :  { %v6934_v37 = vrot.slane %v6933_v19, 1 }
 0x8bd   :  { %v6913_v28 = vrot.slane %v6912_v40, 1 }
 0x8be   :  { %v6935_v46 = vadd.f32 %v6934_v37, %v6933_v19  ;;  %v6618_v19 = vand.u32 2147483647, %v13402_v25 }
 0x8bf   :  { %v6914_v50 = vadd.f32 %v6913_v28, %v6912_v40 }
 0x8c0   :  { %v6936_v58 = vmul.f32 0.125, %v6935_v46  ;;  %v6620_v28 = vsub.f32 0.0, %v6618_v19 }
 0x8c1   :  { %v6915_v61 = vmul.f32 0.125, %v6914_v50 }
 0x8c2   :  { %v6937_v3 = vadd.f32 1e-05, %v6936_v58  ;;  %v6622_v46 = vmul.f32 1.442695, %v6620_v28 }
 0x8c3   :  { %v6916_v31 = vadd.f32 1e-05, %v6915_v61 }
 0x8c4   :  { %10557 = vrsqrt.f32 %v6937_v3 }
 0x8c5   :  { %10559 = vrsqrt.f32 %v6916_v31 }
 0x8ce   :  { %v10558_v10 = vpop.eup %10557 }
 0x8cf   :  { %v10560_v43 = vpop.eup %10559  ;;  %v6939_v56 = vmul.f32 %v10558_v10, %v6927_v45 }
 0x8d0   :  { %v6918_v17 = vmul.f32 %v10560_v43, %v6906_v22 }
 0x8d1   :  { %v6947_v2 = vmul.f32 %v7962_v32, %v6939_v56 }
 0x8d2   :  { %v6946_v41 = vmul.f32 %v7962_v32, %v6918_v17 }
 0x8d3   :  { %v6955_v7 = vadd.f32 %v7963_v39, %v6947_v2 }
 0x8d4   :  { %v6954_v16 = vadd.f32 %v7963_v39, %v6946_v41 }
 0x8d5   :  { %v6957_v29 = vmax.f32 %v6955_v7, 0.0 }
 0x8d6   :  { %v6956_v30 = vmax.f32 %v6954_v16, 0.0 }
 0x8d8   :  { %9944 = vmatprep.mubr.msk.f32.mxu1 %vm6516_vm2, %v6956_v30 }
 0x8d9   :  { %9945 = vmatmul.mubr.msk.f32.vlgmr.msra.gmra.mrb[194].mxu1 %vm6516_vm2, %v6957_v29 }
 0x9ac   :  { %v9946_v12 = vpop.f32.mrb[194].mxu1 }
 0x9ad   :  { %v7064_v35 = vsel %vm6516_vm2, %v9946_v12, 0.0  ;;  %v7034_v52 = vpop.f32.mrb[195].mxu1 }
 0x9ae   :  { %v7065_v13 = vrot.slane %v7064_v35, 4  ;;  %v7043_v54 = vsel %vm6516_vm2, %v7034_v52, 0.0 }
 0x9af   :  { %v7044_v14 = vrot.slane %v7043_v54, 4 }
 0x9b0   :  { %v7066_v36 = vadd.f32 %v7065_v13, %v7064_v35 }
 0x9b1   :  { %v7045_v55 = vadd.f32 %v7044_v14, %v7043_v54 }
 0x9b2   :  { %v7067_v57 = vrot.slane %v7066_v36, 2 }
 0x9b3   :  { %v7046_v49 = vrot.slane %v7045_v55, 2 }
 0x9b4   :  { %v7068_v1 = vadd.f32 %v7067_v57, %v7066_v36 }
 0x9b5   :  { %v7047_v18 = vadd.f32 %v7046_v49, %v7045_v55  ;;  %v7311_v49 = vsel %vm6516_vm2, %v13436_v33, 0.0 }
 0x9b6   :  { %v7069_v27 = vrot.slane %v7068_v1, 1 }
 0x9b7   :  { %v7048_v59 = vrot.slane %v7047_v18, 1 }
 0x9b8   :  { %v7070_v20 = vadd.f32 %v7069_v27, %v7068_v1 }
 0x9b9   :  { %v7049_v15 = vadd.f32 %v7048_v59, %v7047_v18  ;;  %v6612_v18 = vmax.f32 %v13402_v25, 0.0 }
 0x9ba   :  { %v7071_v62 = vmul.f32 0.125, %v7070_v20 }
 0x9bb   :  { %v7050_v5 = vmul.f32 0.125, %v7049_v15 }
 0x9bc   :  { %v7072_v11 = vsub.f32 %v9946_v12, %v7071_v62 }
 0x9bd   :  { %v7051_v0 = vsub.f32 %v7034_v52, %v7050_v5 }
 0x9be   :  { %v7073_v60 = vmul.f32 %v7072_v11, %v7072_v11 }
 0x9bf   :  { %v7052_v38 = vmul.f32 %v7051_v0, %v7051_v0 }
 0x9c0   :  { %v7074_v47 = vsel %vm6516_vm2, %v7073_v60, 0.0 }
 0x9c1   :  { %v7075_v51 = vrot.slane %v7074_v47, 4  ;;  %v7053_v21 = vsel %vm6516_vm2, %v7052_v38, 0.0 }
 0x9c2   :  { %v7054_v53 = vrot.slane %v7053_v21, 4 }
 0x9c3   :  { %v7076_v45 = vadd.f32 %v7075_v51, %v7074_v47 }
 0x9c4   :  { %v7055_v22 = vadd.f32 %v7054_v53, %v7053_v21 }
 0x9c5   :  { %v7077_v6 = vrot.slane %v7076_v45, 2 }
 0x9c6   :  { %v7056_v4 = vrot.slane %v7055_v22, 2 }
 0x9c7   :  { %v7078_v34 = vadd.f32 %v7077_v6, %v7076_v45 }
 0x9c8   :  { %v7057_v26 = vadd.f32 %v7056_v4, %v7055_v22 }
 0x9c9   :  { %v7079_v44 = vrot.slane %v7078_v34, 1 }
 0x9ca   :  { %v7058_v23 = vrot.slane %v7057_v26, 1 }
 0x9cb   :  { %v7080_v24 = vadd.f32 %v7079_v44, %v7078_v34 }
 0x9cc   :  { %v7059_v63 = vadd.f32 %v7058_v23, %v7057_v26 }
 0x9cd   :  { %v7081_v48 = vmul.f32 0.125, %v7080_v24 }
 0x9ce   :  { %v7060_v9 = vmul.f32 0.125, %v7059_v63 }
 0x9cf   :  { %v7082_v40 = vadd.f32 1e-05, %v7081_v48 }
 0x9d0   :  { %v7061_v37 = vadd.f32 1e-05, %v7060_v9 }
 0x9d1   :  { %10561 = vrsqrt.f32 %v7082_v40 }
 0x9d2   :  { %10563 = vrsqrt.f32 %v7061_v37 }
 0x9d3   :  { %10565 = vpow2.f32 %v6622_v46 }
 0x9db   :  { %v10562_v50 = vpop.eup %10561 }
 0x9dc   :  { %v10564_v58 = vpop.eup %10563  ;;  %v7084_v61 = vmul.f32 %v10562_v50, %v7072_v11 }
 0x9dd   :  { %v7063_v3 = vmul.f32 %v10564_v58, %v7051_v0  ;;  %v10566_v56 = vpop.eup %10565 }
 0x9de   :  { %9947 = vmatprep.subr.mxu1 %v7084_v61  ;;  %v6626_v2 = vadd.f32 1.0, %v10566_v56  ;;  %v6629_v12 = vmul.f32 -0.5, %v10566_v56  ;;  %v6632_v36 = vand.u32 2147483647, %v10566_v56 }
 0x9df   :  { %9948 = vmatpush3.msra.mxu1 %v7084_v61  ;;  %7085 = vxpose.xlu1.b32.start.end [1/1] (short) (narrow) %v7063_v3, 32  ;;  %v7219_v31 = vmul.f32 %v7084_v61, %v7063_v3 }
 0x9e0   :  { %10567 = vlog2.f32 %v6626_v2  ;;  %v6630_v54 = vadd.f32 1.0, %v6629_v12  ;;  %vm6633_vm7 = vcmp.lt.f32.partialorder %v6632_v36, 0.0004427343 }
 0x9e1   :  { %v7220_v10 = vsel %vm6516_vm2, %v7219_v31, 0.0 }
 0x9e2   :  { %v7221_v32 = vrot.slane %v7220_v10, 4  ;;  %v6631_v57 = vmul.f32 %v10566_v56, %v6630_v54 }
 0x9e4   :  { %v7222_v43 = vadd.f32 %v7221_v32, %v7220_v10  ;;  %v7293_v32 = vsel %vm6660_vm5, %v13424_v8, 0.0 }
 0x9e6   :  { %v7223_v39 = vrot.slane %v7222_v43, 2 }
 0x9e8   :  { %v7224_v17 = vadd.f32 %v7223_v39, %v7222_v43 }
 0x9ea   :  { %v7225_v41 = vrot.slane %v7224_v17, 1  ;;  %v10568_v13 = vpop.eup %10567 }
 0x9eb   :  { %v6628_v55 = vmul.f32 0.6931472, %v10568_v13 }
 0x9ec   :  { %v7226_v7 = vadd.f32 %v7225_v41, %v7224_v17 }
 0x9ed   :  { %v6634_v1 = vsel %vm6633_vm7, %v6631_v57, %v6628_v55 }
 0x9ee   :  { %v7227_v16 = vmul.f32 0.125, %v7226_v7  ;;  %v6644_v27 = vadd.f32 %v6634_v1, %v6612_v18 }
 0x9f0   :  { %v7970_v30 = vadd.f32 -1.0, %v7227_v16  ;;  %v7263_v52 = vmul.f32 %v7227_v16, %v7227_v16  ;;  %v6646_v59 = vsel %vm6614_vm8, %v13402_v25, %v6644_v27 }
 0x9f1   :  { %v6648_v20 = vadd.f32 1.0, %v6646_v59 }
 0x9f2   :  { %v7229_v29 = vmul.f32 %v7970_v30, %v7970_v30  ;;  %v7264_v14 = vsel %vm7230_vm6, %v7263_v52, 0.0 }
 0x9f3   :  { %v13500_v15 = vadd.f32 %v13420_v42, %v6648_v20 }
 0x9f4   :  { %v7231_v35 = vsel %vm7230_vm6, %v7229_v29, 0.0 }
 0x9f5   :  { %7232 = vadd.xlane.f32.xlu0 %v7231_v35 }
 0x9f9   :  { %7265 = vadd.xlane.f32.xlu0 %v7264_v14 }
 0x9fd   :  { %7312 = vadd.xlane.f32.xlu0 %v7311_v49 }
 0xa09   :  { %6654 = vrot.lane.b32.xlu1 %v6648_v20, %s10609_s29 }
 0xa13   :  { %7329 = vrot.lane.b32.xlu0 %v13500_v15, %s10609_s29 }
 0xa5f   :  { %v7101_v33 = vpop.trf.xlu1 }
 0xa60   :  { %9949 = vmatprep.mubr.msk.f32.mxu1 %vm7117_vm9, %v7101_v33 }
 0xa63   :  { %v7102_v62 = vpop.trf.xlu1 }
 0xa64   :  { %9950 = vmatmul.mubr.msk.f32.vlgmr.msra.gmra.mrb[196].mxu1 %vm7117_vm9, %v7102_v62 }
 0xa67   :  { %v7103_v5 = vpop.trf.xlu1 }
 0xa68   :  { %9952 = vmatprep.mubr.msk.f32.mxu1 %vm7117_vm9, %v7103_v5 }
 0xa6b   :  { %v7104_v11 = vpop.trf.xlu1 }
 0xa6c   :  { %9953 = vmatmul.mubr.msk.f32.gmra.mrb[198].mxu1 %vm7117_vm9, %v7104_v11 }
 0xa7b   :  { %v6655_v0 = vpop.permute.xlu1 %6654 }
 0xa7c   :  { %6661 = vst.msk [vmem:[%s13564_s13] sm:$0xff] %vm6660_vm5, %v6655_v0  ;;  %v7281_v10 = vsel %vm6660_vm5, %v6655_v0, 0.0 }
 0xa82   :  { %v7233_v25 = vpop.xlane.xlu0 %7232 }
 0xa83   :  { %v7234_v42 = vrot.slane %v7233_v25, 4 }
 0xa85   :  { %v7235_v60 = vadd.f32 %v7234_v42, %v7233_v25 }
 0xa86   :  { %v7266_v38 = vpop.xlane.xlu0 %7265 }
 0xa87   :  { %v7236_v47 = vrot.slane %v7235_v60, 2  ;;  %v7267_v56 = vrot.slane %v7266_v38, 4 }
 0xa89   :  { %v7237_v51 = vadd.f32 %v7236_v47, %v7235_v60  ;;  %v7268_v39 = vadd.f32 %v7267_v56, %v7266_v38 }
 0xa8a   :  { %v13508_v21 = vpop.xlane.xlu0 %7312 }
 0xa8b   :  { %v7238_v53 = vrot.slane %v7237_v51, 1  ;;  %v7315_v43 = vsel %vm6660_vm5, %v13508_v21, 0.0  ;;  %v7269_v17 = vrot.slane %v7268_v39, 2 }
 0xa8d   :  { %v7239_v45 = vadd.f32 %v7238_v53, %v7237_v51  ;;  %v7270_v16 = vadd.f32 %v7269_v17, %v7268_v39 }
 0xa8e   :  { %v7330_v22 = vpop.permute.xlu0 %7329 }
 0xa8f   :  { %10513 = vpush %v7239_v45  ;;  %v7332_v6 = vsel %vm6660_vm5, %v7330_v22, 0.0  ;;  %v7271_v12 = vrot.slane %v7270_v16, 1 }
 0xa90   :  { %7333 = vadd.xlane.f32.xlu0 %v7332_v6 }
 0xa91   :  { %v7272_v13 = vadd.f32 %v7271_v12, %v7270_v16 }
 0xac0   :  { %s10514_s13 = spop %10513 }
 0xac1   :  { %v7241_v0 = vstv %s10514_s13 }
 0xb1d   :  { %v7334_v47 = vpop.xlane.xlu0 %7333 }
 0xb1e   :  { %v7335_v53 = vrot.slane %v7334_v47, 4 }
 0xb20   :  { %v7336_v22 = vadd.f32 %v7335_v53, %v7334_v47 }
 0xb37   :  { %v9951_v4 = vpop.f32.mrb[196].mxu1 }
 0xb38   :  { %v7216_v34 = vmul.f32 0.125, %v9951_v4  ;;  %v7196_v26 = vpop.f32.mrb[197].mxu1  ;;  %v7337_v4 = vrot.slane %v7336_v22, 2 }
 0xb39   :  { %v7215_v44 = vmul.f32 0.125, %v7196_v26 }
 0xb3a   :  { %v7243_v23 = vmul.f32 %v7216_v34, %v7216_v34 }
 0xb3b   :  { %v7242_v24 = vmul.f32 %v7215_v44, %v7215_v44  ;;  %v7338_v44 = vadd.f32 %v7337_v4, %v7336_v22 }
 0xb3c   :  { %v7247_v63 = vsel %vm6516_vm2, %v7243_v23, 0.0 }
 0xb3d   :  { %v7246_v48 = vsel %vm6516_vm2, %v7242_v24, 0.0 }
 0xb3e   :  { %v7248_v9 = vadd.f32 %v7247_v63, %v7246_v48 }
 0xb3f   :  { %v9954_v19 = vpop.f32.mrb[198].mxu1 }
 0xb40   :  { %v7218_v40 = vmul.f32 0.125, %v9954_v19  ;;  %v7206_v37 = vpop.f32.mrb[199].mxu1  ;;  %v7339_v19 = vrot.slane %v7338_v44, 1 }
 0xb41   :  { %v7217_v28 = vmul.f32 0.125, %v7206_v37 }
 0xb42   :  { %v7245_v46 = vmul.f32 %v7218_v40, %v7218_v40 }
 0xb43   :  { %v7244_v50 = vmul.f32 %v7217_v28, %v7217_v28  ;;  %v7340_v28 = vadd.f32 %v7339_v19, %v7338_v44 }
 0xb44   :  { %v7251_v3 = vsel %vm6516_vm2, %v7245_v46, 0.0 }
 0xb45   :  { %v7249_v58 = vsel %vm6516_vm2, %v7244_v50, 0.0 }
 0xb46   :  { %v7250_v61 = vadd.f32 %v7249_v58, %v7248_v9 }
 0xb48   :  { %v7252_v31 = vadd.f32 %v7251_v3, %v7250_v61 }
 0xb4a   :  { %7253 = vadd.xlane.f32.xlu1 %v7252_v31 }
 0xb4e   :  { %7282 = vadd.xlane.f32.xlu1 %v7281_v10 }
 0xb52   :  { %7294 = vadd.xlane.f32.xlu1 %v7293_v32 }
 0xb56   :  { %7316 = vadd.xlane.f32.xlu1 %v7315_v43 }
 0xbd7   :  { %v7254_v2 = vpop.xlane.xlu1 %7253 }
 0xbd8   :  { %v7255_v41 = vrot.slane %v7254_v2, 4 }
 0xbda   :  { %v7256_v7 = vadd.f32 %v7255_v41, %v7254_v2 }
 0xbdb   :  { %v7283_v8 = vpop.xlane.xlu1 %7282 }
 0xbdc   :  { %v7257_v30 = vrot.slane %v7256_v7, 2  ;;  %v7284_v14 = vrot.slane %v7283_v8, 4 }
 0xbde   :  { %v7258_v29 = vadd.f32 %v7257_v30, %v7256_v7  ;;  %v7285_v55 = vadd.f32 %v7284_v14, %v7283_v8 }
 0xbdf   :  { %v7295_v54 = vpop.xlane.xlu1 %7294 }
 0xbe0   :  { %v7259_v35 = vrot.slane %v7258_v29, 1  ;;  %v7296_v36 = vrot.slane %v7295_v54, 4  ;;  %v7286_v49 = vrot.slane %v7285_v55, 2 }
 0xbe2   :  { %v7260_v52 = vadd.f32 %v7259_v35, %v7258_v29  ;;  %v7297_v57 = vadd.f32 %v7296_v36, %v7295_v54  ;;  %v7287_v18 = vadd.f32 %v7286_v49, %v7285_v55 }
 0xbe3   :  { %v7317_v38 = vpop.xlane.xlu1 %7316 }
 0xbe4   :  { %10515 = vpush %v7260_v52  ;;  %v7298_v1 = vrot.slane %v7297_v57, 2  ;;  %v7288_v62 = vrot.slane %v7287_v18, 1  ;;  %v7318_v51 = vrot.slane %v7317_v38, 4 }
 0xbe5   :  { %10517 = vpush %v7272_v13 }
 0xbe6   :  { %v7299_v59 = vadd.f32 %v7298_v1, %v7297_v57  ;;  %v7289_v42 = vadd.f32 %v7288_v62, %v7287_v18  ;;  %v7319_v45 = vadd.f32 %v7318_v51, %v7317_v38 }
 0xbe8   :  { %v7300_v11 = vrot.slane %v7299_v59, 1  ;;  %v7320_v6 = vrot.slane %v7319_v45, 2 }
 0xbea   :  { %v7301_v60 = vadd.f32 %v7300_v11, %v7299_v59  ;;  %v7321_v34 = vadd.f32 %v7320_v6, %v7319_v45 }
 0xbec   :  { %v7322_v48 = vrot.slane %v7321_v34, 1 }
 0xbee   :  { %v7323_v37 = vadd.f32 %v7322_v48, %v7321_v34 }
 0xc15   :  { %s10516_s30 = spop %10515 }
 0xc16   :  { %v7262_v27 = vstv %s10516_s30  ;;  %s10518_s1 = spop %10517 }
 0xc17   :  { %v7274_v20 = vstv %s10518_s1 }
 0xc18   :  { %v7275_v33 = vsub.f32 %v7262_v27, %v7274_v20 }
 0xc1a   :  { %v7276_v5 = vmul.f32 0.0051, %v7275_v33 }
 0xc1c   :  { %v7277_v25 = vadd.f32 %v7276_v5, %v7241_v0 }
 0xc1e   :  { %10519 = vpush %v7277_v25 }
 0xc1f   :  { %10521 = vpush %v7289_v42 }
 0xc20   :  { %10523 = vpush %v7301_v60 }
 0xc4f   :  { %s10520_s15 = spop %10519 }
 0xc50   :  { %7280 = sst [smem:[#allocation5]] %s10520_s15  ;;  %s10522_s16 = spop %10521 }
 0xc51   :  { %v7291_v26 = vstv %s10522_s16  ;;  %s10524_s17 = spop %10523 }
 0xc52   :  { %v7292_v23 = vmul.f32 0.125, %v7291_v26  ;;  %v7303_v24 = vstv %s10524_s17 }
 0xc53   :  { %v7304_v63 = vmul.f32 0.125, %v7303_v24 }
 0xc55   :  { %v7305_v9 = vadd.f32 %v7304_v63, %v7292_v23 }
 0xc57   :  { %v7306_v40 = vmul.f32 0.0, %v7305_v9 }
 0xc59   :  { %10525 = vpush %v7306_v40 }
 0xc5a   :  { %10527 = vpush %v7323_v37 }
 0xc5b   :  { %10529 = vpush %v7340_v28 }
 0xc8a   :  { %s10526_s18 = spop %10525 }
 0xc8b   :  { %7309 = sst [smem:[#allocation5 + $0x1]] %s10526_s18  ;;  %s10528_s2 = spop %10527 }
 0xc8c   :  { %v7325_v46 = vstv %s10528_s2  ;;  %s10530_s19 = spop %10529 }
 0xc8d   :  { %v7326_v50 = vmul.f32 0.125, %v7325_v46  ;;  %v7342_v58 = vstv %s10530_s19 }
 0xc8e   :  { %v7343_v61 = vmul.f32 0.125, %v7342_v58 }
 0xc8f   :  { %v7327_v3 = vsub.f32 %v13508_v21, %v7326_v50 }
 0xc90   :  { %v7344_v31 = vsub.f32 %v13500_v15, %v7343_v61 }
 0xc91   :  { %v7362_v10 = vmul.f32 %v7327_v3, %v7327_v3 }
 0xc92   :  { %v7345_v32 = vmul.f32 %v7344_v31, %v7327_v3  ;;  %v7375_v56 = vmul.f32 %v7344_v31, %v7344_v31 }
 0xc93   :  { %v7363_v43 = vsel %vm6660_vm5, %v7362_v10, 0.0 }
 0xc94   :  { %7347 = vrot.lane.b32.xlu1 %v7345_v32, %s10609_s29  ;;  %7364 = vadd.xlane.f32.xlu0 %v7363_v43 }
 0xc98   :  { %7377 = vrot.lane.b32.xlu1 %v7375_v56, %s10609_s29  ;;  %s10610_s29 = smov [#allocation2]  }
 0xc99   :  { %s7412_s20 = sshll.u32 %s10610_s29, 4  ;;  %s7413_s20 = int_to_ptr.vmem [resolvable:$true] %s7412_s20 }
 0xc9a   :  { %s10573_s6 = scalar_lea.vmem %s7413_s20, 256  ;;  %p10578_p1 = scmp.lt.s32.totalorder %s7413_s20, %s7413_s20 }
 0xc9b   :  { %p10574_p0 = scmp.ne.s32.totalorder %s7413_s20, %s10573_s6  ;;  %p10579_p2 = scmp.lt.s32.totalorder %s10573_s6, %s10573_s6 }
 0xc9d   :  { %p10580_p3 = por %p10579_p2, %p10578_p1 }
 0xc9f   :  { %p10581_p4 = pnand %p10580_p3, %p10574_p0 }
 0xd06   :  { %v7348_v39 = vpop.permute.xlu1 %7347 }
 0xd07   :  { %v7350_v17 = vsel %vm6660_vm5, %v7348_v39, 0.0 }
 0xd08   :  { %7351 = vadd.xlane.f32.xlu1 %v7350_v17 }
 0xd0a   :  { %v7378_v2 = vpop.permute.xlu1 %7377 }
 0xd0b   :  { %v7380_v41 = vsel %vm6660_vm5, %v7378_v2, 0.0 }
 0xd0c   :  { %7381 = vadd.xlane.f32.xlu0 %v7380_v41 }
 0xd21   :  { %v7365_v21 = vpop.xlane.xlu0 %7364 }
 0xd22   :  { %v7366_v15 = vrot.slane %v7365_v21, 4 }
 0xd24   :  { %v7367_v7 = vadd.f32 %v7366_v15, %v7365_v21 }
 0xd26   :  { %v7368_v16 = vrot.slane %v7367_v7, 2 }
 0xd28   :  { %v7369_v52 = vadd.f32 %v7368_v16, %v7367_v7 }
 0xd2a   :  { %v7370_v36 = vrot.slane %v7369_v52, 1 }
 0xd2c   :  { %v7371_v18 = vadd.f32 %v7370_v36, %v7369_v52 }
 0xd95   :  { %v7352_v30 = vpop.xlane.xlu1 %7351 }
 0xd96   :  { %v7353_v29 = vrot.slane %v7352_v30, 4 }
 0xd98   :  { %v7354_v12 = vadd.f32 %v7353_v29, %v7352_v30 }
 0xd99   :  { %v7382_v35 = vpop.xlane.xlu0 %7381 }
 0xd9a   :  { %v7355_v13 = vrot.slane %v7354_v12, 2  ;;  %v7383_v8 = vrot.slane %v7382_v35, 4 }
 0xd9c   :  { %v7356_v54 = vadd.f32 %v7355_v13, %v7354_v12  ;;  %v7384_v14 = vadd.f32 %v7383_v8, %v7382_v35 }
 0xd9e   :  { %v7385_v55 = vrot.slane %v7384_v14, 2  ;;  %v7357_v57 = vrot.slane %v7356_v54, 1 }
 0xda0   :  { %v7386_v49 = vadd.f32 %v7385_v55, %v7384_v14  ;;  %v7358_v1 = vadd.f32 %v7357_v57, %v7356_v54 }
 0xda2   :  { %10531 = vpush %v7358_v1  ;;  %v7387_v27 = vrot.slane %v7386_v49, 1 }
 0xda3   :  { %10533 = vpush %v7371_v18 }
 0xda4   :  { %v7388_v59 = vadd.f32 %v7387_v27, %v7386_v49 }
 0xda6   :  { %10535 = vpush %v7388_v59 }
 0xda7   :  { %10584 = shalt.err (!%p10581_p4)
}
 0xda8   :  { %s10585_s22 = scalar_lea.hbm %s13563_s12, 256 }
 0xda9   :  { %p10586_p5 = scmp.ne.s32.totalorder %s13563_s12, %s10585_s22  ;;  %p10589_p6 = scmp.lt.u32.totalorder %s10585_s22, %s13563_s12 }
 0xdab   :  { %p10591_p7 = pnand %p10589_p6, %p10586_p5 }
 0xdad   :  { %10594 = shalt.err (!%p10591_p7)
}
 0xdae   :  { %s10611_s9 = smov 128   ;;  %s10612_s0 = smov 8  }
 0xdaf   :  { %7418 = dma.vmem_to_hbm [thread:$0]  %s7413_s20, 256, %s13563_s12, [#allocation3], %s10611_s9, %s10611_s9, %s10612_s0  }
 0xdb0   :  { %s10595_s11 = scalar_lea.hbm %s13565_s14, 16 }
 0xdb1   :  { %p10596_p8 = scmp.ne.s32.totalorder %s13565_s14, %s10595_s11  ;;  %p10599_p9 = scmp.lt.u32.totalorder %s10595_s11, %s13565_s14 }
 0xdb3   :  { %p10601_p10 = pnand %p10599_p9, %p10596_p8 }
 0xdd3   :  { %s10532_s7 = spop %10531 }
 0xdd4   :  { %s10534_s27 = spop %10533  ;;  %v7360_v51 = vstv %s10532_s7 }
 0xdd5   :  { %v7373_v20 = vstv %s10534_s27  ;;  %v7361_v53 = vmul.f32 0.125, %v7360_v51 }
 0xdd6   :  { %v7374_v62 = vmul.f32 0.125, %v7373_v20 }
 0xdd7   :  { %s10536_s28 = spop %10535  ;;  %v7401_v45 = vmul.f32 0.001, %v7361_v53 }
 0xdd8   :  { %v7390_v33 = vstv %s10536_s28 }
 0xdd9   :  { %v7391_v5 = vmul.f32 0.125, %v7390_v33 }
 0xddb   :  { %v7392_v11 = vmul.f32 %v7391_v5, %v7374_v62 }
 0xddd   :  { %v7393_v0 = vadd.f32 1e-12, %v7392_v11 }
 0xddf   :  { %10569 = vrsqrt.f32 %v7393_v0  ;;  %vm7396_vm10 = vcmp.eq.f32.partialorder %v7393_v0, inf  ;;  %v7399_v60 = vand.u32 2147483648, %v7393_v0  ;;  %vm7398_vm11 = vcmp.eq.f32.partialorder %v7393_v0, 0.0 }
 0xde9   :  { %v10570_v25 = vpop.eup %10569 }
 0xdea   :  { %v7395_v42 = vmul.f32 %v10570_v25, %v7393_v0 }
 0xdec   :  { %v7397_v38 = vsel %vm7396_vm10, %v7393_v0, %v7395_v42 }
 0xded   :  { %v7400_v47 = vsel %vm7398_vm11, %v7399_v60, %v7397_v38 }
 0xdee   :  { %10571 = vrcp.f32 %v7400_v47 }
 0xdf8   :  { %v10572_v22 = vpop.eup %10571 }
 0xdf9   :  { %v7403_v6 = vmul.f32 %v10572_v22, %v7401_v45 }
 0xdfb   :  { %10537 = vpush %v7403_v6 }
 0xe2c   :  { %s10538_s12 = spop %10537 }
 0xe2d   :  { %7406 = sst [smem:[#allocation5 + $0x2]] %s10538_s12 }
 0xe2e   :  { %10604 = shalt.err (!%p10601_p10)
}
 0xe2f   :  { %s10613_s16 = smov [#allocation5]  }
 0xe30   :  { %7428 = dma.smem_to_hbm %s10613_s16, 16, %s13565_s14, [#allocation4]  }
 0xe31   :  { %10605 = dma.done.wait [#allocation3], 256  }
 0xe32   :  { %10606 = vsyncadd [#allocation3], 4294967040 }
 0xe33   :  { %10607 = dma.done.wait [#allocation4], 16  }
 0xe34   :  { %10608 = vsyncadd [#allocation4], 4294967280 }
 0xe35   :  { %7437 = sfence }
 0xe36   :  { %7438 = vsyncpa [#allocation3], 1 }
 0xe37   :  { %7439 = vsyncpa [#allocation4], 1 }

</bundles_post_ra>
